<compile_context>
chip_gen: v6e
topology: v6e:2x2x1
jax: 0.10.0
libtpu: 0.0.40
codegen_flags: <defaults>
</compile_context>

<pallas_src>
import functools

import jax
import jax.numpy as jnp
import numpy as np
from jax.experimental import pallas as pl
from jax.experimental.pallas import tpu as pltpu


def _transition_up_kernel(x_ref, w_ref, b_ref, skip_ref, out_ref, xpad_ref,
                          *, r0, c0, h, w, hs, ws, cin, cout, cskip):
    # x_ref   : (1, H, W, Cin)        bf16 input (unpadded)
    # w_ref   : (9, Cin, Cout)        bf16 spatially-flipped ConvTranspose weights
    # b_ref   : (1, Cout)             f32 bias
    # skip_ref: (1, Hs, Ws, Cskip)
    # out_ref : (1, Hs, Ws, Cout + Cskip)
    # xpad_ref: (H+4, W+4, Cin)       bf16 VMEM scratch (in-kernel zero padding)

    # Build the zero-padded input in VMEM (full padding = 2 of the stride-1
    # transposed conv). Cheap VMEM-only traffic instead of an HBM jnp.pad.
    xpad_ref[...] = jnp.zeros_like(xpad_ref)
    xpad_ref[2:2 + h, 2:2 + w, :] = x_ref[0]

    # 9 shifted taps; the center-crop offset (r0, c0) is folded into the
    # window start. bf16 x bf16 matmuls, fp32 accumulation, DEFAULT precision.
    acc = None
    for kh in range(3):
        for kw in range(3):
            win = xpad_ref[r0 + kh:r0 + kh + hs, c0 + kw:c0 + kw + ws, :]
            p = jnp.dot(win.reshape(hs * ws, cin), w_ref[kh * 3 + kw],
                        preferred_element_type=jnp.float32)
            acc = p if acc is None else acc + p
    acc = acc + b_ref[...]                        # (1, Cout) broadcasts over rows

    # Two slice stores instead of an in-kernel concatenate.
    out_ref[0, :, :, 0:cout] = acc.reshape(hs, ws, cout).astype(out_ref.dtype)
    out_ref[0, :, :, cout:cout + cskip] = skip_ref[0].astype(out_ref.dtype)


def transition_up(x_nchw, skip_nchw, weight, bias):
    """TransitionUp forward (transConv mode).

    x_nchw   : (N, Cin, H, W)      float32
    skip_nchw: (N, Cskip, Hs, Ws)  float32
    weight   : (Cin, Cout, 3, 3)   nn.ConvTranspose2d weight layout
    bias     : (Cout,)
    returns  : (N, Cout + Cskip, Hs, Ws)
    """
    n, cin, h, w = x_nchw.shape
    _, cskip, hs, ws = skip_nchw.shape
    cout = weight.shape[1]

    # transposed-conv output size and center-crop offsets (floor, as in the
    # module's center_crop).
    ho, wo = h + 2, w + 2
    r0 = (ho - hs) // 2
    c0 = (wo - ws) // 2

    # Boundary layout glue (interface is NCHW to match PyTorch); the x
    # transpose fuses with the bf16 downcast in XLA.
    # TODO(synk): if the surrounding model is kept NHWC end-to-end these
    # transposes disappear entirely.
    x_nhwc = jnp.transpose(x_nchw, (0, 2, 3, 1)).astype(jnp.bfloat16)
    skip_nhwc = jnp.transpose(skip_nchw, (0, 2, 3, 1))

    # ConvTranspose(stride=1, pad=0) == cross-correlation with the spatially
    # flipped kernel:  w_flip[kh*3+kw, ci, co] = weight[ci, co, 2-kh, 2-kw]
    w_flip = jnp.transpose(weight[:, :, ::-1, ::-1],
                           (2, 3, 0, 1)).reshape(9, cin, cout).astype(jnp.bfloat16)
    b2 = bias.reshape(1, cout).astype(jnp.float32)

    ctot = cout + cskip
    kernel = functools.partial(_transition_up_kernel, r0=r0, c0=c0, h=h, w=w,
                               hs=hs, ws=ws, cin=cin, cout=cout, cskip=cskip)

    out_nhwc = pl.pallas_call(
        kernel,
        out_shape=jax.ShapeDtypeStruct((n, hs, ws, ctot), skip_nchw.dtype),
        grid_spec=pltpu.PrefetchScalarGridSpec(
            num_scalar_prefetch=0,
            grid=(n,),
            in_specs=[
                pl.BlockSpec((1, h, w, cin), lambda i: (i, 0, 0, 0)),
                pl.BlockSpec((9, cin, cout), lambda i: (0, 0, 0)),
                pl.BlockSpec((1, cout), lambda i: (0, 0)),
                pl.BlockSpec((1, hs, ws, cskip), lambda i: (i, 0, 0, 0)),
            ],
            out_specs=pl.BlockSpec((1, hs, ws, ctot), lambda i: (i, 0, 0, 0)),
            scratch_shapes=[pltpu.VMEM((h + 4, w + 4, cin), jnp.bfloat16)],
        ),
        compiler_params=pltpu.CompilerParams(
            dimension_semantics=("parallel",)),
    )(x_nhwc, w_flip, b2, skip_nhwc)

    return jnp.transpose(out_nhwc, (0, 3, 1, 2))


def _reference(x, skip, weight, bias):
    """Pure-JAX fp32 reference of the PyTorch forward (NCHW)."""
    w_t = jnp.transpose(weight, (1, 0, 2, 3))[:, :, ::-1, ::-1]   # (Cout, Cin, 3, 3)
    full = jax.lax.conv_general_dilated(
        x, w_t, window_strides=(1, 1), padding=((2, 2), (2, 2)),
        dimension_numbers=('NCHW', 'OIHW', 'NCHW'),
        precision=jax.lax.Precision.HIGHEST)
    full = full + bias[None, :, None, None]
    hs, ws = skip.shape[2], skip.shape[3]
    ho, wo = full.shape[2], full.shape[3]
    r0 = (ho - hs) // 2
    c0 = (wo - ws) // 2
    crop = full[:, :, r0:r0 + hs, c0:c0 + ws]
    return jnp.concatenate([crop, skip], axis=1)


if __name__ == "__main__":
    key = jax.random.PRNGKey(0)
    k1, k2, k3, k4 = jax.random.split(key, 4)

    N, Cin, Cout, Cskip, H, W = 2, 4, 4, 4, 16, 16
    x = jax.random.normal(k1, (N, Cin, H, W), jnp.float32)
    skip = jax.random.normal(k2, (N, Cskip, H, W), jnp.float32)
    # deterministic ConvTranspose2d parameters (PyTorch weight layout (Cin, Cout, kH, kW))
    weight = 0.1 * jax.random.normal(k3, (Cin, Cout, 3, 3), jnp.float32)
    bias = 0.1 * jax.random.normal(k4, (Cout,), jnp.float32)

    out = transition_up(x, skip, weight, bias)
    out = jax.block_until_ready(out)

    ref = _reference(x, skip, weight, bias)
    assert out.shape == (N, Cout + Cskip, H, W), out.shape
    # Tolerance accounts for bf16 inputs / fp32 accumulation on the MXU
    # (reference is fp32 HIGHEST); skip channels are copied exactly.
    np.testing.assert_allclose(np.asarray(out), np.asarray(ref), rtol=2e-2, atol=2e-2)
    print("KERNEL_OK")
</pallas_src>

<mosaic_0001>
module attributes {stable_mosaic.version = 11 : i64} {
  func.func @_transition_up_kernel(%arg0: i32, %arg1: memref<1x16x16x4xbf16, #tpu.memory_space<vmem>>, %arg2: memref<9x4x4xbf16, #tpu.memory_space<vmem>>, %arg3: memref<1x4xf32, #tpu.memory_space<vmem>>, %arg4: memref<1x16x16x4xf32, #tpu.memory_space<vmem>>, %arg5: memref<1x16x16x8xf32, #tpu.memory_space<vmem>>, %arg6: memref<20x20x4xbf16, #tpu.memory_space<vmem>>) attributes {dimension_semantics = [#tpu.dimension_semantics<parallel>], iteration_bounds = array<i64: 2>, scalar_prefetch = 0 : i64, scratch_operands = 1 : i64, tpu.core_type = #tpu.core_type<tc>, window_params = [{transform_indices = @transform_0, window_bounds = array<i64: 1, 16, 16, 4>}, {pipeline_mode = #tpu.pipeline_mode<synchronous>, transform_indices = @transform_1, window_bounds = array<i64: 9, 4, 4>}, {pipeline_mode = #tpu.pipeline_mode<synchronous>, transform_indices = @transform_2, window_bounds = array<i64: 1, 4>}, {transform_indices = @transform_3, window_bounds = array<i64: 1, 16, 16, 4>}, {transform_indices = @transform_4, window_bounds = array<i64: 1, 16, 16, 8>}]} {
    %cst = arith.constant 0.000000e+00 : bf16
    %0 = vector.broadcast %cst : bf16 to vector<20x20x4xbf16>
    %c0 = arith.constant 0 : index
    %c0_0 = arith.constant 0 : index
    %c0_1 = arith.constant 0 : index
    %1 = vector.load %arg6[%c0, %c0_0, %c0_1] : memref<20x20x4xbf16, #tpu.memory_space<vmem>>, vector<20x20x4xbf16>
    tpu.vector_store %arg6[%c0, %c0_0, %c0_1], %0 {strides = array<i32>} : memref<20x20x4xbf16, #tpu.memory_space<vmem>>, vector<20x20x4xbf16>,
    %c0_2 = arith.constant 0 : index
    %c0_3 = arith.constant 0 : index
    %c0_4 = arith.constant 0 : index
    %c0_5 = arith.constant 0 : index
    %2 = vector.load %arg1[%c0_2, %c0_3, %c0_4, %c0_5] : memref<1x16x16x4xbf16, #tpu.memory_space<vmem>>, vector<1x16x16x4xbf16>
    %3 = vector.shape_cast %2 : vector<1x16x16x4xbf16> to vector<16x16x4xbf16>
    %c2 = arith.constant 2 : index
    %c2_6 = arith.constant 2 : index
    %c0_7 = arith.constant 0 : index
    %4 = vector.load %arg6[%c2, %c2_6, %c0_7] : memref<20x20x4xbf16, #tpu.memory_space<vmem>>, vector<16x16x4xbf16>
    tpu.vector_store %arg6[%c2, %c2_6, %c0_7], %3 {strides = array<i32>} : memref<20x20x4xbf16, #tpu.memory_space<vmem>>, vector<16x16x4xbf16>,
    %c1 = arith.constant 1 : index
    %c1_8 = arith.constant 1 : index
    %c0_9 = arith.constant 0 : index
    %5 = vector.load %arg6[%c1, %c1_8, %c0_9] : memref<20x20x4xbf16, #tpu.memory_space<vmem>>, vector<16x16x4xbf16>
    %6 = vector.shape_cast %5 : vector<16x16x4xbf16> to vector<256x4xbf16>
    %c0_10 = arith.constant 0 : index
    %c0_11 = arith.constant 0 : index
    %c0_12 = arith.constant 0 : index
    %7 = vector.load %arg2[%c0_10, %c0_11, %c0_12] : memref<9x4x4xbf16, #tpu.memory_space<vmem>>, vector<1x4x4xbf16>
    %8 = vector.shape_cast %7 : vector<1x4x4xbf16> to vector<4x4xbf16>
    %cst_13 = arith.constant dense<0.000000e+00> : vector<256x4xf32>
    %9 = tpu.matmul %6, %8, %cst_13 {dimension_numbers = #tpu.dot_dimension_numbers<[1], [0], [0], [1], [0, 0, 1, 1], [], []>} : vector<256x4xbf16>, vector<4x4xbf16>, vector<256x4xf32> -> vector<256x4xf32>
    %c1_14 = arith.constant 1 : index
    %c2_15 = arith.constant 2 : index
    %c0_16 = arith.constant 0 : index
    %10 = vector.load %arg6[%c1_14, %c2_15, %c0_16] : memref<20x20x4xbf16, #tpu.memory_space<vmem>>, vector<16x16x4xbf16>
    %11 = vector.shape_cast %10 : vector<16x16x4xbf16> to vector<256x4xbf16>
    %c1_17 = arith.constant 1 : index
    %c0_18 = arith.constant 0 : index
    %c0_19 = arith.constant 0 : index
    %12 = vector.load %arg2[%c1_17, %c0_18, %c0_19] : memref<9x4x4xbf16, #tpu.memory_space<vmem>>, vector<1x4x4xbf16>
    %13 = vector.shape_cast %12 : vector<1x4x4xbf16> to vector<4x4xbf16>
    %cst_20 = arith.constant dense<0.000000e+00> : vector<256x4xf32>
    %14 = tpu.matmul %11, %13, %cst_20 {dimension_numbers = #tpu.dot_dimension_numbers<[1], [0], [0], [1], [0, 0, 1, 1], [], []>} : vector<256x4xbf16>, vector<4x4xbf16>, vector<256x4xf32> -> vector<256x4xf32>
    %15 = arith.addf %9, %14 : vector<256x4xf32>
    %c1_21 = arith.constant 1 : index
    %c3 = arith.constant 3 : index
    %c0_22 = arith.constant 0 : index
    %16 = vector.load %arg6[%c1_21, %c3, %c0_22] : memref<20x20x4xbf16, #tpu.memory_space<vmem>>, vector<16x16x4xbf16>
    %17 = vector.shape_cast %16 : vector<16x16x4xbf16> to vector<256x4xbf16>
    %c2_23 = arith.constant 2 : index
    %c0_24 = arith.constant 0 : index
    %c0_25 = arith.constant 0 : index
    %18 = vector.load %arg2[%c2_23, %c0_24, %c0_25] : memref<9x4x4xbf16, #tpu.memory_space<vmem>>, vector<1x4x4xbf16>
    %19 = vector.shape_cast %18 : vector<1x4x4xbf16> to vector<4x4xbf16>
    %cst_26 = arith.constant dense<0.000000e+00> : vector<256x4xf32>
    %20 = tpu.matmul %17, %19, %cst_26 {dimension_numbers = #tpu.dot_dimension_numbers<[1], [0], [0], [1], [0, 0, 1, 1], [], []>} : vector<256x4xbf16>, vector<4x4xbf16>, vector<256x4xf32> -> vector<256x4xf32>
    %21 = arith.addf %15, %20 : vector<256x4xf32>
    %c2_27 = arith.constant 2 : index
    %c1_28 = arith.constant 1 : index
    %c0_29 = arith.constant 0 : index
    %22 = vector.load %arg6[%c2_27, %c1_28, %c0_29] : memref<20x20x4xbf16, #tpu.memory_space<vmem>>, vector<16x16x4xbf16>
    %23 = vector.shape_cast %22 : vector<16x16x4xbf16> to vector<256x4xbf16>
    %c3_30 = arith.constant 3 : index
    %c0_31 = arith.constant 0 : index
    %c0_32 = arith.constant 0 : index
    %24 = vector.load %arg2[%c3_30, %c0_31, %c0_32] : memref<9x4x4xbf16, #tpu.memory_space<vmem>>, vector<1x4x4xbf16>
    %25 = vector.shape_cast %24 : vector<1x4x4xbf16> to vector<4x4xbf16>
    %cst_33 = arith.constant dense<0.000000e+00> : vector<256x4xf32>
    %26 = tpu.matmul %23, %25, %cst_33 {dimension_numbers = #tpu.dot_dimension_numbers<[1], [0], [0], [1], [0, 0, 1, 1], [], []>} : vector<256x4xbf16>, vector<4x4xbf16>, vector<256x4xf32> -> vector<256x4xf32>
    %27 = arith.addf %21, %26 : vector<256x4xf32>
    %c2_34 = arith.constant 2 : index
    %c2_35 = arith.constant 2 : index
    %c0_36 = arith.constant 0 : index
    %28 = vector.load %arg6[%c2_34, %c2_35, %c0_36] : memref<20x20x4xbf16, #tpu.memory_space<vmem>>, vector<16x16x4xbf16>
    %29 = vector.shape_cast %28 : vector<16x16x4xbf16> to vector<256x4xbf16>
    %c4 = arith.constant 4 : index
    %c0_37 = arith.constant 0 : index
    %c0_38 = arith.constant 0 : index
    %30 = vector.load %arg2[%c4, %c0_37, %c0_38] : memref<9x4x4xbf16, #tpu.memory_space<vmem>>, vector<1x4x4xbf16>
    %31 = vector.shape_cast %30 : vector<1x4x4xbf16> to vector<4x4xbf16>
    %cst_39 = arith.constant dense<0.000000e+00> : vector<256x4xf32>
    %32 = tpu.matmul %29, %31, %cst_39 {dimension_numbers = #tpu.dot_dimension_numbers<[1], [0], [0], [1], [0, 0, 1, 1], [], []>} : vector<256x4xbf16>, vector<4x4xbf16>, vector<256x4xf32> -> vector<256x4xf32>
    %33 = arith.addf %27, %32 : vector<256x4xf32>
    %c2_40 = arith.constant 2 : index
    %c3_41 = arith.constant 3 : index
    %c0_42 = arith.constant 0 : index
    %34 = vector.load %arg6[%c2_40, %c3_41, %c0_42] : memref<20x20x4xbf16, #tpu.memory_space<vmem>>, vector<16x16x4xbf16>
    %35 = vector.shape_cast %34 : vector<16x16x4xbf16> to vector<256x4xbf16>
    %c5 = arith.constant 5 : index
    %c0_43 = arith.constant 0 : index
    %c0_44 = arith.constant 0 : index
    %36 = vector.load %arg2[%c5, %c0_43, %c0_44] : memref<9x4x4xbf16, #tpu.memory_space<vmem>>, vector<1x4x4xbf16>
    %37 = vector.shape_cast %36 : vector<1x4x4xbf16> to vector<4x4xbf16>
    %cst_45 = arith.constant dense<0.000000e+00> : vector<256x4xf32>
    %38 = tpu.matmul %35, %37, %cst_45 {dimension_numbers = #tpu.dot_dimension_numbers<[1], [0], [0], [1], [0, 0, 1, 1], [], []>} : vector<256x4xbf16>, vector<4x4xbf16>, vector<256x4xf32> -> vector<256x4xf32>
    %39 = arith.addf %33, %38 : vector<256x4xf32>
    %c3_46 = arith.constant 3 : index
    %c1_47 = arith.constant 1 : index
    %c0_48 = arith.constant 0 : index
    %40 = vector.load %arg6[%c3_46, %c1_47, %c0_48] : memref<20x20x4xbf16, #tpu.memory_space<vmem>>, vector<16x16x4xbf16>
    %41 = vector.shape_cast %40 : vector<16x16x4xbf16> to vector<256x4xbf16>
    %c6 = arith.constant 6 : index
    %c0_49 = arith.constant 0 : index
    %c0_50 = arith.constant 0 : index
    %42 = vector.load %arg2[%c6, %c0_49, %c0_50] : memref<9x4x4xbf16, #tpu.memory_space<vmem>>, vector<1x4x4xbf16>
    %43 = vector.shape_cast %42 : vector<1x4x4xbf16> to vector<4x4xbf16>
    %cst_51 = arith.constant dense<0.000000e+00> : vector<256x4xf32>
    %44 = tpu.matmul %41, %43, %cst_51 {dimension_numbers = #tpu.dot_dimension_numbers<[1], [0], [0], [1], [0, 0, 1, 1], [], []>} : vector<256x4xbf16>, vector<4x4xbf16>, vector<256x4xf32> -> vector<256x4xf32>
    %45 = arith.addf %39, %44 : vector<256x4xf32>
    %c3_52 = arith.constant 3 : index
    %c2_53 = arith.constant 2 : index
    %c0_54 = arith.constant 0 : index
    %46 = vector.load %arg6[%c3_52, %c2_53, %c0_54] : memref<20x20x4xbf16, #tpu.memory_space<vmem>>, vector<16x16x4xbf16>
    %47 = vector.shape_cast %46 : vector<16x16x4xbf16> to vector<256x4xbf16>
    %c7 = arith.constant 7 : index
    %c0_55 = arith.constant 0 : index
    %c0_56 = arith.constant 0 : index
    %48 = vector.load %arg2[%c7, %c0_55, %c0_56] : memref<9x4x4xbf16, #tpu.memory_space<vmem>>, vector<1x4x4xbf16>
    %49 = vector.shape_cast %48 : vector<1x4x4xbf16> to vector<4x4xbf16>
    %cst_57 = arith.constant dense<0.000000e+00> : vector<256x4xf32>
    %50 = tpu.matmul %47, %49, %cst_57 {dimension_numbers = #tpu.dot_dimension_numbers<[1], [0], [0], [1], [0, 0, 1, 1], [], []>} : vector<256x4xbf16>, vector<4x4xbf16>, vector<256x4xf32> -> vector<256x4xf32>
    %51 = arith.addf %45, %50 : vector<256x4xf32>
    %c3_58 = arith.constant 3 : index
    %c3_59 = arith.constant 3 : index
    %c0_60 = arith.constant 0 : index
    %52 = vector.load %arg6[%c3_58, %c3_59, %c0_60] : memref<20x20x4xbf16, #tpu.memory_space<vmem>>, vector<16x16x4xbf16>
    %53 = vector.shape_cast %52 : vector<16x16x4xbf16> to vector<256x4xbf16>
    %c8 = arith.constant 8 : index
    %c0_61 = arith.constant 0 : index
    %c0_62 = arith.constant 0 : index
    %54 = vector.load %arg2[%c8, %c0_61, %c0_62] : memref<9x4x4xbf16, #tpu.memory_space<vmem>>, vector<1x4x4xbf16>
    %55 = vector.shape_cast %54 : vector<1x4x4xbf16> to vector<4x4xbf16>
    %cst_63 = arith.constant dense<0.000000e+00> : vector<256x4xf32>
    %56 = tpu.matmul %53, %55, %cst_63 {dimension_numbers = #tpu.dot_dimension_numbers<[1], [0], [0], [1], [0, 0, 1, 1], [], []>} : vector<256x4xbf16>, vector<4x4xbf16>, vector<256x4xf32> -> vector<256x4xf32>
    %57 = arith.addf %51, %56 : vector<256x4xf32>
    %c0_64 = arith.constant 0 : index
    %c0_65 = arith.constant 0 : index
    %58 = vector.load %arg3[%c0_64, %c0_65] : memref<1x4xf32, #tpu.memory_space<vmem>>, vector<1x4xf32>
    %59 = vector.broadcast %58 : vector<1x4xf32> to vector<256x4xf32>
    %60 = arith.addf %57, %59 : vector<256x4xf32>
    %61 = vector.shape_cast %60 : vector<256x4xf32> to vector<16x16x4xf32>
    %c0_66 = arith.constant 0 : index
    %c0_67 = arith.constant 0 : index
    %c0_68 = arith.constant 0 : index
    %c0_69 = arith.constant 0 : index
    %62 = vector.load %arg5[%c0_66, %c0_67, %c0_68, %c0_69] : memref<1x16x16x8xf32, #tpu.memory_space<vmem>>, vector<1x16x16x4xf32>
    %63 = vector.shape_cast %62 : vector<1x16x16x4xf32> to vector<16x16x4xf32>
    %64 = vector.shape_cast %61 : vector<16x16x4xf32> to vector<1x16x16x4xf32>
    tpu.vector_store %arg5[%c0_66, %c0_67, %c0_68, %c0_69], %64 {strides = array<i32>} : memref<1x16x16x8xf32, #tpu.memory_space<vmem>>, vector<1x16x16x4xf32>,
    %c0_70 = arith.constant 0 : index
    %c0_71 = arith.constant 0 : index
    %c0_72 = arith.constant 0 : index
    %c0_73 = arith.constant 0 : index
    %65 = vector.load %arg4[%c0_70, %c0_71, %c0_72, %c0_73] : memref<1x16x16x4xf32, #tpu.memory_space<vmem>>, vector<1x16x16x4xf32>
    %66 = vector.shape_cast %65 : vector<1x16x16x4xf32> to vector<16x16x4xf32>
    %c0_74 = arith.constant 0 : index
    %c0_75 = arith.constant 0 : index
    %c0_76 = arith.constant 0 : index
    %c4_77 = arith.constant 4 : index
    %67 = vector.load %arg5[%c0_74, %c0_75, %c0_76, %c4_77] : memref<1x16x16x8xf32, #tpu.memory_space<vmem>>, vector<1x16x16x4xf32>
    %68 = vector.shape_cast %67 : vector<1x16x16x4xf32> to vector<16x16x4xf32>
    %69 = vector.shape_cast %66 : vector<16x16x4xf32> to vector<1x16x16x4xf32>
    tpu.vector_store %arg5[%c0_74, %c0_75, %c0_76, %c4_77], %69 {strides = array<i32>} : memref<1x16x16x8xf32, #tpu.memory_space<vmem>>, vector<1x16x16x4xf32>,
    return
  }
  func.func @transform_0(%arg0: i32) -> (i32, i32, i32, i32) {
    %c0_i32 = arith.constant 0 : i32
    %c0_i32_0 = arith.constant 0 : i32
    %c0_i32_1 = arith.constant 0 : i32
    %c0_i32_2 = arith.constant 0 : i32
    return %arg0, %c0_i32, %c0_i32_0, %c0_i32_1 : i32, i32, i32, i32
  }
  func.func @transform_1(%arg0: i32) -> (i32, i32, i32) {
    %c0_i32 = arith.constant 0 : i32
    %c0_i32_0 = arith.constant 0 : i32
    %c0_i32_1 = arith.constant 0 : i32
    %c0_i32_2 = arith.constant 0 : i32
    return %c0_i32, %c0_i32_0, %c0_i32_1 : i32, i32, i32
  }
  func.func @transform_2(%arg0: i32) -> (i32, i32) {
    %c0_i32 = arith.constant 0 : i32
    %c0_i32_0 = arith.constant 0 : i32
    %c0_i32_1 = arith.constant 0 : i32
    return %c0_i32, %c0_i32_0 : i32, i32
  }
  func.func @transform_3(%arg0: i32) -> (i32, i32, i32, i32) {
    %c0_i32 = arith.constant 0 : i32
    %c0_i32_0 = arith.constant 0 : i32
    %c0_i32_1 = arith.constant 0 : i32
    %c0_i32_2 = arith.constant 0 : i32
    return %arg0, %c0_i32, %c0_i32_0, %c0_i32_1 : i32, i32, i32, i32
  }
  func.func @transform_4(%arg0: i32) -> (i32, i32, i32, i32) {
    %c0_i32 = arith.constant 0 : i32
    %c0_i32_0 = arith.constant 0 : i32
    %c0_i32_1 = arith.constant 0 : i32
    %c0_i32_2 = arith.constant 0 : i32
    return %arg0, %c0_i32, %c0_i32_0, %c0_i32_1 : i32, i32, i32, i32
  }
}

</mosaic_0001>

<bundles_post_ra>
// kernel: tpu_custom_call.1
= control target key start
LH: loop header
LB: loop body
LE: loop exit
PB: predicated region body
PF: predicated region fallthrough
CT: control target
= control target key end

     0   :  { %s7376_s15 = smov 0   ;;  %s9909_s0 = inlined_call_operand.vmem [shape: bf16[2,16,16,4], index: 0, kind: input, shape index: {}]   ;;  %s9910_s1 = inlined_call_operand.vmem [shape: bf16[9,4,4], index: 1, kind: input, shape index: {}]   ;;  %s9911_s2 = inlined_call_operand.vmem [shape: f32[1,4], index: 2, kind: input, shape index: {}]   ;;  %s9912_s3 = inlined_call_operand.vmem [shape: f32[2,16,16,4], index: 3, kind: input, shape index: {}]   ;;  %s9913_s4 = inlined_call_operand.vmem [shape: f32[2,16,16,8], index: 4, kind: output, shape index: {}]  }
   0x1 LB: > { %s6428_s16 = sadd.s32 4294967295, %s7347_s15   ;;  %p6432_p0 = scmp.ge.s32.totalorder %s7347_s15, 1  ;;  %s7347_s15 = sphi %s7376_s15, %s14_s15  }
   0x2   : > { %p172_p1 = scmp.lt.s32.totalorder %s7347_s15, 3 }
   0x4   : > { %p173_p2 = pnand %p6432_p0, %p172_p1 }
   0x6   : > { %176 = sbr.rel (%p173_p2) target bundleno = 804 (0x324), region = 36 }
   0xb   : > { %v6455_v0 = vld [vmem:[%s9910_s1 + $0x2] sm:$0x3]  ;;  %vm1242_vm0 = vcmask 1041408   ;;  %vm219_vm1 = vcmask 27648   ;;  %vm222_vm2 = vcmask 25600   ;;  %v7349_v2 = vmov 0  }
   0xc   : > { %7250 = vmatprep.subr.msk.bf16.mxu0 %vm1242_vm0, %v6455_v0  ;;  %7251 = vmatprep.subr.msk.bf16.mxu1 %vm1242_vm0, %v6455_v0  ;;  %v1244_v1 = vsel %vm1242_vm0, %v6455_v0, 0  ;;  %224 = vst.msk [vmem:[#allocation2 + $0xc] sm:$0xf] %vm219_vm1, %v7349_v2  ;;  %225 = vst.msk [vmem:[#allocation2 + $0x10] sm:$0xf] %vm219_vm1, %v7349_v2  ;;  %p203_p3 = scmp.lt.s32.totalorder %s6428_s16, 1 }
   0xd   : > { %226 = vst.msk [vmem:[#allocation2 + $0x14] sm:$0x3] %vm222_vm2, %v7349_v2  ;;  %229 = vst.msk [vmem:[#allocation2 + $0x20] sm:$0x3] %vm222_vm2, %v7349_v2  ;;  %6943 = vmatpush3.bf16.msra.mxu0 %v1244_v1  ;;  %7249 = vmatpush3.bf16.msra.mxu1 %v1244_v1  ;;  %v963_v3 = vld [vmem:[%s9910_s1] sm:$0x3] }
   0xe   : > { %227 = vst.msk [vmem:[#allocation2 + $0x18] sm:$0xf] %vm219_vm1, %v7349_v2  ;;  %228 = vst.msk [vmem:[#allocation2 + $0x1c] sm:$0xf] %vm219_vm1, %v7349_v2  ;;  %s10332_s16 = smov (!%p203_p3, %s6428_s16), 1  ;;  %7252 = vmatprep.subr.msk.bf16.mxu1 %vm1242_vm0, %v963_v3  ;;  %vm1028_vm3 = vcmask 1042432  }
   0xf   : > { %230 = vst.msk [vmem:[#allocation2 + $0x24] sm:$0xf] %vm219_vm1, %v7349_v2  ;;  %231 = vst.msk [vmem:[#allocation2 + $0x28] sm:$0xf] %vm219_vm1, %v7349_v2  ;;  %v6520_v4 = vld [vmem:[%s9910_s1 + $0x4] sm:$0x3] }
  0x10   : > { %232 = vst.msk [vmem:[#allocation2 + $0x2c] sm:$0x3] %vm222_vm2, %v7349_v2  ;;  %235 = vst.msk [vmem:[#allocation2 + $0x38] sm:$0x3] %vm222_vm2, %v7349_v2  ;;  %7253 = vmatprep.subr.msk.bf16.mxu0 %vm1242_vm0, %v6520_v4  ;;  %vm1029_vm4 = vcmask 1046532   ;;  %s6786_s23 = sshll.u32 %s10332_s16, 7 }
  0x11   : > { %233 = vst.msk [vmem:[#allocation2 + $0x30] sm:$0xf] %vm219_vm1, %v7349_v2  ;;  %234 = vst.msk [vmem:[#allocation2 + $0x34] sm:$0xf] %vm219_vm1, %v7349_v2  ;;  %v7462_v5 = vld [vmem:[%s9910_s1 + $0x6] sm:$0x3]  ;;  %s7467_s28 = scalar_lea.vmem %s9909_s0, %s6786_s23 }
  0x12   : > { %236 = vst.msk [vmem:[#allocation2 + $0x3c] sm:$0xf] %vm219_vm1, %v7349_v2  ;;  %237 = vst.msk [vmem:[#allocation2 + $0x40] sm:$0xf] %vm219_vm1, %v7349_v2  ;;  %vm1193_vm5 = vcmask 31744   ;;  %vm345_vm6 = vcmask 1040384  }
  0x13   : > { %238 = vst.msk [vmem:[#allocation2 + $0x44] sm:$0x3] %vm222_vm2, %v7349_v2  ;;  %241 = vst.msk [vmem:[#allocation2 + $0x50] sm:$0x3] %vm222_vm2, %v7349_v2  ;;  %vm346_vm7 = vcmask 1044484   ;;  %vm477_vm8 = vcmask 27649  }
  0x14   : > { %239 = vst.msk [vmem:[#allocation2 + $0x48] sm:$0xf] %vm219_vm1, %v7349_v2  ;;  %240 = vst.msk [vmem:[#allocation2 + $0x4c] sm:$0xf] %vm219_vm1, %v7349_v2  ;;  %vm480_vm9 = vcmask 24576   ;;  %v7470_v6 = vsel %vm1242_vm0, %v963_v3, 0 }
  0x15   : > { %242 = vst.msk [vmem:[#allocation2 + $0x54] sm:$0xf] %vm219_vm1, %v7349_v2  ;;  %243 = vst.msk [vmem:[#allocation2 + $0x58] sm:$0xf] %vm219_vm1, %v7349_v2  ;;  %v7473_v7 = vsel %vm1242_vm0, %v6520_v4, 0  ;;  %v7477_v8 = vsel %vm1242_vm0, %v7462_v5, 0 }
  0x16   : > { %244 = vst.msk [vmem:[#allocation2 + $0x5c] sm:$0x3] %vm222_vm2, %v7349_v2  ;;  %247 = vst.msk [vmem:[#allocation2 + $0x68] sm:$0x3] %vm222_vm2, %v7349_v2  ;;  %v7479_v9 = vld [vmem:[#allocation2 + $0x10] sm:$0xf] }
  0x17   : > { %245 = vst.msk [vmem:[#allocation2 + $0x60] sm:$0xf] %vm219_vm1, %v7349_v2  ;;  %246 = vst.msk [vmem:[#allocation2 + $0x64] sm:$0xf] %vm219_vm1, %v7349_v2  ;;  %v530_v10 = vld [vmem:[#allocation2 + $0x14] sm:$0x1] }
  0x18   : > { %248 = vst.msk [vmem:[#allocation2 + $0x6c] sm:$0xf] %vm219_vm1, %v7349_v2  ;;  %249 = vst.msk [vmem:[#allocation2 + $0x70] sm:$0xf] %vm219_vm1, %v7349_v2  ;;  %v964_v11 = vld [vmem:[#allocation2 + $0xc] sm:$0xe] }
  0x19   : > { %250 = vst.msk [vmem:[#allocation2 + $0x74] sm:$0x3] %vm222_vm2, %v7349_v2  ;;  %253 = vst.msk [vmem:[#allocation2 + $0x80] sm:$0x3] %vm222_vm2, %v7349_v2  ;;  %v281_v12 = vld [vmem:[%s7467_s28] sm:$0xf] }
  0x1a   : > { %251 = vst.msk [vmem:[#allocation2 + $0x78] sm:$0xf] %vm219_vm1, %v7349_v2  ;;  %252 = vst.msk [vmem:[#allocation2 + $0x7c] sm:$0xf] %vm219_vm1, %v7349_v2  ;;  %v282_v13 = vld [vmem:[%s7467_s28 + $0x4] sm:$0xf] }
  0x1b   : > { %254 = vst.msk [vmem:[#allocation2 + $0x84] sm:$0xf] %vm219_vm1, %v7349_v2  ;;  %255 = vst.msk [vmem:[#allocation2 + $0x88] sm:$0xf] %vm219_vm1, %v7349_v2  ;;  %v295_v14 = vld [vmem:[%s7467_s28 + $0x38] sm:$0xf] }
  0x1c   : > { %256 = vst.msk [vmem:[#allocation2 + $0x8c] sm:$0x3] %vm222_vm2, %v7349_v2  ;;  %259 = vst.msk [vmem:[#allocation2 + $0x98] sm:$0x3] %vm222_vm2, %v7349_v2  ;;  %v9915_v15 = vshll.u32 %v7479_v9, 16  ;;  %v593_v16 = vshrl.u32 %v7479_v9, 16 }
  0x1d   : > { %257 = vst.msk [vmem:[#allocation2 + $0x90] sm:$0xf] %vm219_vm1, %v7349_v2  ;;  %258 = vst.msk [vmem:[#allocation2 + $0x94] sm:$0xf] %vm219_vm1, %v7349_v2  ;;  %v599_v17 = vshll.u32 %v530_v10, 16  ;;  %v6439_v19 = vrot.slane %v964_v11, 9 }
  0x1e   : > { %260 = vst.msk [vmem:[#allocation2 + $0x9c] sm:$0xf] %vm219_vm1, %v7349_v2  ;;  %261 = vst.msk [vmem:[#allocation2 + $0xa0] sm:$0xf] %vm219_vm1, %v7349_v2  ;;  %v296_v20 = vld [vmem:[%s7467_s28 + $0x3c] sm:$0xf] }
  0x1f   : > { %262 = vst.msk [vmem:[#allocation2 + $0xa4] sm:$0x3] %vm222_vm2, %v7349_v2  ;;  %265 = vst.msk [vmem:[#allocation2 + $0xb0] sm:$0x3] %vm222_vm2, %v7349_v2  ;;  %v1033_v21 = vrot.slane %v7479_v9, 5  ;;  %v1036_v22 = vrot.slane %v530_v10, 5 }
  0x20   : > { %263 = vst.msk [vmem:[#allocation2 + $0xa8] sm:$0xf] %vm219_vm1, %v7349_v2  ;;  %264 = vst.msk [vmem:[#allocation2 + $0xac] sm:$0xf] %vm219_vm1, %v7349_v2  ;;  %v1687_v23 = vshrl.u32 %v964_v11, 16  ;;  %v1690_v24 = vshll.u32 %v964_v11, 16 }
  0x21   : > { %266 = vst.msk [vmem:[#allocation2 + $0xb4] sm:$0xf] %vm219_vm1, %v7349_v2  ;;  %267 = vst.msk [vmem:[#allocation2 + $0xb8] sm:$0xf] %vm219_vm1, %v7349_v2  ;;  %v297_v25 = vld [vmem:[%s7467_s28 + $0x40] sm:$0xf] }
  0x22   : > { %268 = vst.msk [vmem:[#allocation2 + $0xbc] sm:$0x3] %vm222_vm2, %v7349_v2  ;;  %271 = vst.msk [vmem:[#allocation2 + $0xc8] sm:$0x3] %vm222_vm2, %v7349_v2  ;;  %v7495_v26 = vrot.slane %v593_v16, 4  ;;  %v7497_v27 = vrot.slane %v599_v17, 5 }
  0x23   : > { %269 = vst.msk [vmem:[#allocation2 + $0xc0] sm:$0xf] %vm219_vm1, %v7349_v2  ;;  %270 = vst.msk [vmem:[#allocation2 + $0xc4] sm:$0xf] %vm219_vm1, %v7349_v2  ;;  %v7499_v28 = vrot.slane %v593_v16, 5  ;;  %v7503_v29 = vrot.slane %v9915_v15, 6 }
  0x24   : > { %272 = vst.msk [vmem:[#allocation2 + $0xcc] sm:$0xf] %vm219_vm1, %v7349_v2  ;;  %273 = vst.msk [vmem:[#allocation2 + $0xd0] sm:$0xf] %vm219_vm1, %v7349_v2  ;;  %v298_v30 = vld [vmem:[%s7467_s28 + $0x44] sm:$0xf] }
  0x25   : > { %274 = vst.msk [vmem:[#allocation2 + $0xd4] sm:$0x3] %vm222_vm2, %v7349_v2  ;;  %277 = vst.msk [vmem:[#allocation2 + $0xe0] sm:$0x3] %vm222_vm2, %v7349_v2  ;;  %v1035_v32 = vrot.slane %v1033_v21, 4  ;;  %v7508_v33 = vrot.slane %v1687_v23, 5 }
  0x26   : > { %275 = vst.msk [vmem:[#allocation2 + $0xd8] sm:$0xf] %vm219_vm1, %v7349_v2  ;;  %276 = vst.msk [vmem:[#allocation2 + $0xdc] sm:$0xf] %vm219_vm1, %v7349_v2  ;;  %v7510_v34 = vrot.slane %v1690_v24, 6  ;;  %v348_v36 = vrot.slane %v281_v12, 7 }
  0x27   : > { %vm7488_vm10 = vmor %vm1028_vm3, %vm1029_vm4  ;;  %v283_v35 = vld [vmem:[%s7467_s28 + $0x8] sm:$0xf]  ;;  %v350_v37 = vrot.slane %v282_v13, 7  ;;  %v383_v38 = vrot.slane %v295_v14, 7  ;;  %v385_v39 = vrot.slane %v296_v20, 7  ;;  %v9980_v42 = vmov 0 }
  0x28   : > { %v1034_v31 = vsel %vm7488_vm10, %v6439_v19, %v1033_v21  ;;  %v284_v40 = vld [vmem:[%s7467_s28 + $0xc] sm:$0xf]  ;;  %v1037_v41 = vsel %vm7488_vm10, %v1035_v32, %v1036_v22  ;;  %vm7518_vm11 = vmor %vm345_vm6, %vm346_vm7  ;;  %v388_v43 = vrot.slane %v297_v25, 7  ;;  %v390_v44 = vrot.slane %v298_v30, 7  ;;  %v285_v46 = vld [vmem:[%s7467_s28 + $0x10] sm:$0xf] }
  0x29   : > { %v9981_v42 = vsel %vm7518_vm11, 4294967295, %v9980_v42  ;;  %v353_v45 = vrot.slane %v283_v35, 7  ;;  %v6456_v47 = vcombine.low %v1034_v31, %v1037_v41  ;;  %v349_v48 = vrot.slane %v348_v36, 4  ;;  %478 = vst.msk [vmem:[#allocation2 + $0x18] sm:$0xe] %vm477_vm8, %v348_v36  ;;  %s6787_s21 = sshll.u32 %s10332_s16, 8 }
  0x2a   : > { %9982 = vst [vmem:[#allocation3_spill] sm:$0xff] %v9981_v42  ;;  %v352_v49 = vrot.slane %v350_v37, 4  ;;  %v384_v50 = vrot.slane %v383_v38, 4  ;;  %500 = vst.msk [vmem:[#allocation2 + $0x6c] sm:$0xe] %vm477_vm8, %v383_v38  ;;  %v387_v52 = vrot.slane %v385_v39, 4  ;;  %s8933_s24 = scalar_lea.vmem %s9912_s3, %s6787_s21  ;;  %s9715_s30 = scalar_lea.vmem %s9913_s4, %s6787_s21 }
  0x2b   : > { %v286_v51 = vld [vmem:[%s7467_s28 + $0x14] sm:$0xf]  ;;  %v389_v53 = vrot.slane %v388_v43, 4  ;;  %v392_v54 = vrot.slane %v390_v44, 4  ;;  %503 = vst.msk [vmem:[#allocation2 + $0x78] sm:$0xe] %vm477_vm8, %v388_v43  ;;  %6944 = vmatprep.mubr.msk.bf16.mxu0 %vm1193_vm5, %v6456_v47  ;;  %v351_v57 = vsel %vm7518_vm11, %v349_v48, %v350_v37  ;;  %v1693_v37 = vor.u32 %v7510_v34, %v7508_v33 }
  0x2c   : > { %v354_v55 = vrot.slane %v353_v45, 4  ;;  %482 = vst.msk [vmem:[#allocation2 + $0x24] sm:$0xe] %vm477_vm8, %v353_v45  ;;  %v299_v56 = vld [vmem:[%s7467_s28 + $0x48] sm:$0xf]  ;;  %v386_v58 = vsel %vm7518_vm11, %v384_v50, %v385_v39  ;;  %v355_v59 = vrot.slane %v284_v40, 7 }
  0x2d   : > { %481 = vst.msk [vmem:[#allocation2 + $0x20] sm:$0x1] %vm480_vm9, %v352_v49  ;;  %v358_v60 = vrot.slane %v285_v46, 7  ;;  %v300_v61 = vld [vmem:[%s7467_s28 + $0x4c] sm:$0xf]  ;;  %v391_v63 = vsel %vm7518_vm11, %v389_v53, %v390_v44  ;;  %v360_v0 = vrot.slane %v286_v51, 7 }
  0x2e   : > { %v301_v62 = vld [vmem:[%s7467_s28 + $0x50] sm:$0xf]  ;;  %479 = vst.msk [vmem:[#allocation2 + $0x1c] sm:$0xf] %vm219_vm1, %v351_v57  ;;  %501 = vst.msk [vmem:[#allocation2 + $0x70] sm:$0xf] %vm219_vm1, %v386_v58  ;;  %v356_v4 = vsel %vm7518_vm11, %v354_v55, %v355_v59 }
  0x2f   : > { %502 = vst.msk [vmem:[#allocation2 + $0x74] sm:$0x1] %vm480_vm9, %v387_v52  ;;  %505 = vst.msk [vmem:[#allocation2 + $0x80] sm:$0x1] %vm480_vm9, %v392_v54  ;;  %v393_v1 = vrot.slane %v299_v56, 7  ;;  %v395_v2 = vrot.slane %v300_v61, 7 }
  0x30   : > { %v302_v3 = vld [vmem:[%s7467_s28 + $0x54] sm:$0xf]  ;;  %504 = vst.msk [vmem:[#allocation2 + $0x7c] sm:$0xf] %vm219_vm1, %v391_v63  ;;  %v357_v10 = vrot.slane %v355_v59, 4  ;;  %v359_v11 = vrot.slane %v358_v60, 4 }
  0x31   : > { %485 = vst.msk [vmem:[#allocation2 + $0x30] sm:$0xe] %vm477_vm8, %v358_v60  ;;  %v398_v12 = vrot.slane %v301_v62, 7  ;;  %v7549_v13 = vld [vmem:[%s7467_s28 + $0x18] sm:$0xf]  ;;  %v362_v14 = vrot.slane %v360_v0, 4 }
  0x32   : > { %483 = vst.msk [vmem:[#allocation2 + $0x28] sm:$0xf] %vm219_vm1, %v356_v4  ;;  %v394_v16 = vrot.slane %v393_v1, 4  ;;  %v397_v17 = vrot.slane %v395_v2, 4  ;;  %v400_v19 = vrot.slane %v302_v3, 7  ;;  %v361_v21 = vsel %vm7518_vm11, %v359_v11, %v360_v0  ;;  %s7350_s25 = smov 4  }
  0x33   : > { %506 = vst.msk [vmem:[#allocation2 + $0x84] sm:$0xe] %vm477_vm8, %v393_v1  ;;  %v7554_v20 = vld [vmem:[%s7467_s28 + $0x1c] sm:$0xf]  ;;  %v399_v22 = vrot.slane %v398_v12, 4  ;;  %v363_v23 = vrot.slane %v7549_v13, 7 }
  0x34   : > { %484 = vst.msk [vmem:[#allocation2 + $0x2c] sm:$0x1] %vm480_vm9, %v357_v10  ;;  %v365_v24 = vrot.slane %v7554_v20, 7  ;;  %v7563_v25 = vld [vmem:[%s7467_s28 + $0x20] sm:$0xf]  ;;  %v396_v32 = vsel %vm7518_vm11, %v394_v16, %v395_v2  ;;  %v402_v35 = vrot.slane %v400_v19, 4 }
  0x35   : > { %509 = vst.msk [vmem:[#allocation2 + $0x90] sm:$0xe] %vm477_vm8, %v398_v12  ;;  %v965_v30 = vld [vmem:[#allocation2 + $0x18] sm:$0xe]  ;;  %v7565_v31 = vld [vmem:[#allocation2 + $0x6c] sm:$0xe]  ;;  %v401_v48 = vsel %vm7518_vm11, %v399_v22, %v400_v19 }
  0x36   : > { %486 = vst.msk [vmem:[#allocation2 + $0x34] sm:$0xf] %vm219_vm1, %v361_v21  ;;  %v368_v36 = vrot.slane %v7563_v25, 7  ;;  %v6440_v38 = vrot.slane %v965_v30, 9  ;;  %v1710_v39 = vshrl.u32 %v965_v30, 16  ;;  %v1713_v40 = vshll.u32 %v965_v30, 16 }
  0x37   : > { %487 = vst.msk [vmem:[#allocation2 + $0x38] sm:$0x1] %vm480_vm9, %v362_v14  ;;  %508 = vst.msk [vmem:[#allocation2 + $0x8c] sm:$0x1] %vm480_vm9, %v397_v17  ;;  %v6447_v41 = vrot.slane %v7565_v31, 9  ;;  %v1871_v45 = vshrl.u32 %v7565_v31, 16 }
  0x38   : > { %v7576_v43 = vld [vmem:[#allocation2 + $0x78] sm:$0xe]  ;;  %507 = vst.msk [vmem:[#allocation2 + $0x88] sm:$0xf] %vm219_vm1, %v396_v32  ;;  %v533_v44 = vld [vmem:[#allocation2 + $0x20] sm:$0x1] }
  0x39   : > { %488 = vst.msk [vmem:[#allocation2 + $0x3c] sm:$0xe] %vm477_vm8, %v363_v23  ;;  %v1874_v46 = vshll.u32 %v7565_v31, 16  ;;  %v6448_v47 = vrot.slane %v7576_v43, 9  ;;  %491 = vst.msk [vmem:[#allocation2 + $0x48] sm:$0xe] %vm477_vm8, %v368_v36 }
  0x3a   : > { %511 = vst.msk [vmem:[#allocation2 + $0x98] sm:$0x1] %vm480_vm9, %v402_v35  ;;  %v532_v49 = vld [vmem:[#allocation2 + $0x1c] sm:$0xf]  ;;  %v623_v50 = vshll.u32 %v533_v44, 16  ;;  %v1043_v51 = vrot.slane %v533_v44, 5 }
  0x3b   : > { %v1712_v52 = vrot.slane %v1710_v39, 5  ;;  %v1715_v53 = vrot.slane %v1713_v40, 6  ;;  %510 = vst.msk [vmem:[#allocation2 + $0x94] sm:$0xf] %vm219_vm1, %v401_v48  ;;  %v613_v54 = vshll.u32 %v532_v49, 16  ;;  %v617_v55 = vshrl.u32 %v532_v49, 16 }
  0x3c   : > { %v1040_v56 = vrot.slane %v532_v49, 5  ;;  %v7592_v57 = vld [vmem:[#allocation2 + $0x70] sm:$0xf]  ;;  %v7594_v58 = vrot.slane %v1871_v45, 5  ;;  %v7596_v59 = vrot.slane %v623_v50, 5  ;;  %v7623_v40 = vrot.slane %v1874_v46, 6 }
  0x3d   : > { %v1716_v60 = vor.u32 %v1715_v53, %v1712_v52  ;;  %v554_v61 = vld [vmem:[#allocation2 + $0x74] sm:$0x1]  ;;  %v9914_v62 = vshll.u32 %v7592_v57, 16  ;;  %v785_v63 = vshrl.u32 %v7592_v57, 16  ;;  %v7600_v0 = vrot.slane %v613_v54, 5 }
  0x3e   : > { %v619_v1 = vrot.slane %v617_v55, 4  ;;  %v1041_v2 = vsel %vm7488_vm10, %v6440_v38, %v1040_v56  ;;  %v1042_v3 = vrot.slane %v1040_v56, 4  ;;  %v556_v4 = vld [vmem:[#allocation2 + $0x7c] sm:$0xf]  ;;  %v1718_v11 = vrot.slane %v617_v55, 5 }
  0x3f   : > { %v7604_v10 = vrot.slane %v1716_v60, 4  ;;  %v1719_v12 = vrot.slane %v613_v54, 6  ;;  %v7606_v14 = vrot.slane %v785_v63, 4  ;;  %v557_v16 = vld [vmem:[#allocation2 + $0x80] sm:$0x1]  ;;  %v791_v21 = vshll.u32 %v554_v61, 16 }
  0x40   : > { %v620_v17 = vor.u32 %v619_v1, %v7600_v0  ;;  %v1044_v19 = vsel %vm7488_vm10, %v1042_v3, %v1043_v51  ;;  %v1089_v22 = vrot.slane %v7592_v57, 5  ;;  %v7612_v30 = vld [vmem:[#allocation2 + $0x28] sm:$0xf]  ;;  %v7614_v31 = vld [vmem:[#allocation2 + $0x2c] sm:$0x1]  ;;  %v1092_v39 = vrot.slane %v554_v61, 5 }
  0x41   : > { %v7619_v32 = vld [vmem:[%s9910_s1 + $0x8] sm:$0x3]  ;;  %v6457_v35 = vcombine.low %v1041_v2, %v1044_v19  ;;  %v7621_v38 = vor.u32 %v1719_v12, %v1718_v11  ;;  %v7625_v43 = vld [vmem:[#allocation2 + $0x24] sm:$0xe]  ;;  %v7627_v44 = vld [vmem:[#allocation2 + $0x34] sm:$0xf] }
  0x42   : > { %v7629_v45 = vrot.slane %v620_v17, 4  ;;  %v7631_v48 = vrot.slane %v791_v21, 5  ;;  %v1090_v49 = vsel %vm7488_vm10, %v6447_v41, %v1089_v22  ;;  %v1091_v50 = vrot.slane %v1089_v22, 4  ;;  %v7635_v51 = vld [vmem:[#allocation2 + $0x38] sm:$0x1] }
  0x43   : > { %6945 = vmatmul.mubr.msk.bf16.vlgmr.msra.gmra.mxu0 %vm1193_vm5, %v6457_v35  ;;  %v7638_v52 = vrot.slane %v785_v63, 5  ;;  %v7642_v46 = vrot.slane %v9914_v62, 6  ;;  %v1096_v53 = vrot.slane %v556_v4, 5  ;;  %v1099_v54 = vrot.slane %v557_v16, 5  ;;  %v7644_v55 = vld [vmem:[#allocation2 + $0x30] sm:$0xe] }
  0x44   : > { %9983 = vst [vmem:[#allocation4_spill] sm:$0xff] %v7631_v48  ;;  %v1093_v56 = vsel %vm7488_vm10, %v1091_v50, %v1092_v39  ;;  %7011 = vmatpush3.bf16.msra.mxu0 %v7473_v7  ;;  %v6441_v41 = vrot.slane %v7625_v43, 9  ;;  %v1047_v60 = vrot.slane %v7612_v30, 5  ;;  %v1050_v61 = vrot.slane %v7614_v31, 5  ;;  %v559_v63 = vld [vmem:[#allocation2 + $0x88] sm:$0xf] }
  0x45   : > { %v6464_v1 = vcombine.low %v1090_v49, %v1093_v56  ;;  %v1097_v2 = vsel %vm7488_vm10, %v6448_v47, %v1096_v53  ;;  %v1098_v3 = vrot.slane %v1096_v53, 4  ;;  %v6442_v4 = vrot.slane %v7644_v55, 9  ;;  %v560_v11 = vld [vmem:[#allocation2 + $0x8c] sm:$0x1]  ;;  %v974_v12 = vld [vmem:[#allocation2 + $0x84] sm:$0xe]  ;;  %7255 = vmatprep.subr.msk.bf16.mxu0 %vm1242_vm0, %v7619_v32 }
  0x46   : > { %v1048_v7 = vsel %vm7488_vm10, %v6441_v41, %v1047_v60  ;;  %v1049_v16 = vrot.slane %v1047_v60, 4  ;;  %v1054_v17 = vrot.slane %v7627_v44, 5  ;;  %v1057_v19 = vrot.slane %v7635_v51, 5  ;;  %v562_v21 = vld [vmem:[#allocation2 + $0x94] sm:$0xf] }
  0x47   : > { %6960 = vmatprep.mubr.msk.bf16.mxu1 %vm1193_vm5, %v6464_v1  ;;  %v1100_v47 = vsel %vm7488_vm10, %v1098_v3, %v1099_v54  ;;  %v6449_v22 = vrot.slane %v974_v12, 9  ;;  %v1103_v35 = vrot.slane %v559_v63, 5  ;;  %v1106_v39 = vrot.slane %v560_v11, 5  ;;  %v563_v49 = vld [vmem:[#allocation2 + $0x98] sm:$0x1] }
  0x48   : > { %v6465_v50 = vcombine.low %v1097_v2, %v1100_v47  ;;  %v1051_v53 = vsel %vm7488_vm10, %v1049_v16, %v1050_v61  ;;  %v1055_v56 = vsel %vm7488_vm10, %v6442_v4, %v1054_v17  ;;  %v1056_v41 = vrot.slane %v1054_v17, 4  ;;  %v975_v60 = vld [vmem:[#allocation2 + $0x90] sm:$0xe]  ;;  %v7668_v62 = vld [vmem:[#allocation2 + $0x3c] sm:$0xe] }
  0x49   : > { %v6458_v1 = vcombine.low %v1048_v7, %v1051_v53  ;;  %v1104_v54 = vsel %vm7488_vm10, %v6449_v22, %v1103_v35  ;;  %v1105_v3 = vrot.slane %v1103_v35, 4  ;;  %v6450_v63 = vrot.slane %v975_v60, 9  ;;  %v290_v11 = vld [vmem:[%s7467_s28 + $0x24] sm:$0xf]  ;;  %v7673_v2 = vld [vmem:[#allocation2 + $0x48] sm:$0xe] }
  0x4a   : > { %vm1683_vm12 = vsmask.f32 2304  ;;  %vm1684_vm13 = vsmask.f32 6416  ;;  %6961 = vmatmul.mubr.msk.bf16.vlgmr.msra.gmra.mxu1 %vm1193_vm5, %v6465_v50  ;;  %v1058_v61 = vsel %vm7488_vm10, %v1056_v41, %v1057_v19  ;;  %v1110_v4 = vrot.slane %v562_v21, 5 }
  0x4b   : > { %v1113_v12 = vrot.slane %v563_v49, 5  ;;  %v364_v7 = vrot.slane %v363_v23, 4  ;;  %v303_v16 = vld [vmem:[%s7467_s28 + $0x58] sm:$0xf]  ;;  %6977 = vmatpush3.bf16.msra.mxu1 %v7470_v6  ;;  %6948 = vmatprep.mubr.msk.bf16.mxu0 %vm1193_vm5, %v6458_v1  ;;  %v6459_v17 = vcombine.low %v1055_v56, %v1058_v61  ;;  %v1107_v47 = vsel %vm7488_vm10, %v1105_v3, %v1106_v39  ;;  %v304_v21 = vld [vmem:[%s7467_s28 + $0x5c] sm:$0xf]  ;;  %vm7742_vm2 = vmor %vm1683_vm12, %vm1684_vm13 }
  0x4c   : > { %v367_v22 = vrot.slane %v365_v24, 4  ;;  %v6443_v19 = vrot.slane %v7668_v62, 9  ;;  %v305_v35 = vld [vmem:[%s7467_s28 + $0x60] sm:$0xf]  ;;  %v6466_v13 = vcombine.low %v1104_v54, %v1107_v47  ;;  %v1111_v23 = vsel %vm7488_vm10, %v6450_v63, %v1110_v4  ;;  %v306_v50 = vld [vmem:[%s7467_s28 + $0x64] sm:$0xf]  ;;  %7254 = vmatprep.subr.msk.bf16.mxu1 %vm1242_vm0, %v7462_v5 }
  0x4d   : > { %v1112_v49 = vrot.slane %v1110_v4, 4  ;;  %v366_v6 = vsel %vm7518_vm11, %v364_v7, %v365_v24  ;;  %v291_v39 = vld [vmem:[%s7467_s28 + $0x28] sm:$0xf]  ;;  %6949 = vmatmul.mubr.msk.bf16.gmra.mxu0 %vm1193_vm5, %v6459_v17  ;;  %v369_v53 = vrot.slane %v368_v36, 4  ;;  %v370_v20 = vrot.slane %v290_v11, 7 }
  0x4e   : > { %489 = vst.msk [vmem:[#allocation2 + $0x40] sm:$0xf] %vm219_vm1, %v366_v6  ;;  %v6444_v24 = vrot.slane %v7673_v2, 9  ;;  %v403_v56 = vrot.slane %v303_v16, 7  ;;  %v292_v41 = vld [vmem:[%s7467_s28 + $0x2c] sm:$0xf]  ;;  %6964 = vmatprep.mubr.msk.bf16.mxu1 %vm1193_vm5, %v6466_v13 }
  0x4f   : > { %490 = vst.msk [vmem:[#allocation2 + $0x44] sm:$0x1] %vm480_vm9, %v367_v22  ;;  %v1114_v5 = vsel %vm7488_vm10, %v1112_v49, %v1113_v12  ;;  %v405_v60 = vrot.slane %v304_v21, 7  ;;  %v408_v1 = vrot.slane %v305_v35, 7  ;;  %v410_v54 = vrot.slane %v306_v50, 7 }
  0x50   : > { %v293_v3 = vld [vmem:[%s7467_s28 + $0x30] sm:$0xf]  ;;  %v6467_v63 = vcombine.low %v1111_v23, %v1114_v5  ;;  %v371_v25 = vsel %vm7518_vm11, %v369_v53, %v370_v20  ;;  %v372_v36 = vrot.slane %v370_v20, 4  ;;  %v404_v11 = vrot.slane %v403_v56, 4  ;;  %512 = vst.msk [vmem:[#allocation2 + $0x9c] sm:$0xe] %vm477_vm8, %v403_v56 }
  0x51   : > { %v294_v61 = vld [vmem:[%s7467_s28 + $0x34] sm:$0xf]  ;;  %v307_v4 = vld [vmem:[%s7467_s28 + $0x68] sm:$0xf]  ;;  %492 = vst.msk [vmem:[#allocation2 + $0x4c] sm:$0xf] %vm219_vm1, %v371_v25 }
  0x52   : > { %v407_v7 = vrot.slane %v405_v60, 4  ;;  %v409_v12 = vrot.slane %v408_v1, 4  ;;  %v412_v16 = vrot.slane %v410_v54, 4  ;;  %515 = vst.msk [vmem:[#allocation2 + $0xa8] sm:$0xe] %vm477_vm8, %v408_v1  ;;  %v373_v17 = vrot.slane %v291_v39, 7  ;;  %6965 = vmatmul.mubr.msk.bf16.gmra.mxu1 %vm1193_vm5, %v6467_v63 }
  0x53   : > { %v308_v47 = vld [vmem:[%s7467_s28 + $0x6c] sm:$0xf]  ;;  %493 = vst.msk [vmem:[#allocation2 + $0x50] sm:$0x1] %vm480_vm9, %v372_v36  ;;  %v406_v22 = vsel %vm7518_vm11, %v404_v11, %v405_v60  ;;  %v375_v21 = vrot.slane %v292_v41, 7  ;;  %v378_v35 = vrot.slane %v293_v3, 7  ;;  %v7748_v36 = vor.u32 %v7503_v29, %v7499_v28 }
  0x54   : > { %v380_v13 = vrot.slane %v294_v61, 7  ;;  %v309_v23 = vld [vmem:[%s7467_s28 + $0x70] sm:$0xf]  ;;  %513 = vst.msk [vmem:[#allocation2 + $0xa0] sm:$0xf] %vm219_vm1, %v406_v22  ;;  %v411_v49 = vsel %vm7518_vm11, %v409_v12, %v410_v54  ;;  %v374_v6 = vrot.slane %v373_v17, 4 }
  0x55   : > { %514 = vst.msk [vmem:[#allocation2 + $0xa4] sm:$0x1] %vm480_vm9, %v407_v7  ;;  %517 = vst.msk [vmem:[#allocation2 + $0xb0] sm:$0x1] %vm480_vm9, %v412_v16  ;;  %v413_v50 = vrot.slane %v307_v4, 7  ;;  %v415_v39 = vrot.slane %v308_v47, 7 }
  0x56   : > { %494 = vst.msk [vmem:[#allocation2 + $0x54] sm:$0xe] %vm477_vm8, %v373_v17  ;;  %v377_v53 = vrot.slane %v375_v21, 4  ;;  %v379_v20 = vrot.slane %v378_v35, 4  ;;  %v382_v56 = vrot.slane %v380_v13, 4  ;;  %v418_v5 = vrot.slane %v309_v23, 7 }
  0x57   : > { %516 = vst.msk [vmem:[#allocation2 + $0xac] sm:$0xf] %vm219_vm1, %v411_v49  ;;  %v310_v41 = vld [vmem:[%s7467_s28 + $0x74] sm:$0xf]  ;;  %vm576_vm14 = vsmask.f32 3328  ;;  %v376_v54 = vsel %vm7518_vm11, %v374_v6, %v375_v21 }
  0x58   : > { %497 = vst.msk [vmem:[#allocation2 + $0x60] sm:$0xe] %vm477_vm8, %v378_v35  ;;  %vm577_vm15 = vsmask.f32 7440  ;;  %v7733_v60 = vld [vmem:[#allocation2 + $0x40] sm:$0xf]  ;;  %v381_v4 = vsel %vm7518_vm11, %v379_v20, %v380_v13 }
  0x59   : > { %v7735_v1 = vld [vmem:[#allocation2 + $0x44] sm:$0x1]  ;;  %v414_v3 = vrot.slane %v413_v50, 4  ;;  %v417_v63 = vrot.slane %v415_v39, 4  ;;  %518 = vst.msk [vmem:[#allocation2 + $0xb4] sm:$0xe] %vm477_vm8, %v413_v50  ;;  %vm7833_vm3 = vmor %vm576_vm14, %vm577_vm15 }
  0x5a   : > { %v1061_v11 = vrot.slane %v7733_v60, 5  ;;  %v1064_v61 = vrot.slane %v7735_v1, 5  ;;  %495 = vst.msk [vmem:[#allocation2 + $0x58] sm:$0xf] %vm219_vm1, %v376_v54  ;;  %v419_v7 = vrot.slane %v418_v5, 4  ;;  %v420_v16 = vrot.slane %v310_v41, 7 }
  0x5b   : > { %496 = vst.msk [vmem:[#allocation2 + $0x5c] sm:$0x1] %vm480_vm9, %v377_v53  ;;  %499 = vst.msk [vmem:[#allocation2 + $0x68] sm:$0x1] %vm480_vm9, %v382_v56  ;;  %v7758_v12 = vld [vmem:[#allocation2 + $0x14] sm:$0x3]  ;;  %v416_v29 = vsel %vm7518_vm11, %v414_v3, %v415_v39 }
  0x5c   : > { %521 = vst.msk [vmem:[#allocation2 + $0xc0] sm:$0xe] %vm477_vm8, %v418_v5  ;;  %v976_v28 = vld [vmem:[#allocation2 + $0x9c] sm:$0xe]  ;;  %v7767_v17 = vrot.slane %v1693_v37, 4  ;;  %v1062_v22 = vsel %vm7488_vm10, %v6443_v19, %v1061_v11  ;;  %v1063_v21 = vrot.slane %v1061_v11, 4  ;;  %v421_v19 = vsel %vm7518_vm11, %v419_v7, %v420_v16 }
  0x5d   : > { %498 = vst.msk [vmem:[#allocation2 + $0x64] sm:$0xf] %vm219_vm1, %v381_v4  ;;  %v7774_v35 = vld [vmem:[#allocation2 + $0x4c] sm:$0xf]  ;;  %v6451_v13 = vrot.slane %v976_v28, 9  ;;  %v422_v6 = vrot.slane %v420_v16, 4 }
  0x5e   : > { %520 = vst.msk [vmem:[#allocation2 + $0xbc] sm:$0x1] %vm480_vm9, %v417_v63  ;;  %v977_v23 = vld [vmem:[#allocation2 + $0xa8] sm:$0xe]  ;;  %v7781_v34 = vld [vmem:[#allocation2 + $0x50] sm:$0x1]  ;;  %v1065_v50 = vsel %vm7488_vm10, %v1063_v21, %v1064_v61 }
  0x5f   : > { %519 = vst.msk [vmem:[#allocation2 + $0xb8] sm:$0xf] %vm219_vm1, %v416_v29  ;;  %v1068_v37 = vrot.slane %v7774_v35, 5  ;;  %v6452_v49 = vrot.slane %v977_v23, 9  ;;  %v1071_v39 = vrot.slane %v7781_v34, 5  ;;  %v1701_v41 = vshrl.u32 %v7758_v12, 16 }
  0x60   : > { %v7789_v53 = vld [vmem:[#allocation2 + $0xa0] sm:$0xf]  ;;  %v566_v20 = vld [vmem:[#allocation2 + $0xa4] sm:$0x1]  ;;  %522 = vst.msk [vmem:[#allocation2 + $0xc4] sm:$0xf] %vm219_vm1, %v421_v19  ;;  %v6460_v5 = vcombine.low %v1062_v22, %v1065_v50 }
  0x61   : > { %9986 = vst [vmem:[#allocation5_spill] sm:$0xff] %v7789_v53  ;;  %v1069_v54 = vsel %vm7488_vm10, %v6444_v24, %v1068_v37  ;;  %v1070_v3 = vrot.slane %v1068_v37, 4  ;;  %v1117_v63 = vrot.slane %v7789_v53, 5  ;;  %v568_v11 = vld [vmem:[#allocation2 + $0xac] sm:$0xf]  ;;  %v1120_v4 = vrot.slane %v566_v20, 5 }
  0x62   : > { %v569_v61 = vld [vmem:[#allocation2 + $0xb0] sm:$0x1]  ;;  %523 = vst.msk [vmem:[#allocation2 + $0xc8] sm:$0x1] %vm480_vm9, %v422_v6  ;;  %v1124_v7 = vrot.slane %v568_v11, 5  ;;  %v7805_v16 = vrot.slane %v1701_v41, 5  ;;  %6952 = vmatprep.mubr.msk.bf16.mxu0 %vm1193_vm5, %v6460_v5 }
  0x63   : > { %v1127_v28 = vrot.slane %v569_v61, 5  ;;  %v7803_v29 = vld [vmem:[#allocation2 + $0x54] sm:$0xe]  ;;  %v1072_v22 = vsel %vm7488_vm10, %v1070_v3, %v1071_v39  ;;  %v1118_v24 = vsel %vm7488_vm10, %v6451_v13, %v1117_v63  ;;  %v1119_v21 = vrot.slane %v1117_v63, 4  ;;  %v7812_v23 = vld [vmem:[#allocation2 + $0x58] sm:$0xf] }
  0x64   : > { %v7814_v37 = vld [vmem:[#allocation2 + $0x5c] sm:$0x1]  ;;  %v6445_v19 = vrot.slane %v7803_v29, 9  ;;  %v6461_v6 = vcombine.low %v1069_v54, %v1072_v22  ;;  %v1125_v50 = vsel %vm7488_vm10, %v6452_v49, %v1124_v7  ;;  %v1126_v20 = vrot.slane %v1124_v7, 4  ;;  %v7820_v5 = vld [vmem:[#allocation2 + $0x64] sm:$0xf] }
  0x65   : > { %v1075_v41 = vrot.slane %v7812_v23, 5  ;;  %v7822_v39 = vld [vmem:[#allocation2 + $0x68] sm:$0x1]  ;;  %v1121_v13 = vsel %vm7488_vm10, %v1119_v21, %v1120_v4  ;;  %v1078_v3 = vrot.slane %v7814_v37, 5  ;;  %v7827_v63 = vld [vmem:[#allocation2 + $0x60] sm:$0xe] }
  0x66   : > { %v1082_v11 = vrot.slane %v7820_v5, 5  ;;  %v1085_v54 = vrot.slane %v7822_v39, 5  ;;  %6953 = vmatmul.mubr.msk.bf16.gmra.mxu0 %vm1193_vm5, %v6461_v6  ;;  %v6468_v61 = vcombine.low %v1118_v24, %v1121_v13  ;;  %v1128_v4 = vsel %vm7488_vm10, %v1126_v20, %v1127_v28  ;;  %v571_v21 = vld [vmem:[#allocation2 + $0xb8] sm:$0xf]  ;;  %v572_v33 = vld [vmem:[#allocation2 + $0xbc] sm:$0x1] }
  0x67   : > { %v1076_v7 = vsel %vm7488_vm10, %v6445_v19, %v1075_v41  ;;  %v1077_v22 = vrot.slane %v1075_v41, 4  ;;  %v528_v56 = vld [vmem:[#allocation2 + $0xc] sm:$0xf]  ;;  %v6469_v47 = vcombine.low %v1125_v50, %v1128_v4  ;;  %v6446_v15 = vrot.slane %v7827_v63, 9  ;;  %v978_v53 = vld [vmem:[#allocation2 + $0xb4] sm:$0xe] }
  0x68   : > { %v1084_v42 = vrot.slane %v1082_v11, 4  ;;  %v1131_v48 = vrot.slane %v571_v21, 5  ;;  %6968 = vmatprep.mubr.msk.bf16.mxu1 %vm1193_vm5, %v6468_v61  ;;  %v6453_v6 = vrot.slane %v978_v53, 9  ;;  %v1134_v28 = vrot.slane %v572_v33, 5  ;;  %v574_v20 = vld [vmem:[#allocation2 + $0xc4] sm:$0xf] }
  0x69   : > { %v1079_v24 = vsel %vm7488_vm10, %v1077_v22, %v1078_v3  ;;  %v575_v13 = vld [vmem:[#allocation2 + $0xc8] sm:$0x1]  ;;  %6969 = vmatmul.mubr.msk.bf16.gmra.mxu1 %vm1193_vm5, %v6469_v47  ;;  %v1083_v41 = vsel %vm7488_vm10, %v6446_v15, %v1082_v11  ;;  %v979_v3 = vld [vmem:[#allocation2 + $0xc0] sm:$0xe]  ;;  %v1138_v21 = vrot.slane %v574_v20, 5  ;;  %v580_v15 = vshrl.u32 %v528_v56, 16 }
  0x6a   : > { %v6462_v50 = vcombine.low %v1076_v7, %v1079_v24  ;;  %v1086_v61 = vsel %vm7488_vm10, %v1084_v42, %v1085_v54  ;;  %v1133_v4 = vrot.slane %v1131_v48, 4  ;;  %v1132_v33 = vsel %vm7488_vm10, %v6453_v6, %v1131_v48  ;;  %v1668_v11 = vld [vmem:[#allocation2 + $0x20] sm:$0x3] }
  0x6b   : > { %v6463_v53 = vcombine.low %v1083_v41, %v1086_v61  ;;  %v6454_v22 = vrot.slane %v979_v3, 9  ;;  %v1141_v7 = vrot.slane %v575_v13, 5  ;;  %v1704_v24 = vshll.u32 %v7758_v12, 16  ;;  %v531_v61 = vld [vmem:[#allocation2 + $0x18] sm:$0xf] }
  0x6c   : > { %6956 = vmatprep.mubr.msk.bf16.mxu0 %vm1193_vm5, %v6462_v50  ;;  %v1135_v47 = vsel %vm7488_vm10, %v1133_v4, %v1134_v28  ;;  %v1140_v54 = vrot.slane %v1138_v21, 4  ;;  %v583_v41 = vshll.u32 %v528_v56, 16  ;;  %v582_v6 = vrot.slane %v580_v15, 4 }
  0x6d   : > { %v6470_v19 = vcombine.low %v1132_v33, %v1135_v47  ;;  %v1139_v42 = vsel %vm7488_vm10, %v6454_v22, %v1138_v21  ;;  %v1706_v48 = vrot.slane %v1704_v24, 6  ;;  %v9989_v20 = vshll.u32 %v7479_v9, 16 }
  0x6e   : > { %v1722_v3 = vrot.slane %v7621_v38, 4  ;;  %6957 = vmatmul.mubr.msk.bf16.gmra.mxu0 %vm1193_vm5, %v6463_v53  ;;  %v1142_v12 = vsel %vm7488_vm10, %v1140_v54, %v1141_v7  ;;  %v585_v28 = vrot.slane %v583_v41, 5  ;;  %v1724_v13 = vshrl.u32 %v1668_v11, 16 }
  0x6f   : > { %v591_v50 = vrot.slane %v9989_v20, 5  ;;  %6972 = vmatprep.mubr.msk.bf16.mxu1 %vm1193_vm5, %v6470_v19  ;;  %v1727_v4 = vshll.u32 %v1668_v11, 16  ;;  %v6471_v33 = vcombine.low %v1139_v42, %v1142_v12  ;;  %v1707_v56 = vor.u32 %v1706_v48, %v7805_v16  ;;  %v1669_v12 = vld [vmem:[#allocation2 + $0x2c] sm:$0x3] }
  0x70   : > { %v604_v21 = vshrl.u32 %v531_v61, 16  ;;  %v586_v9 = vor.u32 %v585_v28, %v582_v6  ;;  %v1726_v47 = vrot.slane %v1724_v13, 5  ;;  %v607_v15 = vshll.u32 %v531_v61, 16 }
  0x71   : > { %v596_v22 = vor.u32 %v7495_v26, %v591_v50  ;;  %v1729_v24 = vrot.slane %v1727_v4, 6  ;;  %6973 = vmatmul.mubr.msk.bf16.gmra.mxu1 %vm1193_vm5, %v6471_v33  ;;  %v9990_v19 = vrot.slane %v7748_v36, 4  ;;  %v3349_v11 = vsel %vm1242_vm0, %v7619_v32, 0  ;;  %v534_v4 = vld [vmem:[#allocation2 + $0x24] sm:$0xf] }
  0x72   : > { %v606_v54 = vrot.slane %v604_v21, 4  ;;  %v9991_v26 = vsel %vm7742_vm2, %v7767_v17, %v7748_v36  ;;  %v587_v42 = vrot.slane %v586_v9, 4  ;;  %v609_v61 = vrot.slane %v607_v15, 5 }
  0x73   : > { %v1708_v53 = vsel %vm7742_vm2, %v9990_v19, %v1707_v56  ;;  %v597_v7 = vrot.slane %v596_v22, 4  ;;  %v1730_v41 = vor.u32 %v1729_v24, %v1726_v47  ;;  %v637_v6 = vshll.u32 %v7612_v30, 16 }
  0x74   : > { %v6521_v16 = vcombine.low %v9991_v26, %v1708_v53  ;;  %v641_v20 = vshrl.u32 %v7612_v30, 16  ;;  %v1733_v32 = vshrl.u32 %v7625_v43, 16  ;;  %v592_v36 = vsel %vm7833_vm3, %v587_v42, %v591_v50 }
  0x75   : > { %v602_v48 = vsel %vm7833_vm3, %v597_v7, %v7497_v27  ;;  %v1731_v17 = vsel %vm7742_vm2, %v1722_v3, %v1730_v41  ;;  %v610_v28 = vor.u32 %v609_v61, %v606_v54  ;;  %v1736_v13 = vshll.u32 %v7625_v43, 16 }
  0x76   : > { %7012 = vmatprep.mubr.msk.bf16.mxu0 %vm1193_vm5, %v6521_v16  ;;  %v6488_v27 = vcombine.low %v592_v36, %v602_v48  ;;  %v9992_v30 = vsel %vm7742_vm2, %v7604_v10, %v7621_v38  ;;  %v1735_v56 = vrot.slane %v1733_v32, 5  ;;  %v1741_v22 = vrot.slane %v641_v20, 5 }
  0x77   : > { %v6522_v33 = vcombine.low %v9992_v30, %v1731_v17  ;;  %v611_v21 = vrot.slane %v610_v28, 4  ;;  %v1738_v9 = vrot.slane %v1736_v13, 6  ;;  %v1742_v47 = vrot.slane %v637_v6, 6  ;;  %v1670_v17 = vld [vmem:[#allocation2 + $0x38] sm:$0x3] }
  0x78   : > { %v1747_v50 = vshrl.u32 %v1669_v12, 16  ;;  %6978 = vmatprep.mubr.msk.bf16.mxu1 %vm1193_vm5, %v6488_v27  ;;  %v1750_v3 = vshll.u32 %v1669_v12, 16  ;;  %v628_v43 = vshrl.u32 %v534_v4, 16  ;;  %v631_v24 = vshll.u32 %v534_v4, 16  ;;  %v537_v27 = vld [vmem:[#allocation2 + $0x30] sm:$0xf] }
  0x79   : > { %7013 = vmatmul.mubr.msk.bf16.vlgmr.msra.gmra.mxu0 %vm1193_vm5, %v6522_v33  ;;  %v639_v15 = vrot.slane %v637_v6, 5  ;;  %v616_v19 = vsel %vm7833_vm3, %v611_v21, %v7600_v0  ;;  %v1739_v10 = vor.u32 %v1738_v9, %v1735_v56  ;;  %v1743_v38 = vor.u32 %v1742_v47, %v1741_v22 }
  0x7a   : > { %7079 = vmatpush3.bf16.msra.mxu0 %v3349_v11  ;;  %v1749_v53 = vrot.slane %v1747_v50, 5  ;;  %v9993_v7 = vsel %vm7833_vm3, %v7629_v45, %v7596_v59  ;;  %v1752_v26 = vrot.slane %v1750_v3, 6  ;;  %v630_v16 = vrot.slane %v628_v43, 4 }
  0x7b   : > { %v6489_v54 = vcombine.low %v616_v19, %v9993_v7  ;;  %v633_v42 = vrot.slane %v631_v24, 5  ;;  %v1740_v41 = vrot.slane %v1739_v10, 4  ;;  %v1745_v61 = vrot.slane %v1743_v38, 4 }
  0x7c   : > { %v643_v48 = vrot.slane %v641_v20, 4  ;;  %v647_v6 = vshll.u32 %v7614_v31, 16  ;;  %v1753_v0 = vor.u32 %v1752_v26, %v1749_v53  ;;  %v661_v12 = vshll.u32 %v7627_v44, 16 }
  0x7d   : > { %6979 = vmatmul.mubr.msk.bf16.vlgmr.msra.gmra.mxu1 %vm1193_vm5, %v6489_v54  ;;  %v634_v11 = vor.u32 %v633_v42, %v630_v16  ;;  %v665_v32 = vshrl.u32 %v7627_v44, 16  ;;  %v1744_v59 = vsel %vm7742_vm2, %v1740_v41, %v1743_v38  ;;  %v1756_v20 = vshrl.u32 %v7644_v55, 16  ;;  %v6635_v41 = vld [vmem:[%s9910_s1 + $0xa] sm:$0x3] }
  0x7e   : > { %7045 = vmatpush3.bf16.msra.mxu1 %v7477_v8  ;;  %v644_v45 = vor.u32 %v643_v48, %v639_v15  ;;  %v649_v36 = vrot.slane %v647_v6, 5  ;;  %v1754_v31 = vsel %vm7742_vm2, %v1745_v61, %v1753_v0  ;;  %v1759_v13 = vshll.u32 %v7644_v55, 16  ;;  %v1671_v0 = vld [vmem:[#allocation2 + $0x44] sm:$0x3] }
  0x7f   : > { %v635_v28 = vrot.slane %v634_v11, 4  ;;  %v1764_v4 = vrot.slane %v665_v32, 5  ;;  %v6523_v30 = vcombine.low %v1744_v59, %v1754_v31  ;;  %v1758_v33 = vrot.slane %v1756_v20, 5  ;;  %7256 = vmatprep.subr.msk.bf16.mxu1 %vm1242_vm0, %v6635_v41 }
  0x80   : > { %v645_v44 = vrot.slane %v644_v45, 4  ;;  %v1765_v8 = vrot.slane %v661_v12, 6  ;;  %v1761_v22 = vrot.slane %v1759_v13, 6  ;;  %v1770_v21 = vshrl.u32 %v1670_v17, 16  ;;  %v540_v45 = vld [vmem:[#allocation2 + $0x3c] sm:$0xf] }
  0x81   : > { %v640_v56 = vsel %vm7833_vm3, %v635_v28, %v639_v15  ;;  %v1773_v9 = vshll.u32 %v1670_v17, 16  ;;  %7016 = vmatprep.mubr.msk.bf16.mxu0 %vm1193_vm5, %v6523_v30  ;;  %v652_v3 = vshrl.u32 %v537_v27, 16  ;;  %v655_v55 = vshll.u32 %v537_v27, 16 }
  0x82   : > { %v650_v47 = vsel %vm7833_vm3, %v645_v44, %v649_v36  ;;  %v1766_v50 = vor.u32 %v1765_v8, %v1764_v4  ;;  %v1762_v24 = vor.u32 %v1761_v22, %v1758_v33  ;;  %v1772_v19 = vrot.slane %v1770_v21, 5  ;;  %v6668_v36 = vld [vmem:[%s9910_s1 + $0xc] sm:$0x3] }
  0x83   : > { %v6490_v43 = vcombine.low %v640_v56, %v650_v47  ;;  %v1775_v10 = vrot.slane %v1773_v9, 6  ;;  %v654_v53 = vrot.slane %v652_v3, 4  ;;  %v657_v7 = vrot.slane %v655_v55, 5  ;;  %7257 = vmatprep.subr.msk.bf16.mxu0 %vm1242_vm0, %v6668_v36 }
  0x84   : > { %v1768_v38 = vrot.slane %v1766_v50, 4  ;;  %v663_v54 = vrot.slane %v661_v12, 5  ;;  %v1763_v15 = vrot.slane %v1762_v24, 4  ;;  %v667_v16 = vrot.slane %v665_v32, 4 }
  0x85   : > { %6982 = vmatprep.mubr.msk.bf16.mxu1 %vm1193_vm5, %v6490_v43  ;;  %v1776_v26 = vor.u32 %v1775_v10, %v1772_v19  ;;  %v671_v42 = vshll.u32 %v7635_v51, 16  ;;  %v658_v61 = vor.u32 %v657_v7, %v654_v53  ;;  %v685_v48 = vshll.u32 %v7733_v60, 16 }
  0x86   : > { %v689_v6 = vshrl.u32 %v7733_v60, 16  ;;  %v1779_v11 = vshrl.u32 %v7668_v62, 16  ;;  %v1767_v12 = vsel %vm7742_vm2, %v1763_v15, %v1766_v50  ;;  %v668_v32 = vor.u32 %v667_v16, %v663_v54  ;;  %v1672_v16 = vld [vmem:[#allocation2 + $0x50] sm:$0x3] }
  0x87   : > { %v1777_v51 = vsel %vm7742_vm2, %v1768_v38, %v1776_v26  ;;  %v673_v59 = vrot.slane %v671_v42, 5  ;;  %v659_v60 = vrot.slane %v658_v61, 4  ;;  %v1782_v31 = vshll.u32 %v7668_v62, 16 }
  0x88   : > { %v6524_v17 = vcombine.low %v1767_v12, %v1777_v51  ;;  %v1781_v20 = vrot.slane %v1779_v11, 5  ;;  %v669_v28 = vrot.slane %v668_v32, 4  ;;  %v1787_v13 = vrot.slane %v689_v6, 5 }
  0x89   : > { %v1788_v4 = vrot.slane %v685_v48, 6  ;;  %v1793_v27 = vshrl.u32 %v1671_v0, 16  ;;  %v664_v30 = vsel %vm7833_vm3, %v659_v60, %v663_v54  ;;  %v1784_v44 = vrot.slane %v1782_v31, 6 }
  0x8a   : > { %7017 = vmatmul.mubr.msk.bf16.gmra.mxu0 %vm1193_vm5, %v6524_v17  ;;  %v1796_v33 = vshll.u32 %v1671_v0, 16  ;;  %v676_v8 = vshrl.u32 %v540_v45, 16  ;;  %v674_v56 = vsel %vm7833_vm3, %v669_v28, %v673_v59  ;;  %v679_v62 = vshll.u32 %v540_v45, 16  ;;  %v543_v0 = vld [vmem:[#allocation2 + $0x48] sm:$0xf] }
  0x8b   : > { %v1789_v22 = vor.u32 %v1788_v4, %v1787_v13  ;;  %v1795_v21 = vrot.slane %v1793_v27, 5  ;;  %v6491_v9 = vcombine.low %v664_v30, %v674_v56  ;;  %v1785_v47 = vor.u32 %v1784_v44, %v1781_v20 }
  0x8c   : > { %v1798_v50 = vrot.slane %v1796_v33, 6  ;;  %v678_v3 = vrot.slane %v676_v8, 4  ;;  %v681_v43 = vrot.slane %v679_v62, 5  ;;  %v687_v24 = vrot.slane %v685_v48, 5 }
  0x8d   : > { %v1791_v55 = vrot.slane %v1789_v22, 4  ;;  %v691_v19 = vrot.slane %v689_v6, 4  ;;  %6983 = vmatmul.mubr.msk.bf16.gmra.mxu1 %vm1193_vm5, %v6491_v9  ;;  %v1786_v10 = vrot.slane %v1785_v47, 4  ;;  %v695_v53 = vshll.u32 %v7735_v1, 16 }
  0x8e   : > { %v1799_v38 = vor.u32 %v1798_v50, %v1795_v21  ;;  %v709_v7 = vshll.u32 %v7774_v35, 16  ;;  %v682_v54 = vor.u32 %v681_v43, %v678_v3  ;;  %v713_v26 = vshrl.u32 %v7774_v35, 16  ;;  %v1673_v43 = vld [vmem:[#allocation2 + $0x5c] sm:$0x3] }
  0x8f   : > { %v692_v15 = vor.u32 %v691_v19, %v687_v24  ;;  %v1802_v42 = vshrl.u32 %v7673_v2, 16  ;;  %v1790_v41 = vsel %vm7742_vm2, %v1786_v10, %v1789_v22  ;;  %v697_v48 = vrot.slane %v695_v53, 5  ;;  %v546_v53 = vld [vmem:[#allocation2 + $0x54] sm:$0xf] }
  0x90   : > { %v1800_v61 = vsel %vm7742_vm2, %v1791_v55, %v1799_v38  ;;  %v1805_v6 = vshll.u32 %v7673_v2, 16  ;;  %v683_v11 = vrot.slane %v682_v54, 4  ;;  %v1810_v59 = vrot.slane %v713_v26, 5 }
  0x91   : > { %v6525_v1 = vcombine.low %v1790_v41, %v1800_v61  ;;  %v693_v12 = vrot.slane %v692_v15, 4  ;;  %v1804_v51 = vrot.slane %v1802_v42, 5  ;;  %v1811_v35 = vrot.slane %v709_v7, 6 }
  0x92   : > { %v1807_v32 = vrot.slane %v1805_v6, 6  ;;  %v1816_v45 = vshrl.u32 %v1672_v16, 16  ;;  %v688_v36 = vsel %vm7833_vm3, %v683_v11, %v687_v24  ;;  %v1819_v60 = vshll.u32 %v1672_v16, 16 }
  0x93   : > { %7020 = vmatprep.mubr.msk.bf16.mxu0 %vm1193_vm5, %v6525_v1  ;;  %v698_v17 = vsel %vm7833_vm3, %v693_v12, %v697_v48  ;;  %v700_v20 = vshrl.u32 %v543_v0, 16  ;;  %v1812_v28 = vor.u32 %v1811_v35, %v1810_v59  ;;  %v703_v30 = vshll.u32 %v543_v0, 16 }
  0x94   : > { %v6492_v2 = vcombine.low %v688_v36, %v698_v17  ;;  %v1808_v31 = vor.u32 %v1807_v32, %v1804_v51  ;;  %v1818_v13 = vrot.slane %v1816_v45, 5  ;;  %v1821_v4 = vrot.slane %v1819_v60, 6 }
  0x95   : > { %v702_v27 = vrot.slane %v700_v20, 4  ;;  %v711_v44 = vrot.slane %v709_v7, 5  ;;  %v1814_v8 = vrot.slane %v1812_v28, 4  ;;  %v715_v56 = vrot.slane %v713_v26, 4 }
  0x96   : > { %6986 = vmatprep.mubr.msk.bf16.mxu1 %vm1193_vm5, %v6492_v2  ;;  %v1809_v33 = vrot.slane %v1808_v31, 4  ;;  %v719_v22 = vshll.u32 %v7781_v34, 16  ;;  %v1822_v21 = vor.u32 %v1821_v4, %v1818_v13  ;;  %v705_v62 = vrot.slane %v703_v30, 5  ;;  %v1674_v30 = vld [vmem:[#allocation2 + $0x68] sm:$0x3] }
  0x97   : > { %v733_v9 = vshll.u32 %v7812_v23, 16  ;;  %v737_v47 = vshrl.u32 %v7812_v23, 16  ;;  %v716_v3 = vor.u32 %v715_v56, %v711_v44  ;;  %v1825_v24 = vshrl.u32 %v7803_v29, 16 }
  0x98   : > { %v1813_v50 = vsel %vm7742_vm2, %v1809_v33, %v1812_v28  ;;  %v721_v55 = vrot.slane %v719_v22, 5  ;;  %v1823_v19 = vsel %vm7742_vm2, %v1814_v8, %v1822_v21  ;;  %v706_v10 = vor.u32 %v705_v62, %v702_v27 }
  0x99   : > { %v1828_v34 = vshll.u32 %v7803_v29, 16  ;;  %v1833_v38 = vrot.slane %v737_v47, 5  ;;  %v6526_v7 = vcombine.low %v1813_v50, %v1823_v19  ;;  %v717_v54 = vrot.slane %v716_v3, 4 }
  0x9a   : > { %v1827_v15 = vrot.slane %v1825_v24, 5  ;;  %v1834_v23 = vrot.slane %v733_v9, 6  ;;  %v707_v26 = vrot.slane %v706_v10, 4  ;;  %v1839_v42 = vshrl.u32 %v1673_v43, 16 }
  0x9b   : > { %v1830_v16 = vrot.slane %v1828_v34, 6  ;;  %v1842_v41 = vshll.u32 %v1673_v43, 16  ;;  %7021 = vmatmul.mubr.msk.bf16.gmra.mxu0 %vm1193_vm5, %v6526_v7  ;;  %v722_v61 = vsel %vm7833_vm3, %v717_v54, %v721_v55  ;;  %v724_v6 = vshrl.u32 %v546_v53, 16  ;;  %v1675_v7 = vld [vmem:[#allocation2 + $0x74] sm:$0x3] }
  0x9c   : > { %v1835_v48 = vor.u32 %v1834_v23, %v1833_v38  ;;  %v727_v0 = vshll.u32 %v546_v53, 16  ;;  %v712_v29 = vsel %vm7833_vm3, %v707_v26, %v711_v44  ;;  %v1841_v11 = vrot.slane %v1839_v42, 5 }
  0x9d   : > { %v1831_v1 = vor.u32 %v1830_v16, %v1827_v15  ;;  %v1844_v12 = vrot.slane %v1842_v41, 6  ;;  %v6493_v51 = vcombine.low %v712_v29, %v722_v61  ;;  %v726_v59 = vrot.slane %v724_v6, 4 }
  0x9e   : > { %v1837_v32 = vrot.slane %v1835_v48, 4  ;;  %v729_v35 = vrot.slane %v727_v0, 5  ;;  %v735_v17 = vrot.slane %v733_v9, 5  ;;  %v739_v60 = vrot.slane %v737_v47, 4 }
  0x9f   : > { %v1832_v45 = vrot.slane %v1831_v1, 4  ;;  %v1845_v36 = vor.u32 %v1844_v12, %v1841_v11  ;;  %6987 = vmatmul.mubr.msk.bf16.gmra.mxu1 %vm1193_vm5, %v6493_v51  ;;  %v743_v2 = vshll.u32 %v7814_v37, 16  ;;  %v757_v31 = vshll.u32 %v7820_v5, 16  ;;  %v549_v37 = vld [vmem:[#allocation2 + $0x60] sm:$0xf] }
  0xa0   : > { %v730_v20 = vor.u32 %v729_v35, %v726_v59  ;;  %v761_v28 = vshrl.u32 %v7820_v5, 16  ;;  %v740_v27 = vor.u32 %v739_v60, %v735_v17  ;;  %v1848_v44 = vshrl.u32 %v7827_v63, 16  ;;  %v552_v1 = vld [vmem:[#allocation2 + $0x6c] sm:$0xf] }
  0xa1   : > { %v1836_v13 = vsel %vm7742_vm2, %v1832_v45, %v1835_v48  ;;  %v1846_v4 = vsel %vm7742_vm2, %v1837_v32, %v1845_v36  ;;  %v745_v56 = vrot.slane %v743_v2, 5  ;;  %v1851_v22 = vshll.u32 %v7827_v63, 16 }
  0xa2   : > { %v6527_v33 = vcombine.low %v1836_v13, %v1846_v4  ;;  %v731_v8 = vrot.slane %v730_v20, 4  ;;  %v741_v21 = vrot.slane %v740_v27, 4  ;;  %v1850_v62 = vrot.slane %v1848_v44, 5  ;;  %v7270_v4 = vld [vmem:[#allocation2 + $0x7c] sm:$0xf] }
  0xa3   : > { %v1856_v9 = vrot.slane %v761_v28, 5  ;;  %v1857_v5 = vrot.slane %v757_v31, 6  ;;  %v1853_v50 = vrot.slane %v1851_v22, 6  ;;  %v1862_v3 = vshrl.u32 %v1674_v30, 16 }
  0xa4   : > { %7024 = vmatprep.mubr.msk.bf16.mxu0 %vm1193_vm5, %v6527_v33  ;;  %v736_v47 = vsel %vm7833_vm3, %v731_v8, %v735_v17  ;;  %v1865_v55 = vshll.u32 %v1674_v30, 16  ;;  %v746_v43 = vsel %vm7833_vm3, %v741_v21, %v745_v56  ;;  %v748_v19 = vshrl.u32 %v549_v37, 16  ;;  %v1676_v30 = vld [vmem:[#allocation2 + $0x80] sm:$0x3] }
  0xa5   : > { %v1858_v24 = vor.u32 %v1857_v5, %v1856_v9  ;;  %v751_v10 = vshll.u32 %v549_v37, 16  ;;  %v6494_v63 = vcombine.low %v736_v47, %v746_v43  ;;  %v1854_v34 = vor.u32 %v1853_v50, %v1850_v62  ;;  %v7271_v37 = vld [vmem:[#allocation2 + $0x78] sm:$0xe] }
  0xa6   : > { %v1864_v38 = vrot.slane %v1862_v3, 5  ;;  %v1867_v53 = vrot.slane %v1865_v55, 6  ;;  %v750_v15 = vrot.slane %v748_v19, 4  ;;  %v759_v26 = vrot.slane %v757_v31, 5  ;;  %v555_v3 = vld [vmem:[#allocation2 + $0x78] sm:$0xf] }
  0xa7   : > { %v1860_v54 = vrot.slane %v1858_v24, 4  ;;  %v753_v23 = vrot.slane %v751_v10, 5  ;;  %6990 = vmatprep.mubr.msk.bf16.mxu1 %vm1193_vm5, %v6494_v63  ;;  %v1855_v16 = vrot.slane %v1854_v34, 4  ;;  %v763_v41 = vrot.slane %v761_v28, 4  ;;  %v9995_v63 = vld [vmem:[#allocation4_spill] sm:$0xff] }
  0xa8   : > { %v1868_v42 = vor.u32 %v1867_v53, %v1864_v38  ;;  %v767_v61 = vshll.u32 %v7822_v39, 16  ;;  %v1877_v6 = vor.u32 %v7623_v40, %v7594_v58  ;;  %v1881_v0 = vor.u32 %v7642_v46, %v7638_v52 }
  0xa9   : > { %v754_v48 = vor.u32 %v753_v23, %v750_v15  ;;  %v1885_v29 = vshrl.u32 %v1675_v7, 16  ;;  %v1859_v11 = vsel %vm7742_vm2, %v1855_v16, %v1858_v24  ;;  %v764_v51 = vor.u32 %v763_v41, %v759_v26 }
  0xaa   : > { %v1869_v12 = vsel %vm7742_vm2, %v1860_v54, %v1868_v42  ;;  %v769_v32 = vrot.slane %v767_v61, 5  ;;  %v1878_v39 = vrot.slane %v1877_v6, 4  ;;  %v1883_v45 = vrot.slane %v1881_v0, 4 }
  0xab   : > { %v6528_v59 = vcombine.low %v1859_v11, %v1869_v12  ;;  %v755_v35 = vrot.slane %v754_v48, 4  ;;  %v765_v36 = vrot.slane %v764_v51, 4  ;;  %v1887_v17 = vrot.slane %v1885_v29, 5  ;;  %v7273_v12 = vld [vmem:[#allocation2 + $0x88] sm:$0xf] }
  0xac   : > { %v1888_v58 = vshll.u32 %v1675_v7, 16  ;;  %v772_v40 = vshrl.u32 %v552_v1, 16  ;;  %v1882_v46 = vsel %vm7742_vm2, %v1878_v39, %v1881_v0  ;;  %v775_v60 = vshll.u32 %v552_v1, 16  ;;  %v7272_v1 = vld [vmem:[#allocation2 + $0x80] sm:$0x1] }
  0xad   : > { %7025 = vmatmul.mubr.msk.bf16.gmra.mxu0 %vm1193_vm5, %v6528_v59  ;;  %v760_v52 = vsel %vm7833_vm3, %v755_v35, %v759_v26  ;;  %v9994_v20 = vshll.u32 %v7592_v57, 16  ;;  %v770_v31 = vsel %vm7833_vm3, %v765_v36, %v769_v32  ;;  %v805_v27 = vshll.u32 %v7270_v4, 16  ;;  %v1677_v39 = vld [vmem:[#allocation2 + $0x8c] sm:$0x3] }
  0xae   : > { %v1890_v28 = vrot.slane %v1888_v58, 6  ;;  %v774_v13 = vrot.slane %v772_v40, 4  ;;  %v6495_v44 = vcombine.low %v760_v52, %v770_v31  ;;  %v777_v33 = vrot.slane %v775_v60, 5 }
  0xaf   : > { %v783_v2 = vrot.slane %v9994_v20, 5  ;;  %v809_v56 = vshrl.u32 %v7270_v4, 16  ;;  %v1894_v21 = vshrl.u32 %v7271_v37, 16  ;;  %v1897_v62 = vshll.u32 %v7271_v37, 16 }
  0xb0   : > { %v1891_v22 = vor.u32 %v1890_v28, %v1887_v17  ;;  %v1903_v9 = vrot.slane %v805_v27, 6  ;;  %6991 = vmatmul.mubr.msk.bf16.gmra.mxu1 %vm1193_vm5, %v6495_v44  ;;  %v778_v57 = vor.u32 %v777_v33, %v774_v13  ;;  %v1908_v50 = vshrl.u32 %v1676_v30, 16 }
  0xb1   : > { %v788_v8 = vor.u32 %v7606_v14, %v783_v2  ;;  %v1902_v47 = vrot.slane %v809_v56, 5  ;;  %v1896_v43 = vrot.slane %v1894_v21, 5  ;;  %v1899_v24 = vrot.slane %v1897_v62, 6 }
  0xb2   : > { %v1892_v55 = vsel %vm7742_vm2, %v1883_v45, %v1891_v22  ;;  %v1911_v19 = vshll.u32 %v1676_v30, 16  ;;  %v779_v10 = vrot.slane %v778_v57, 4  ;;  %v1910_v7 = vrot.slane %v1908_v50, 5  ;;  %v7274_v45 = vld [vmem:[#allocation2 + $0x84] sm:$0xe] }
  0xb3   : > { %v789_v5 = vrot.slane %v788_v8, 4  ;;  %v6529_v14 = vcombine.low %v1882_v46, %v1892_v55  ;;  %v1904_v38 = vor.u32 %v1903_v9, %v1902_v47  ;;  %v1900_v53 = vor.u32 %v1899_v24, %v1896_v43  ;;  %v558_v46 = vld [vmem:[#allocation2 + $0x84] sm:$0xf]  ;;  %v7275_v24 = vld [vmem:[#allocation2 + $0x8c] sm:$0x1] }
  0xb4   : > { %v1913_v54 = vrot.slane %v1911_v19, 6  ;;  %v796_v15 = vshrl.u32 %v555_v3, 16  ;;  %v784_v23 = vsel %vm7833_vm3, %v779_v10, %v783_v2  ;;  %v799_v16 = vshll.u32 %v555_v3, 16 }
  0xb5   : > { %v794_v34 = vsel %vm7833_vm3, %v789_v5, %v9995_v63  ;;  %7028 = vmatprep.mubr.msk.bf16.mxu0 %vm1193_vm5, %v6529_v14  ;;  %v1906_v26 = vrot.slane %v1904_v38, 4  ;;  %v807_v42 = vrot.slane %v805_v27, 5  ;;  %v1901_v61 = vrot.slane %v1900_v53, 4  ;;  %v7276_v14 = vld [vmem:[#allocation2 + $0x94] sm:$0xf] }
  0xb6   : > { %v6496_v41 = vcombine.low %v784_v23, %v794_v34  ;;  %v1914_v48 = vor.u32 %v1913_v54, %v1910_v7  ;;  %v798_v6 = vrot.slane %v796_v15, 4  ;;  %v801_v0 = vrot.slane %v799_v16, 5  ;;  %v1678_v7 = vld [vmem:[#allocation2 + $0x98] sm:$0x3]  ;;  %v7277_v54 = vld [vmem:[#allocation2 + $0x90] sm:$0xe] }
  0xb7   : > { %v811_v29 = vrot.slane %v809_v56, 4  ;;  %v815_v11 = vshll.u32 %v7272_v1, 16  ;;  %v829_v51 = vshll.u32 %v7273_v12, 16  ;;  %v1905_v32 = vsel %vm7742_vm2, %v1901_v61, %v1904_v38 }
  0xb8   : > { %6994 = vmatprep.mubr.msk.bf16.mxu1 %vm1193_vm5, %v6496_v41  ;;  %v1915_v59 = vsel %vm7742_vm2, %v1906_v26, %v1914_v48  ;;  %v833_v35 = vshrl.u32 %v7273_v12, 16  ;;  %v1917_v36 = vshrl.u32 %v7274_v45, 16  ;;  %v802_v58 = vor.u32 %v801_v0, %v798_v6  ;;  %v561_v41 = vld [vmem:[#allocation2 + $0x90] sm:$0xf] }
  0xb9   : > { %v6530_v17 = vcombine.low %v1905_v32, %v1915_v59  ;;  %v812_v40 = vor.u32 %v811_v29, %v807_v42  ;;  %v817_v52 = vrot.slane %v815_v11, 5  ;;  %v1920_v20 = vshll.u32 %v7274_v45, 16 }
  0xba   : > { %v1919_v60 = vrot.slane %v1917_v36, 5  ;;  %v1925_v2 = vrot.slane %v833_v35, 5  ;;  %v1926_v31 = vrot.slane %v829_v51, 6  ;;  %v803_v28 = vrot.slane %v802_v58, 4 }
  0xbb   : > { %7029 = vmatmul.mubr.msk.bf16.gmra.mxu0 %vm1193_vm5, %v6530_v17  ;;  %v813_v13 = vrot.slane %v812_v40, 4  ;;  %v1931_v4 = vshrl.u32 %v1677_v39, 16  ;;  %v1934_v27 = vshll.u32 %v1677_v39, 16  ;;  %v1922_v30 = vrot.slane %v1920_v20, 6 }
  0xbc   : > { %v1927_v44 = vor.u32 %v1926_v31, %v1925_v2  ;;  %v820_v33 = vshrl.u32 %v558_v46, 16  ;;  %v823_v8 = vshll.u32 %v558_v46, 16  ;;  %v808_v56 = vsel %vm7833_vm3, %v803_v28, %v807_v42  ;;  %v7278_v31 = vld [vmem:[#allocation2 + $0x98] sm:$0x1] }
  0xbd   : > { %v818_v22 = vsel %vm7833_vm3, %v813_v13, %v817_v52  ;;  %v1933_v37 = vrot.slane %v1931_v4, 5  ;;  %v1936_v21 = vrot.slane %v1934_v27, 6  ;;  %v1923_v9 = vor.u32 %v1922_v30, %v1919_v60  ;;  %v9996_v27 = vld [vmem:[#allocation5_spill] sm:$0xff] }
  0xbe   : > { %v6497_v62 = vcombine.low %v808_v56, %v818_v22  ;;  %v1929_v57 = vrot.slane %v1927_v44, 4  ;;  %v822_v5 = vrot.slane %v820_v33, 4  ;;  %v825_v50 = vrot.slane %v823_v8, 5  ;;  %v1679_v22 = vld [vmem:[#allocation2 + $0xa4] sm:$0x3] }
  0xbf   : > { %v1937_v47 = vor.u32 %v1936_v21, %v1933_v37  ;;  %v831_v3 = vrot.slane %v829_v51, 5  ;;  %v835_v55 = vrot.slane %v833_v35, 4  ;;  %v1924_v43 = vrot.slane %v1923_v9, 4  ;;  %v7279_v37 = vld [vmem:[#allocation2 + $0x9c] sm:$0xe] }
  0xc0   : > { %6995 = vmatmul.mubr.msk.bf16.gmra.mxu1 %vm1193_vm5, %v6497_v62  ;;  %v839_v19 = vshll.u32 %v7275_v24, 16  ;;  %v853_v10 = vshll.u32 %v7276_v14, 16  ;;  %v857_v63 = vshrl.u32 %v7276_v14, 16  ;;  %v826_v38 = vor.u32 %v825_v50, %v822_v5 }
  0xc1   : > { %v1938_v34 = vsel %vm7742_vm2, %v1929_v57, %v1937_v47  ;;  %v836_v53 = vor.u32 %v835_v55, %v831_v3  ;;  %v1940_v15 = vshrl.u32 %v7277_v54, 16  ;;  %v1928_v23 = vsel %vm7742_vm2, %v1924_v43, %v1927_v44  ;;  %v564_v47 = vld [vmem:[#allocation2 + $0x9c] sm:$0xf] }
  0xc2   : > { %v841_v26 = vrot.slane %v839_v19, 5  ;;  %v1943_v16 = vshll.u32 %v7277_v54, 16  ;;  %v1948_v42 = vrot.slane %v857_v63, 5  ;;  %v6531_v61 = vcombine.low %v1928_v23, %v1938_v34 }
  0xc3   : > { %v827_v48 = vrot.slane %v826_v38, 4  ;;  %v837_v6 = vrot.slane %v836_v53, 4  ;;  %v1942_v0 = vrot.slane %v1940_v15, 5  ;;  %v1949_v1 = vrot.slane %v853_v10, 6 }
  0xc4   : > { %v1945_v29 = vrot.slane %v1943_v16, 6  ;;  %v1954_v11 = vshrl.u32 %v1678_v7, 16  ;;  %v1957_v12 = vshll.u32 %v1678_v7, 16  ;;  %7032 = vmatprep.mubr.msk.bf16.mxu0 %vm1193_vm5, %v6531_v61  ;;  %v844_v59 = vshrl.u32 %v561_v41, 16 }
  0xc5   : > { %v832_v51 = vsel %vm7833_vm3, %v827_v48, %v831_v3  ;;  %v842_v32 = vsel %vm7833_vm3, %v837_v6, %v841_v26  ;;  %v847_v35 = vshll.u32 %v561_v41, 16  ;;  %v1950_v36 = vor.u32 %v1949_v1, %v1948_v42 }
  0xc6   : > { %v6498_v39 = vcombine.low %v832_v51, %v842_v32  ;;  %v1946_v45 = vor.u32 %v1945_v29, %v1942_v0  ;;  %v1956_v17 = vrot.slane %v1954_v11, 5  ;;  %v1959_v58 = vrot.slane %v1957_v12, 6  ;;  %v7280_v0 = vld [vmem:[#allocation2 + $0xa4] sm:$0x1]  ;;  %v7281_v11 = vld [vmem:[#allocation2 + $0xac] sm:$0xf] }
  0xc7   : > { %v846_v40 = vrot.slane %v844_v59, 4  ;;  %v849_v52 = vrot.slane %v847_v35, 5  ;;  %v855_v46 = vrot.slane %v853_v10, 5  ;;  %v1952_v20 = vrot.slane %v1950_v36, 4  ;;  %v1680_v32 = vld [vmem:[#allocation2 + $0xb0] sm:$0x3] }
  0xc8   : > { %6998 = vmatprep.mubr.msk.bf16.mxu1 %vm1193_vm5, %v6498_v39  ;;  %v1947_v60 = vrot.slane %v1946_v45, 4  ;;  %v859_v2 = vrot.slane %v857_v63, 4  ;;  %v863_v28 = vshll.u32 %v7278_v31, 16  ;;  %v1960_v13 = vor.u32 %v1959_v58, %v1956_v17  ;;  %v7282_v59 = vld [vmem:[#allocation2 + $0xa8] sm:$0xe] }
  0xc9   : > { %v850_v4 = vor.u32 %v849_v52, %v846_v40  ;;  %v877_v30 = vshll.u32 %v9996_v27, 16  ;;  %v881_v44 = vshrl.u32 %v9996_v27, 16  ;;  %v1963_v21 = vshrl.u32 %v7279_v37, 16  ;;  %v567_v58 = vld [vmem:[#allocation2 + $0xa8] sm:$0xf] }
  0xca   : > { %v1951_v33 = vsel %vm7742_vm2, %v1947_v60, %v1950_v36  ;;  %v860_v8 = vor.u32 %v859_v2, %v855_v46  ;;  %v865_v56 = vrot.slane %v863_v28, 5  ;;  %v1961_v62 = vsel %vm7742_vm2, %v1952_v20, %v1960_v13 }
  0xcb   : > { %v851_v9 = vrot.slane %v850_v4, 4  ;;  %v1966_v57 = vshll.u32 %v7279_v37, 16  ;;  %v1971_v5 = vrot.slane %v881_v44, 5  ;;  %v6532_v50 = vcombine.low %v1951_v33, %v1961_v62 }
  0xcc   : > { %v861_v3 = vrot.slane %v860_v8, 4  ;;  %v1965_v55 = vrot.slane %v1963_v21, 5  ;;  %v1972_v43 = vrot.slane %v877_v30, 6  ;;  %v1977_v14 = vshrl.u32 %v1679_v22, 16 }
  0xcd   : > { %v856_v24 = vsel %vm7833_vm3, %v851_v9, %v855_v46  ;;  %v1968_v19 = vrot.slane %v1966_v57, 6  ;;  %v1980_v10 = vshll.u32 %v1679_v22, 16  ;;  %7033 = vmatmul.mubr.msk.bf16.gmra.mxu0 %vm1193_vm5, %v6532_v50  ;;  %v868_v38 = vshrl.u32 %v564_v47, 16 }
  0xce   : > { %v866_v63 = vsel %vm7833_vm3, %v861_v3, %v865_v56  ;;  %v1973_v34 = vor.u32 %v1972_v43, %v1971_v5  ;;  %v871_v53 = vshll.u32 %v564_v47, 16  ;;  %v1979_v15 = vrot.slane %v1977_v14, 5 }
  0xcf   : > { %v6499_v7 = vcombine.low %v856_v24, %v866_v63  ;;  %v1969_v54 = vor.u32 %v1968_v19, %v1965_v55  ;;  %v1982_v23 = vrot.slane %v1980_v10, 6  ;;  %v870_v16 = vrot.slane %v868_v38, 4  ;;  %v7283_v55 = vld [vmem:[#allocation2 + $0xb0] sm:$0x1]  ;;  %v7284_v24 = vld [vmem:[#allocation2 + $0xb8] sm:$0xf] }
  0xd0   : > { %v1975_v26 = vrot.slane %v1973_v34, 4  ;;  %v873_v42 = vrot.slane %v871_v53, 5  ;;  %v879_v41 = vrot.slane %v877_v30, 5  ;;  %v883_v6 = vrot.slane %v881_v44, 4  ;;  %v7285_v38 = vld [vmem:[#allocation2 + $0xb4] sm:$0xe] }
  0xd1   : > { %6999 = vmatmul.mubr.msk.bf16.gmra.mxu1 %vm1193_vm5, %v6499_v7  ;;  %v1970_v61 = vrot.slane %v1969_v54, 4  ;;  %v1983_v48 = vor.u32 %v1982_v23, %v1979_v15  ;;  %v887_v29 = vshll.u32 %v7280_v0, 16  ;;  %v901_v12 = vshll.u32 %v7281_v11, 16 }
  0xd2   : > { %v874_v1 = vor.u32 %v873_v42, %v870_v16  ;;  %v905_v51 = vshrl.u32 %v7281_v11, 16  ;;  %v1986_v35 = vshrl.u32 %v7282_v59, 16  ;;  %v884_v36 = vor.u32 %v883_v6, %v879_v41 }
  0xd3   : > { %v1974_v39 = vsel %vm7742_vm2, %v1970_v61, %v1973_v34  ;;  %v1984_v45 = vsel %vm7742_vm2, %v1975_v26, %v1983_v48  ;;  %v889_v17 = vrot.slane %v887_v29, 5  ;;  %v1989_v60 = vshll.u32 %v7282_v59, 16  ;;  %v1681_v34 = vld [vmem:[#allocation2 + $0xbc] sm:$0x3]  ;;  %v570_v26 = vld [vmem:[#allocation2 + $0xb4] sm:$0xf] }
  0xd4   : > { %v6533_v40 = vcombine.low %v1974_v39, %v1984_v45  ;;  %v875_v52 = vrot.slane %v874_v1, 4  ;;  %v1988_v46 = vrot.slane %v1986_v35, 5  ;;  %v885_v20 = vrot.slane %v884_v36, 4 }
  0xd5   : > { %v1994_v2 = vrot.slane %v905_v51, 5  ;;  %v1995_v31 = vrot.slane %v901_v12, 6  ;;  %v2000_v28 = vshrl.u32 %v1680_v32, 16  ;;  %v1991_v4 = vrot.slane %v1989_v60, 6  ;;  %v7286_v60 = vld [vmem:[#allocation2 + $0xbc] sm:$0x1] }
  0xd6   : > { %7036 = vmatprep.mubr.msk.bf16.mxu0 %vm1193_vm5, %v6533_v40  ;;  %v880_v13 = vsel %vm7833_vm3, %v875_v52, %v879_v41  ;;  %v2003_v27 = vshll.u32 %v1680_v32, 16  ;;  %v892_v30 = vshrl.u32 %v567_v58, 16  ;;  %v890_v44 = vsel %vm7833_vm3, %v885_v20, %v889_v17 }
  0xd7   : > { %v1996_v33 = vor.u32 %v1995_v31, %v1994_v2  ;;  %v2002_v8 = vrot.slane %v2000_v28, 5  ;;  %v895_v56 = vshll.u32 %v567_v58, 16  ;;  %v6500_v22 = vcombine.low %v880_v13, %v890_v44  ;;  %v7287_v28 = vld [vmem:[#allocation2 + $0xc4] sm:$0xf] }
  0xd8   : > { %v1992_v37 = vor.u32 %v1991_v4, %v1988_v46  ;;  %v2005_v21 = vrot.slane %v2003_v27, 6  ;;  %v894_v62 = vrot.slane %v892_v30, 4  ;;  %v903_v5 = vrot.slane %v901_v12, 5 }
  0xd9   : > { %v1998_v9 = vrot.slane %v1996_v33, 4  ;;  %v897_v57 = vrot.slane %v895_v56, 5  ;;  %v907_v47 = vrot.slane %v905_v51, 4  ;;  %7002 = vmatprep.mubr.msk.bf16.mxu1 %vm1193_vm5, %v6500_v22  ;;  %v911_v43 = vshll.u32 %v7283_v55, 16 }
  0xda   : > { %v1993_v50 = vrot.slane %v1992_v37, 4  ;;  %v2006_v3 = vor.u32 %v2005_v21, %v2002_v8  ;;  %v925_v19 = vshll.u32 %v7284_v24, 16  ;;  %v929_v63 = vshrl.u32 %v7284_v24, 16  ;;  %v7288_v8 = vld [vmem:[#allocation2 + $0xc0] sm:$0xe] }
  0xdb   : > { %v898_v14 = vor.u32 %v897_v57, %v894_v62  ;;  %v908_v10 = vor.u32 %v907_v47, %v903_v5  ;;  %v2009_v53 = vshrl.u32 %v7285_v38, 16  ;;  %v913_v15 = vrot.slane %v911_v43, 5 }
  0xdc   : > { %v1997_v7 = vsel %vm7742_vm2, %v1993_v50, %v1996_v33  ;;  %v2007_v54 = vsel %vm7742_vm2, %v1998_v9, %v2006_v3  ;;  %v2012_v23 = vshll.u32 %v7285_v38, 16  ;;  %v2017_v6 = vrot.slane %v929_v63, 5  ;;  %v1682_v33 = vld [vmem:[#allocation2 + $0xc8] sm:$0x3]  ;;  %v573_v9 = vld [vmem:[#allocation2 + $0xc0] sm:$0xf] }
  0xdd   : > { %v6534_v16 = vcombine.low %v1997_v7, %v2007_v54  ;;  %v899_v42 = vrot.slane %v898_v14, 4  ;;  %v909_v41 = vrot.slane %v908_v10, 4  ;;  %v2011_v61 = vrot.slane %v2009_v53, 5  ;;  %v3074_v54 = vld [vmem:[#allocation2 + $0x18] sm:$0xe] }
  0xde   : > { %v2014_v48 = vrot.slane %v2012_v23, 6  ;;  %v2018_v0 = vrot.slane %v925_v19, 6  ;;  %v2023_v29 = vshrl.u32 %v1681_v34, 16  ;;  %v2026_v12 = vshll.u32 %v1681_v34, 16 }
  0xdf   : > { %7037 = vmatmul.mubr.msk.bf16.gmra.mxu0 %vm1193_vm5, %v6534_v16  ;;  %v904_v1 = vsel %vm7833_vm3, %v899_v42, %v903_v5  ;;  %v914_v11 = vsel %vm7833_vm3, %v909_v41, %v913_v15  ;;  %v916_v51 = vshrl.u32 %v570_v26, 16  ;;  %v919_v17 = vshll.u32 %v570_v26, 16  ;;  %v2350_v42 = vld [vmem:[#allocation2 + $0x20] sm:$0x1] }
  0xe0   : > { %v6501_v32 = vcombine.low %v904_v1, %v914_v11  ;;  %v2015_v59 = vor.u32 %v2014_v48, %v2011_v61  ;;  %v2019_v35 = vor.u32 %v2018_v0, %v2017_v6  ;;  %v2025_v39 = vrot.slane %v2023_v29, 5  ;;  %v8086_v0 = vld [vmem:[#allocation2 + $0x1c] sm:$0xf]  ;;  %v7289_v1 = vld [vmem:[#allocation2 + $0xc8] sm:$0x1] }
  0xe1   : > { %v2028_v45 = vrot.slane %v2026_v12, 6  ;;  %v918_v36 = vrot.slane %v916_v51, 4  ;;  %v927_v58 = vrot.slane %v925_v19, 5  ;;  %v931_v46 = vrot.slane %v929_v63, 4 }
  0xe2   : > { %7003 = vmatmul.mubr.msk.bf16.gmra.mxu1 %vm1193_vm5, %v6501_v32  ;;  %v2016_v40 = vrot.slane %v2015_v59, 4  ;;  %v2021_v52 = vrot.slane %v2019_v35, 4  ;;  %v935_v20 = vshll.u32 %v7286_v60, 16  ;;  %v921_v31 = vrot.slane %v919_v17, 5  ;;  %v2348_v32 = vld [vmem:[#allocation2 + $0x18] sm:$0xf] }
  0xe3   : > { %v2029_v2 = vor.u32 %v2028_v45, %v2025_v39  ;;  %v949_v13 = vshll.u32 %v7287_v28, 16  ;;  %v953_v4 = vshrl.u32 %v7287_v28, 16  ;;  %v932_v30 = vor.u32 %v931_v46, %v927_v58 }
  0xe4   : > { %v2020_v27 = vsel %vm7742_vm2, %v2016_v40, %v2019_v35  ;;  %v937_v44 = vrot.slane %v935_v20, 5  ;;  %v2032_v56 = vshrl.u32 %v7288_v8, 16  ;;  %v922_v37 = vor.u32 %v921_v31, %v918_v36 }
  0xe5   : > { %v2030_v22 = vsel %vm7742_vm2, %v2021_v52, %v2029_v2  ;;  %v2035_v21 = vshll.u32 %v7288_v8, 16  ;;  %v2040_v62 = vrot.slane %v953_v4, 5  ;;  %v933_v5 = vrot.slane %v932_v30, 4  ;;  %v2353_v8 = vld [vmem:[#allocation2 + $0x2c] sm:$0x1] }
  0xe6   : > { %v6535_v57 = vcombine.low %v2020_v27, %v2030_v22  ;;  %v2034_v47 = vrot.slane %v2032_v56, 5  ;;  %v2041_v50 = vrot.slane %v949_v13, 6  ;;  %v923_v3 = vrot.slane %v922_v37, 4  ;;  %v2351_v56 = vld [vmem:[#allocation2 + $0x24] sm:$0xf] }
  0xe7   : > { %v2037_v55 = vrot.slane %v2035_v21, 6  ;;  %v2046_v43 = vshrl.u32 %v1682_v33, 16  ;;  %v2049_v24 = vshll.u32 %v1682_v33, 16  ;;  %v938_v19 = vsel %vm7833_vm3, %v933_v5, %v937_v44 }
  0xe8   : > { %7040 = vmatprep.mubr.msk.bf16.mxu0 %vm1193_vm5, %v6535_v57  ;;  %v2042_v14 = vor.u32 %v2041_v50, %v2040_v62  ;;  %v940_v10 = vshrl.u32 %v573_v9, 16  ;;  %v943_v63 = vshll.u32 %v573_v9, 16  ;;  %v928_v34 = vsel %vm7833_vm3, %v923_v3, %v927_v58  ;;  %v8109_v9 = vld [vmem:[#allocation2 + $0x28] sm:$0xf] }
  0xe9   : > { %v2038_v38 = vor.u32 %v2037_v55, %v2034_v47  ;;  %v2048_v53 = vrot.slane %v2046_v43, 5  ;;  %v2051_v7 = vrot.slane %v2049_v24, 6  ;;  %v6502_v15 = vcombine.low %v928_v34, %v938_v19 }
  0xea   : > { %v2044_v23 = vrot.slane %v2042_v14, 4  ;;  %v942_v26 = vrot.slane %v940_v10, 4  ;;  %v945_v16 = vrot.slane %v943_v63, 5  ;;  %v951_v48 = vrot.slane %v949_v13, 5 }
  0xeb   : > { %v2039_v41 = vrot.slane %v2038_v38, 4  ;;  %v2052_v61 = vor.u32 %v2051_v7, %v2048_v53  ;;  %v955_v6 = vrot.slane %v953_v4, 4  ;;  %7006 = vmatprep.mubr.msk.bf16.mxu1 %vm1193_vm5, %v6502_v15  ;;  %v959_v11 = vshll.u32 %v7289_v1, 16  ;;  %v3075_v4 = vld [vmem:[#allocation2 + $0x24] sm:$0xe] }
  0xec   : > { %v946_v29 = vor.u32 %v945_v16, %v942_v26  ;;  %v6586_v12 = vrot.slane %v3074_v54, 9  ;;  %v3140_v51 = vrot.slane %v8086_v0, 5  ;;  %v3143_v45 = vrot.slane %v2350_v42, 5  ;;  %v8124_v16 = vld [vmem:[#allocation2 + $0x34] sm:$0xf] }
  0xed   : > { %v2043_v59 = vsel %vm7742_vm2, %v2039_v41, %v2042_v14  ;;  %v2053_v35 = vsel %vm7742_vm2, %v2044_v23, %v2052_v61  ;;  %v956_v39 = vor.u32 %v955_v6, %v951_v48  ;;  %v961_v58 = vrot.slane %v959_v11, 5  ;;  %v2354_v1 = vld [vmem:[#allocation2 + $0x30] sm:$0xf] }
  0xee   : > { %v6536_v36 = vcombine.low %v2043_v59, %v2053_v35  ;;  %v947_v17 = vrot.slane %v946_v29, 4  ;;  %v3141_v40 = vsel %vm7488_vm10, %v6586_v12, %v3140_v51  ;;  %v3142_v46 = vrot.slane %v3140_v51, 4  ;;  %v2356_v29 = vld [vmem:[#allocation2 + $0x38] sm:$0x1]  ;;  %v7290_v51 = vld [vmem:[%s9910_s1 + $0xa] sm:$0x3] }
  0xef   : > { %v957_v52 = vrot.slane %v956_v39, 4  ;;  %v2397_v60 = vshrl.u32 %v2348_v32, 16  ;;  %v2400_v20 = vshll.u32 %v2348_v32, 16  ;;  %v2406_v31 = vshll.u32 %v8086_v0, 16  ;;  %v7291_v59 = vld [vmem:[%s9910_s1 + $0xc] sm:$0x3] }
  0xf0   : > { %7041 = vmatmul.mubr.msk.bf16.gmra.mxu0 %vm1193_vm5, %v6536_v36  ;;  %v952_v2 = vsel %vm7833_vm3, %v947_v17, %v951_v48  ;;  %v2410_v28 = vshrl.u32 %v8086_v0, 16  ;;  %v2416_v13 = vshll.u32 %v2350_v42, 16  ;;  %v3144_v30 = vsel %vm7488_vm10, %v3142_v46, %v3143_v45  ;;  %v3076_v42 = vld [vmem:[#allocation2 + $0x30] sm:$0xe] }
  0xf1   : > { %v962_v27 = vsel %vm7833_vm3, %v957_v52, %v961_v58  ;;  %v2399_v44 = vrot.slane %v2397_v60, 4  ;;  %v2402_v33 = vrot.slane %v2400_v20, 5  ;;  %v6603_v37 = vcombine.low %v3141_v40, %v3144_v30  ;;  %v6750_v39 = vld [vmem:[%s9910_s1 + $0x10] sm:$0x3]  ;;  %v3077_v20 = vld [vmem:[#allocation2 + $0x3c] sm:$0xe] }
  0xf2   : > { %v6503_v22 = vcombine.low %v952_v2, %v962_v27  ;;  %v2408_v21 = vrot.slane %v2406_v31, 5  ;;  %v2412_v62 = vrot.slane %v2410_v28, 4  ;;  %v2418_v5 = vrot.slane %v2416_v13, 5  ;;  %v2359_v30 = vld [vmem:[#allocation2 + $0x44] sm:$0x1] }
  0xf3   : > { %v2403_v57 = vor.u32 %v2402_v33, %v2399_v44  ;;  %v6587_v47 = vrot.slane %v3075_v4, 9  ;;  %v3147_v50 = vrot.slane %v8109_v9, 5  ;;  %7080 = vmatprep.mubr.msk.bf16.mxu0 %vm1193_vm5, %v6603_v37  ;;  %v3150_v55 = vrot.slane %v2353_v8, 5 }
  0xf4   : > { %7007 = vmatmul.mubr.msk.bf16.gmra.mxu1 %vm1193_vm5, %v6503_v22  ;;  %v2413_v3 = vor.u32 %v2412_v62, %v2408_v21  ;;  %v2421_v43 = vshrl.u32 %v2351_v56, 16  ;;  %v2424_v24 = vshll.u32 %v2351_v56, 16  ;;  %v9947_v63 = vshll.u32 %v8109_v9, 16  ;;  %v2357_v22 = vld [vmem:[#allocation2 + $0x3c] sm:$0xf] }
  0xf5   : > { %v2404_v19 = vrot.slane %v2403_v57, 4  ;;  %v3148_v14 = vsel %vm7488_vm10, %v6587_v47, %v3147_v50  ;;  %v3149_v10 = vrot.slane %v3147_v50, 4  ;;  %v9948_v7 = vshrl.u32 %v8109_v9, 16  ;;  %v8157_v57 = vld [vmem:[#allocation2 + $0x40] sm:$0xf] }
  0xf6   : > { %v2414_v34 = vrot.slane %v2413_v3, 4  ;;  %v2423_v38 = vrot.slane %v2421_v43, 4  ;;  %v2426_v53 = vrot.slane %v2424_v24, 5  ;;  %v2432_v23 = vrot.slane %v9947_v63, 5 }
  0xf7   : > { %v2409_v54 = vsel %vm7833_vm3, %v2404_v19, %v2408_v21  ;;  %v3151_v15 = vsel %vm7488_vm10, %v3149_v10, %v3150_v55  ;;  %v2440_v26 = vshll.u32 %v2353_v8, 16  ;;  %v2436_v6 = vrot.slane %v9948_v7, 4  ;;  %v8165_v10 = vld [vmem:[%s9910_s1 + $0xe] sm:$0x3] }
  0xf8   : > { %v2419_v41 = vsel %vm7833_vm3, %v2414_v34, %v2418_v5  ;;  %v6604_v61 = vcombine.low %v3148_v14, %v3151_v15  ;;  %v2427_v48 = vor.u32 %v2426_v53, %v2423_v38  ;;  %v4027_v32 = vsel %vm1242_vm0, %v7290_v51, 0  ;;  %v3078_v15 = vld [vmem:[#allocation2 + $0x48] sm:$0xe] }
  0xf9   : > { %v6554_v11 = vcombine.low %v2409_v54, %v2419_v41  ;;  %v2442_v12 = vrot.slane %v2440_v26, 5  ;;  %v4754_v35 = vsel %vm1242_vm0, %v7291_v59, 0  ;;  %v2437_v36 = vor.u32 %v2436_v6, %v2432_v23 }
  0xfa   : > { %7081 = vmatmul.mubr.msk.bf16.vlgmr.msra.gmra.mxu0 %vm1193_vm5, %v6604_v61  ;;  %v2428_v45 = vrot.slane %v2427_v48, 4  ;;  %v6588_v17 = vrot.slane %v3076_v42, 9  ;;  %v3154_v58 = vrot.slane %v8124_v16, 5  ;;  %v3157_v40 = vrot.slane %v2356_v29, 5  ;;  %v8173_v61 = vld [vmem:[#allocation2 + $0x4c] sm:$0xf] }
  0xfb   : > { %7046 = vmatprep.mubr.msk.bf16.mxu1 %vm1193_vm5, %v6554_v11  ;;  %7147 = vmatpush3.bf16.msra.mxu0 %v4754_v35  ;;  %v2445_v52 = vshrl.u32 %v2354_v1, 16  ;;  %v2448_v46 = vshll.u32 %v2354_v1, 16  ;;  %v9945_v60 = vshll.u32 %v8124_v16, 16  ;;  %v2438_v13 = vrot.slane %v2437_v36, 4  ;;  %v2362_v11 = vld [vmem:[#allocation2 + $0x50] sm:$0x1] }
  0xfc   : > { %v2433_v2 = vsel %vm7833_vm3, %v2428_v45, %v2432_v23  ;;  %v3155_v4 = vsel %vm7488_vm10, %v6588_v17, %v3154_v58  ;;  %v3156_v27 = vrot.slane %v3154_v58, 4  ;;  %7259 = vmatprep.subr.msk.bf16.mxu0 %vm1242_vm0, %v6750_v39  ;;  %v9946_v56 = vshrl.u32 %v8124_v16, 16  ;;  %v2360_v35 = vld [vmem:[#allocation2 + $0x48] sm:$0xf] }
  0xfd   : > { %v2447_v44 = vrot.slane %v2445_v52, 4  ;;  %v2450_v33 = vrot.slane %v2448_v46, 5  ;;  %v2456_v8 = vrot.slane %v9945_v60, 5  ;;  %v2443_v37 = vsel %vm7833_vm3, %v2438_v13, %v2442_v12 }
  0xfe   : > { %v3158_v21 = vsel %vm7488_vm10, %v3156_v27, %v3157_v40  ;;  %v2464_v62 = vshll.u32 %v2356_v29, 16  ;;  %v6589_v5 = vrot.slane %v3077_v20, 9  ;;  %v6555_v47 = vcombine.low %v2433_v2, %v2443_v37 }
  0xff   : > { %v6605_v50 = vcombine.low %v3155_v4, %v3158_v21  ;;  %v2451_v3 = vor.u32 %v2450_v33, %v2447_v44  ;;  %v2460_v55 = vrot.slane %v9946_v56, 4  ;;  %v3161_v24 = vrot.slane %v8157_v57, 5 }
 0x100   : > { %v2466_v43 = vrot.slane %v2464_v62, 5  ;;  %v3164_v19 = vrot.slane %v2359_v30, 5  ;;  %v2469_v14 = vshrl.u32 %v2357_v22, 16  ;;  %7047 = vmatmul.mubr.msk.bf16.vlgmr.msra.gmra.mxu1 %vm1193_vm5, %v6555_v47  ;;  %v2472_v53 = vshll.u32 %v2357_v22, 16  ;;  %v2363_v47 = vld [vmem:[#allocation2 + $0x54] sm:$0xf] }
 0x101   : > { %7084 = vmatprep.mubr.msk.bf16.mxu0 %vm1193_vm5, %v6605_v50  ;;  %v2452_v34 = vrot.slane %v2451_v3, 4  ;;  %v2461_v38 = vor.u32 %v2460_v55, %v2456_v8  ;;  %v9943_v54 = vshll.u32 %v8157_v57, 16  ;;  %7113 = vmatpush3.bf16.msra.mxu1 %v4027_v32  ;;  %v3162_v23 = vsel %vm7488_vm10, %v6589_v5, %v3161_v24  ;;  %v2365_v5 = vld [vmem:[#allocation2 + $0x5c] sm:$0x1] }
 0x102   : > { %v3163_v26 = vrot.slane %v3161_v24, 4  ;;  %v2471_v42 = vrot.slane %v2469_v14, 4  ;;  %v9944_v41 = vshrl.u32 %v8157_v57, 16  ;;  %v2474_v29 = vrot.slane %v2472_v53, 5  ;;  %7258 = vmatprep.subr.msk.bf16.mxu1 %vm1242_vm0, %v8165_v10  ;;  %v8202_v24 = vld [vmem:[#allocation2 + $0x58] sm:$0xf] }
 0x103   : > { %v2457_v48 = vsel %vm7833_vm3, %v2452_v34, %v2456_v8  ;;  %v2462_v6 = vrot.slane %v2461_v38, 4  ;;  %v2480_v1 = vrot.slane %v9943_v54, 5  ;;  %v2488_v32 = vshll.u32 %v2359_v30, 16  ;;  %v3079_v8 = vld [vmem:[#allocation2 + $0x54] sm:$0xe] }
 0x104   : > { %v3165_v12 = vsel %vm7488_vm10, %v3163_v26, %v3164_v19  ;;  %v2484_v51 = vrot.slane %v9944_v41, 4  ;;  %v6590_v59 = vrot.slane %v3078_v15, 9  ;;  %v2475_v36 = vor.u32 %v2474_v29, %v2471_v42 }
 0x105   : > { %v2467_v39 = vsel %vm7833_vm3, %v2462_v6, %v2466_v43  ;;  %v6606_v45 = vcombine.low %v3162_v23, %v3165_v12  ;;  %v3168_v17 = vrot.slane %v8173_v61, 5  ;;  %v2490_v52 = vrot.slane %v2488_v32, 5 }
 0x106   : > { %v6556_v58 = vcombine.low %v2457_v48, %v2467_v39  ;;  %v2485_v40 = vor.u32 %v2484_v51, %v2480_v1  ;;  %v3171_v46 = vrot.slane %v2362_v11, 5  ;;  %v2476_v20 = vrot.slane %v2475_v36, 4  ;;  %v2368_v36 = vld [vmem:[#allocation2 + $0x68] sm:$0x1] }
 0x107   : > { %7085 = vmatmul.mubr.msk.bf16.gmra.mxu0 %vm1193_vm5, %v6606_v45  ;;  %v3169_v2 = vsel %vm7488_vm10, %v6590_v59, %v3168_v17  ;;  %v3170_v13 = vrot.slane %v3168_v17, 4  ;;  %v2493_v4 = vshrl.u32 %v2360_v35, 16  ;;  %v2496_v30 = vshll.u32 %v2360_v35, 16 }
 0x108   : > { %7050 = vmatprep.mubr.msk.bf16.mxu1 %vm1193_vm5, %v6556_v58  ;;  %v2486_v27 = vrot.slane %v2485_v40, 4  ;;  %v9937_v44 = vshll.u32 %v8173_v61, 16  ;;  %v9942_v33 = vshrl.u32 %v8173_v61, 16  ;;  %v2481_v22 = vsel %vm7833_vm3, %v2476_v20, %v2480_v1  ;;  %v3080_v1 = vld [vmem:[#allocation2 + $0x60] sm:$0xe] }
 0x109   : > { %v3172_v37 = vsel %vm7488_vm10, %v3170_v13, %v3171_v46  ;;  %v2495_v21 = vrot.slane %v2493_v4, 4  ;;  %v2512_v62 = vshll.u32 %v2362_v11, 16  ;;  %v2498_v55 = vrot.slane %v2496_v30, 5  ;;  %v2366_v46 = vld [vmem:[#allocation2 + $0x60] sm:$0xf] }
 0x10a   : > { %v2491_v50 = vsel %vm7833_vm3, %v2486_v27, %v2490_v52  ;;  %v6607_v3 = vcombine.low %v3169_v2, %v3172_v37  ;;  %v2504_v43 = vrot.slane %v9937_v44, 5  ;;  %v2508_v14 = vrot.slane %v9942_v33, 4  ;;  %v8223_v27 = vld [vmem:[#allocation2 + $0x64] sm:$0xf] }
 0x10b   : > { %v6557_v19 = vcombine.low %v2481_v22, %v2491_v50  ;;  %v2514_v34 = vrot.slane %v2512_v62, 5  ;;  %v6591_v38 = vrot.slane %v3079_v8, 9  ;;  %v2499_v53 = vor.u32 %v2498_v55, %v2495_v21 }
 0x10c   : > { %7088 = vmatprep.mubr.msk.bf16.mxu0 %vm1193_vm5, %v6607_v3  ;;  %v3175_v15 = vrot.slane %v8202_v24, 5  ;;  %v3178_v23 = vrot.slane %v2365_v5, 5  ;;  %v2517_v26 = vshrl.u32 %v2363_v47, 16  ;;  %v2509_v42 = vor.u32 %v2508_v14, %v2504_v43 }
 0x10d   : > { %7051 = vmatmul.mubr.msk.bf16.gmra.mxu1 %vm1193_vm5, %v6557_v19  ;;  %v2520_v48 = vshll.u32 %v2363_v47, 16  ;;  %v9935_v6 = vshll.u32 %v8202_v24, 16  ;;  %v9936_v29 = vshrl.u32 %v8202_v24, 16  ;;  %v2500_v11 = vrot.slane %v2499_v53, 4  ;;  %v3081_v19 = vld [vmem:[#allocation2 + $0x6c] sm:$0xe] }
 0x10e   : > { %v3176_v12 = vsel %vm7488_vm10, %v6591_v38, %v3175_v15  ;;  %v3177_v51 = vrot.slane %v3175_v15, 4  ;;  %v2519_v32 = vrot.slane %v2517_v26, 4  ;;  %v2510_v59 = vrot.slane %v2509_v42, 4  ;;  %v2371_v15 = vld [vmem:[#allocation2 + $0x74] sm:$0x1] }
 0x10f   : > { %v2522_v35 = vrot.slane %v2520_v48, 5  ;;  %v2528_v39 = vrot.slane %v9935_v6, 5  ;;  %v2532_v45 = vrot.slane %v9936_v29, 4  ;;  %v2505_v17 = vsel %vm7833_vm3, %v2500_v11, %v2504_v43  ;;  %v8242_v11 = vld [vmem:[#allocation2 + $0x70] sm:$0xf] }
 0x110   : > { %v3179_v58 = vsel %vm7488_vm10, %v3177_v51, %v3178_v23  ;;  %v2536_v40 = vshll.u32 %v2365_v5, 16  ;;  %v6592_v52 = vrot.slane %v3080_v1, 9  ;;  %v2515_v20 = vsel %vm7833_vm3, %v2510_v59, %v2514_v34  ;;  %v2369_v23 = vld [vmem:[#allocation2 + $0x6c] sm:$0xf]  ;;  %v8414_v6 = vld [vmem:[#allocation2 + $0x28] sm:$0xf] }
 0x111   : > { %v6608_v2 = vcombine.low %v3176_v12, %v3179_v58  ;;  %v2523_v13 = vor.u32 %v2522_v35, %v2519_v32  ;;  %v2533_v4 = vor.u32 %v2532_v45, %v2528_v39  ;;  %v6558_v30 = vcombine.low %v2505_v17, %v2515_v20  ;;  %v3082_v20 = vld [vmem:[#allocation2 + $0x78] sm:$0xe] }
 0x112   : > { %v2538_v8 = vrot.slane %v2536_v40, 5  ;;  %v3182_v22 = vrot.slane %v8223_v27, 5  ;;  %v3185_v37 = vrot.slane %v2368_v36, 5  ;;  %v2541_v5 = vshrl.u32 %v2366_v46, 16 }
 0x113   : > { %7089 = vmatmul.mubr.msk.bf16.gmra.mxu0 %vm1193_vm5, %v6608_v2  ;;  %v2524_v21 = vrot.slane %v2523_v13, 4  ;;  %v2534_v62 = vrot.slane %v2533_v4, 4  ;;  %v2544_v47 = vshll.u32 %v2366_v46, 16  ;;  %7054 = vmatprep.mubr.msk.bf16.mxu1 %vm1193_vm5, %v6558_v30  ;;  %v9932_v55 = vshll.u32 %v8223_v27, 16  ;;  %v2372_v30 = vld [vmem:[#allocation2 + $0x78] sm:$0xf] }
 0x114   : > { %v3183_v50 = vsel %vm7488_vm10, %v6592_v52, %v3182_v22  ;;  %v3184_v3 = vrot.slane %v3182_v22, 4  ;;  %v9934_v43 = vshrl.u32 %v8223_v27, 16  ;;  %v2543_v38 = vrot.slane %v2541_v5, 4 }
 0x115   : > { %v2529_v14 = vsel %vm7833_vm3, %v2524_v21, %v2528_v39  ;;  %v2539_v34 = vsel %vm7833_vm3, %v2534_v62, %v2538_v8  ;;  %v2546_v53 = vrot.slane %v2544_v47, 5  ;;  %v2552_v48 = vrot.slane %v9932_v55, 5  ;;  %v2374_v62 = vld [vmem:[#allocation2 + $0x80] sm:$0x1] }
 0x116   : > { %v6559_v26 = vcombine.low %v2529_v14, %v2539_v34  ;;  %v3186_v42 = vsel %vm7488_vm10, %v3184_v3, %v3185_v37  ;;  %v2556_v1 = vrot.slane %v9934_v43, 4  ;;  %v2560_v32 = vshll.u32 %v2368_v36, 16  ;;  %v8259_v3 = vld [vmem:[#allocation2 + $0x7c] sm:$0xf] }
 0x117   : > { %v6609_v12 = vcombine.low %v3183_v50, %v3186_v42  ;;  %v2547_v51 = vor.u32 %v2546_v53, %v2543_v38  ;;  %v6593_v59 = vrot.slane %v3081_v19, 9  ;;  %v3189_v39 = vrot.slane %v8242_v11, 5 }
 0x118   : > { %7055 = vmatmul.mubr.msk.bf16.gmra.mxu1 %vm1193_vm5, %v6559_v26  ;;  %v2557_v35 = vor.u32 %v2556_v1, %v2552_v48  ;;  %v3192_v45 = vrot.slane %v2371_v15, 5  ;;  %v2565_v17 = vshrl.u32 %v2369_v23, 16  ;;  %v2562_v40 = vrot.slane %v2560_v32, 5  ;;  %v3083_v32 = vld [vmem:[#allocation2 + $0x84] sm:$0xe] }
 0x119   : > { %7092 = vmatprep.mubr.msk.bf16.mxu0 %vm1193_vm5, %v6609_v12  ;;  %v2548_v58 = vrot.slane %v2547_v51, 4  ;;  %v2568_v52 = vshll.u32 %v2369_v23, 16  ;;  %v9928_v46 = vshll.u32 %v8242_v11, 16  ;;  %v3190_v36 = vsel %vm7488_vm10, %v6593_v59, %v3189_v39 }
 0x11a   : > { %v2558_v2 = vrot.slane %v2557_v35, 4  ;;  %v3191_v13 = vrot.slane %v3189_v39, 4  ;;  %v2567_v4 = vrot.slane %v2565_v17, 4  ;;  %v9930_v21 = vshrl.u32 %v8242_v11, 16  ;;  %v8270_v17 = vld [vmem:[#allocation2 + $0x88] sm:$0xf] }
 0x11b   : > { %v2553_v8 = vsel %vm7833_vm3, %v2548_v58, %v2552_v48  ;;  %v2570_v22 = vrot.slane %v2568_v52, 5  ;;  %v2576_v37 = vrot.slane %v9928_v46, 5  ;;  %v2584_v50 = vshll.u32 %v2371_v15, 16 }
 0x11c   : > { %v2563_v5 = vsel %vm7833_vm3, %v2558_v2, %v2562_v40  ;;  %v3193_v47 = vsel %vm7488_vm10, %v3191_v13, %v3192_v45  ;;  %v6594_v19 = vrot.slane %v3082_v20, 9  ;;  %v2580_v53 = vrot.slane %v9930_v21, 4  ;;  %v2377_v2 = vld [vmem:[#allocation2 + $0x8c] sm:$0x1] }
 0x11d   : > { %v6560_v14 = vcombine.low %v2553_v8, %v2563_v5  ;;  %v6610_v34 = vcombine.low %v3190_v36, %v3193_v47  ;;  %v2571_v38 = vor.u32 %v2570_v22, %v2567_v4  ;;  %v2586_v23 = vrot.slane %v2584_v50, 5  ;;  %v2375_v8 = vld [vmem:[#allocation2 + $0x84] sm:$0xf] }
 0x11e   : > { %v3196_v26 = vrot.slane %v8259_v3, 5  ;;  %v3199_v42 = vrot.slane %v2374_v62, 5  ;;  %v2589_v48 = vshrl.u32 %v2372_v30, 16  ;;  %v2581_v15 = vor.u32 %v2580_v53, %v2576_v37 }
 0x11f   : > { %7058 = vmatprep.mubr.msk.bf16.mxu1 %vm1193_vm5, %v6560_v14  ;;  %7093 = vmatmul.mubr.msk.bf16.gmra.mxu0 %vm1193_vm5, %v6610_v34  ;;  %v2572_v1 = vrot.slane %v2571_v38, 4  ;;  %v2592_v12 = vshll.u32 %v2372_v30, 16  ;;  %v9926_v51 = vshll.u32 %v8259_v3, 16  ;;  %v9927_v45 = vshrl.u32 %v8259_v3, 16 }
 0x120   : > { %v3197_v59 = vsel %vm7488_vm10, %v6594_v19, %v3196_v26  ;;  %v3198_v35 = vrot.slane %v3196_v26, 4  ;;  %v2591_v39 = vrot.slane %v2589_v48, 4  ;;  %v2582_v40 = vrot.slane %v2581_v15, 4  ;;  %v3084_v15 = vld [vmem:[#allocation2 + $0x90] sm:$0xe] }
 0x121   : > { %v2577_v58 = vsel %vm7833_vm3, %v2572_v1, %v2576_v37  ;;  %v2594_v52 = vrot.slane %v2592_v12, 5  ;;  %v2600_v20 = vrot.slane %v9926_v51, 5  ;;  %v2604_v13 = vrot.slane %v9927_v45, 4 }
 0x122   : > { %v3200_v36 = vsel %vm7488_vm10, %v3198_v35, %v3199_v42  ;;  %v2608_v4 = vshll.u32 %v2374_v62, 16  ;;  %v6595_v30 = vrot.slane %v3083_v32, 9  ;;  %v2587_v22 = vsel %vm7833_vm3, %v2582_v40, %v2586_v23 }
 0x123   : > { %v6611_v5 = vcombine.low %v3197_v59, %v3200_v36  ;;  %v2595_v37 = vor.u32 %v2594_v52, %v2591_v39  ;;  %v3203_v47 = vrot.slane %v8270_v17, 5  ;;  %v6561_v50 = vcombine.low %v2577_v58, %v2587_v22  ;;  %v2380_v39 = vld [vmem:[#allocation2 + $0x98] sm:$0x1]  ;;  %v2378_v58 = vld [vmem:[#allocation2 + $0x90] sm:$0xf] }
 0x124   : > { %v2605_v19 = vor.u32 %v2604_v13, %v2600_v20  ;;  %v2610_v14 = vrot.slane %v2608_v4, 5  ;;  %v3206_v34 = vrot.slane %v2377_v2, 5  ;;  %v2613_v26 = vshrl.u32 %v2375_v8, 16  ;;  %v8297_v4 = vld [vmem:[#allocation2 + $0x94] sm:$0xf] }
 0x125   : > { %7096 = vmatprep.mubr.msk.bf16.mxu0 %vm1193_vm5, %v6611_v5  ;;  %v2596_v38 = vrot.slane %v2595_v37, 4  ;;  %v3204_v53 = vsel %vm7488_vm10, %v6595_v30, %v3203_v47  ;;  %v3205_v62 = vrot.slane %v3203_v47, 4  ;;  %7059 = vmatmul.mubr.msk.bf16.gmra.mxu1 %vm1193_vm5, %v6561_v50  ;;  %v2616_v23 = vshll.u32 %v2375_v8, 16 }
 0x126   : > { %v2606_v42 = vrot.slane %v2605_v19, 4  ;;  %v9923_v48 = vshll.u32 %v8270_v17, 16  ;;  %v9924_v1 = vshrl.u32 %v8270_v17, 16  ;;  %v2615_v59 = vrot.slane %v2613_v26, 4 }
 0x127   : > { %v2601_v12 = vsel %vm7833_vm3, %v2596_v38, %v2600_v20  ;;  %v3207_v32 = vsel %vm7488_vm10, %v3205_v62, %v3206_v34  ;;  %v2632_v35 = vshll.u32 %v2377_v2, 16  ;;  %v2618_v36 = vrot.slane %v2616_v23, 5  ;;  %v3085_v38 = vld [vmem:[#allocation2 + $0x9c] sm:$0xe] }
 0x128   : > { %v2611_v40 = vsel %vm7833_vm3, %v2606_v42, %v2610_v14  ;;  %v6612_v52 = vcombine.low %v3204_v53, %v3207_v32  ;;  %v2624_v13 = vrot.slane %v9923_v48, 5  ;;  %v2628_v20 = vrot.slane %v9924_v1, 4 }
 0x129   : > { %v6562_v30 = vcombine.low %v2601_v12, %v2611_v40  ;;  %v2634_v8 = vrot.slane %v2632_v35, 5  ;;  %v6596_v22 = vrot.slane %v3084_v15, 9  ;;  %v2619_v2 = vor.u32 %v2618_v36, %v2615_v59  ;;  %v2383_v59 = vld [vmem:[#allocation2 + $0xa4] sm:$0x1]  ;;  %v2381_v36 = vld [vmem:[#allocation2 + $0x9c] sm:$0xf] }
 0x12a   : > { %7097 = vmatmul.mubr.msk.bf16.gmra.mxu0 %vm1193_vm5, %v6612_v52  ;;  %v3210_v5 = vrot.slane %v8297_v4, 5  ;;  %v3213_v37 = vrot.slane %v2380_v39, 5  ;;  %v2637_v47 = vshrl.u32 %v2378_v58, 16  ;;  %v2629_v50 = vor.u32 %v2628_v20, %v2624_v13 }
 0x12b   : > { %7062 = vmatprep.mubr.msk.bf16.mxu1 %vm1193_vm5, %v6562_v30  ;;  %v2640_v19 = vshll.u32 %v2378_v58, 16  ;;  %v9919_v14 = vshll.u32 %v8297_v4, 16  ;;  %v9922_v34 = vshrl.u32 %v8297_v4, 16  ;;  %v2620_v53 = vrot.slane %v2619_v2, 4 }
 0x12c   : > { %v3211_v62 = vsel %vm7488_vm10, %v6596_v22, %v3210_v5  ;;  %v3212_v26 = vrot.slane %v3210_v5, 4  ;;  %v2639_v42 = vrot.slane %v2637_v47, 4  ;;  %v2630_v23 = vrot.slane %v2629_v50, 4  ;;  %v8318_v5 = vld [vmem:[#allocation2 + $0xa0] sm:$0xf] }
 0x12d   : > { %v2642_v15 = vrot.slane %v2640_v19, 5  ;;  %v2648_v12 = vrot.slane %v9919_v14, 5  ;;  %v2652_v32 = vrot.slane %v9922_v34, 4  ;;  %v2625_v35 = vsel %vm7833_vm3, %v2620_v53, %v2624_v13 }
 0x12e   : > { %v3214_v58 = vsel %vm7488_vm10, %v3212_v26, %v3213_v37  ;;  %v2656_v40 = vshll.u32 %v2380_v39, 16  ;;  %v6597_v52 = vrot.slane %v3085_v38, 9  ;;  %v2635_v30 = vsel %vm7833_vm3, %v2630_v23, %v2634_v8 }
 0x12f   : > { %v6613_v20 = vcombine.low %v3211_v62, %v3214_v58  ;;  %v2643_v22 = vor.u32 %v2642_v15, %v2639_v42  ;;  %v2653_v2 = vor.u32 %v2652_v32, %v2648_v12  ;;  %v6563_v47 = vcombine.low %v2625_v35, %v2635_v30  ;;  %v3086_v42 = vld [vmem:[#allocation2 + $0xa8] sm:$0xe]  ;;  %v2386_v58 = vld [vmem:[#allocation2 + $0xb0] sm:$0x1] }
 0x130   : > { %v2658_v50 = vrot.slane %v2656_v40, 5  ;;  %v3217_v19 = vrot.slane %v8318_v5, 5  ;;  %v3220_v14 = vrot.slane %v2383_v59, 5  ;;  %v2661_v39 = vshrl.u32 %v2381_v36, 16  ;;  %v2384_v40 = vld [vmem:[#allocation2 + $0xa8] sm:$0xf] }
 0x131   : > { %7100 = vmatprep.mubr.msk.bf16.mxu0 %vm1193_vm5, %v6613_v20  ;;  %v2644_v13 = vrot.slane %v2643_v22, 4  ;;  %v2654_v37 = vrot.slane %v2653_v2, 4  ;;  %v2664_v38 = vshll.u32 %v2381_v36, 16  ;;  %7063 = vmatmul.mubr.msk.bf16.gmra.mxu1 %vm1193_vm5, %v6563_v47  ;;  %v9920_v62 = vshll.u32 %v8318_v5, 16  ;;  %v8337_v22 = vld [vmem:[#allocation2 + $0xac] sm:$0xf]  ;;  %v8341_v2 = vpop.f32.mrf.mxu1 }
 0x132   : > { %v3218_v8 = vsel %vm7488_vm10, %v6597_v52, %v3217_v19  ;;  %v3219_v53 = vrot.slane %v3217_v19, 4  ;;  %v9921_v26 = vshrl.u32 %v8318_v5, 16  ;;  %v2663_v32 = vrot.slane %v2661_v39, 4  ;;  %9998 = vst [vmem:[#allocation5_spill] sm:$0xff] %v8341_v2 }
 0x133   : > { %v2649_v23 = vsel %vm7833_vm3, %v2644_v13, %v2648_v12  ;;  %v2659_v15 = vsel %vm7833_vm3, %v2654_v37, %v2658_v50  ;;  %v2666_v35 = vrot.slane %v2664_v38, 5  ;;  %v2672_v30 = vrot.slane %v9920_v62, 5  ;;  %v8339_v12 = vpop.f32.mrf.mxu0 }
 0x134   : > { %v6564_v36 = vcombine.low %v2649_v23, %v2659_v15  ;;  %v3221_v52 = vsel %vm7488_vm10, %v3219_v53, %v3220_v14  ;;  %v2676_v20 = vrot.slane %v9921_v26, 4  ;;  %9997 = vst [vmem:[#allocation4_spill] sm:$0xff] %v8339_v12  ;;  %v2680_v19 = vshll.u32 %v2383_v59, 16  ;;  %v3087_v26 = vld [vmem:[#allocation2 + $0xb4] sm:$0xe] }
 0x135   : > { %v6614_v47 = vcombine.low %v3218_v8, %v3221_v52  ;;  %v2667_v50 = vor.u32 %v2666_v35, %v2663_v32  ;;  %v6598_v13 = vrot.slane %v3086_v42, 9  ;;  %v3224_v14 = vrot.slane %v8337_v22, 5  ;;  %v2387_v32 = vld [vmem:[#allocation2 + $0xb4] sm:$0xf]  ;;  %v8349_v35 = vpop.f32.mrf.mxu0 }
 0x136   : > { %7066 = vmatprep.mubr.msk.bf16.mxu1 %vm1193_vm5, %v6564_v36  ;;  %v2677_v37 = vor.u32 %v2676_v20, %v2672_v30  ;;  %v3227_v39 = vrot.slane %v2386_v58, 5  ;;  %v2685_v38 = vshrl.u32 %v2384_v40, 16  ;;  %v2682_v23 = vrot.slane %v2680_v19, 5  ;;  %9999 = vst [vmem:[#allocation6_spill] sm:$0xff] %v8349_v35  ;;  %v8351_v36 = vpop.f32.mrf.mxu1 }
 0x137   : > { %7101 = vmatmul.mubr.msk.bf16.gmra.mxu0 %vm1193_vm5, %v6614_v47  ;;  %v2668_v53 = vrot.slane %v2667_v50, 4  ;;  %v2688_v15 = vshll.u32 %v2384_v40, 16  ;;  %v9925_v62 = vshll.u32 %v8337_v22, 16  ;;  %v3225_v59 = vsel %vm7488_vm10, %v6598_v13, %v3224_v14  ;;  %10000 = vst [vmem:[#allocation7_spill] sm:$0xff] %v8351_v36  ;;  %v2389_v50 = vld [vmem:[#allocation2 + $0xbc] sm:$0x1]  ;;  %v8367_v46 = vpop.f32.mrf.mxu0 }
 0x138   : > { %v2678_v34 = vrot.slane %v2677_v37, 4  ;;  %v3226_v8 = vrot.slane %v3224_v14, 4  ;;  %v2687_v42 = vrot.slane %v2685_v38, 4  ;;  %v9929_v47 = vshrl.u32 %v8337_v22, 16  ;;  %v8362_v14 = vld [vmem:[#allocation2 + $0xb8] sm:$0xf] }
 0x139   : > { %v2673_v52 = vsel %vm7833_vm3, %v2668_v53, %v2672_v30  ;;  %v2690_v20 = vrot.slane %v2688_v15, 5  ;;  %v2696_v40 = vrot.slane %v9925_v62, 5  ;;  %v2704_v37 = vshll.u32 %v2386_v58, 16  ;;  %10001 = vst [vmem:[#allocation8_spill] sm:$0xff] %v8367_v46 }
 0x13a   : > { %v2683_v19 = vsel %vm7833_vm3, %v2678_v34, %v2682_v23  ;;  %v3228_v13 = vsel %vm7488_vm10, %v3226_v8, %v3227_v39  ;;  %v6599_v38 = vrot.slane %v3087_v26, 9  ;;  %v2700_v53 = vrot.slane %v9929_v47, 4  ;;  %v8369_v34 = vpop.f32.mrf.mxu1  ;;  %v8387_v47 = vpop.f32.mrf.mxu0 }
 0x13b   : > { %v6565_v48 = vcombine.low %v2673_v52, %v2683_v19  ;;  %v6615_v1 = vcombine.low %v3225_v59, %v3228_v13  ;;  %v2691_v30 = vor.u32 %v2690_v20, %v2687_v42  ;;  %v2706_v15 = vrot.slane %v2704_v37, 5  ;;  %10002 = vst [vmem:[#allocation9_spill] sm:$0xff] %v8369_v34  ;;  %v3088_v59 = vld [vmem:[#allocation2 + $0xc0] sm:$0xe]  ;;  %v8377_v19 = vld [vmem:[#allocation2 + $0xc4] sm:$0xf] }
 0x13c   : > { %v3231_v62 = vrot.slane %v8362_v14, 5  ;;  %v3234_v51 = vrot.slane %v2389_v50, 5  ;;  %v2709_v45 = vshrl.u32 %v2387_v32, 16  ;;  %v2701_v58 = vor.u32 %v2700_v53, %v2696_v40  ;;  %v2392_v37 = vld [vmem:[#allocation2 + $0xc8] sm:$0x1]  ;;  %10003 = vst [vmem:[#allocation10_spill] sm:$0xff] %v8387_v47  ;;  %v8389_v21 = vpop.f32.mrf.mxu1 }
 0x13d   : > { %7067 = vmatmul.mubr.msk.bf16.gmra.mxu1 %vm1193_vm5, %v6565_v48  ;;  %7104 = vmatprep.mubr.msk.bf16.mxu0 %vm1193_vm5, %v6615_v1  ;;  %v2692_v26 = vrot.slane %v2691_v30, 4  ;;  %v2712_v39 = vshll.u32 %v2387_v32, 16  ;;  %v9931_v23 = vshll.u32 %v8362_v14, 16  ;;  %v9933_v20 = vshrl.u32 %v8362_v14, 16  ;;  %v2390_v53 = vld [vmem:[#allocation2 + $0xc0] sm:$0xf] }
 0x13e   : > { %v3232_v8 = vsel %vm7488_vm10, %v6599_v38, %v3231_v62  ;;  %v3233_v42 = vrot.slane %v3231_v62, 4  ;;  %v2711_v52 = vrot.slane %v2709_v45, 4  ;;  %v2702_v13 = vrot.slane %v2701_v58, 4  ;;  %10004 = vst [vmem:[#allocation11_spill] sm:$0xff] %v8389_v21 }
 0x13f   : > { %v2697_v48 = vsel %vm7833_vm3, %v2692_v26, %v2696_v40  ;;  %v2714_v1 = vrot.slane %v2712_v39, 5  ;;  %v2720_v32 = vrot.slane %v9931_v23, 5  ;;  %v2724_v62 = vrot.slane %v9933_v20, 4 }
 0x140   : > { %v3235_v30 = vsel %vm7488_vm10, %v3233_v42, %v3234_v51  ;;  %v2728_v45 = vshll.u32 %v2389_v50, 16  ;;  %v6600_v38 = vrot.slane %v3088_v59, 9  ;;  %v2707_v40 = vsel %vm7833_vm3, %v2702_v13, %v2706_v15  ;;  %v311_v13 = vld [vmem:[%s7467_s28 + $0x78] sm:$0xf] }
 0x141   : > { %v6616_v26 = vcombine.low %v3232_v8, %v3235_v30  ;;  %v2715_v58 = vor.u32 %v2714_v1, %v2711_v52  ;;  %v3238_v39 = vrot.slane %v8377_v19, 5  ;;  %v6566_v23 = vcombine.low %v2697_v48, %v2707_v40  ;;  %v8401_v1 = vpop.f32.mrf.mxu0  ;;  %v8403_v30 = vpop.f32.mrf.mxu1 }
 0x142   : > { %v2725_v51 = vor.u32 %v2724_v62, %v2720_v32  ;;  %v2730_v42 = vrot.slane %v2728_v45, 5  ;;  %v3241_v55 = vrot.slane %v2392_v37, 5  ;;  %v2733_v43 = vshrl.u32 %v2390_v53, 16  ;;  %10005 = vst [vmem:[#allocation12_spill] sm:$0xff] %v8403_v30 }
 0x143   : > { %7105 = vmatmul.mubr.msk.bf16.gmra.mxu0 %vm1193_vm5, %v6616_v26  ;;  %v2716_v50 = vrot.slane %v2715_v58, 4  ;;  %v3239_v59 = vsel %vm7488_vm10, %v6600_v38, %v3238_v39  ;;  %v3240_v20 = vrot.slane %v3238_v39, 4  ;;  %7070 = vmatprep.mubr.msk.bf16.mxu1 %vm1193_vm5, %v6566_v23  ;;  %v2736_v8 = vshll.u32 %v2390_v53, 16  ;;  %v312_v23 = vld [vmem:[%s7467_s28 + $0x7c] sm:$0xf] }
 0x144   : > { %v2726_v15 = vrot.slane %v2725_v51, 4  ;;  %v9938_v52 = vshll.u32 %v8377_v19, 16  ;;  %v9941_v48 = vshrl.u32 %v8377_v19, 16  ;;  %v2735_v38 = vrot.slane %v2733_v43, 4  ;;  %v4223_v26 = vld [vmem:[#allocation2 + $0x24] sm:$0xf] }
 0x145   : > { %v2721_v62 = vsel %vm7833_vm3, %v2716_v50, %v2720_v32  ;;  %v3242_v45 = vsel %vm7488_vm10, %v3240_v20, %v3241_v55  ;;  %v2752_v40 = vshll.u32 %v2392_v37, 16  ;;  %v2738_v39 = vrot.slane %v2736_v8, 5 }
 0x146   : > { %v2731_v53 = vsel %vm7833_vm3, %v2726_v15, %v2730_v42  ;;  %v6617_v58 = vcombine.low %v3239_v59, %v3242_v45  ;;  %v2744_v51 = vrot.slane %v9938_v52, 5  ;;  %v2748_v32 = vrot.slane %v9941_v48, 4  ;;  %v8419_v42 = vpop.f32.mrf.mxu0  ;;  %v8421_v59 = vpop.f32.mrf.mxu1 }
 0x147   : > { %v6567_v29 = vcombine.low %v2721_v62, %v2731_v53  ;;  %v2754_v50 = vrot.slane %v2752_v40, 5  ;;  %v423_v55 = vrot.slane %v311_v13, 7  ;;  %v2739_v43 = vor.u32 %v2738_v39, %v2735_v38  ;;  %10006 = vst [vmem:[#allocation13_spill] sm:$0xff] %v8421_v59  ;;  %v4225_v62 = vld [vmem:[#allocation2 + $0x2c] sm:$0x1] }
 0x148   : > { %7108 = vmatprep.mubr.msk.bf16.mxu0 %vm1193_vm5, %v6617_v58  ;;  %v425_v20 = vrot.slane %v312_v23, 7  ;;  %v4272_v37 = vshrl.u32 %v4223_v26, 16  ;;  %v4275_v44 = vshll.u32 %v4223_v26, 16  ;;  %v2749_v15 = vor.u32 %v2748_v32, %v2744_v51  ;;  %v8437_v58 = vpop.f32.mrf.mxu0 }
 0x149   : > { %7071 = vmatmul.mubr.msk.bf16.gmra.mxu1 %vm1193_vm5, %v6567_v29  ;;  %v424_v8 = vrot.slane %v423_v55, 4  ;;  %524 = vst.msk [vmem:[#allocation2 + $0xcc] sm:$0xe] %vm477_vm8, %v423_v55  ;;  %v9939_v45 = vshll.u32 %v8414_v6, 16  ;;  %v9940_v13 = vshrl.u32 %v8414_v6, 16  ;;  %v2740_v40 = vrot.slane %v2739_v43, 4 }
 0x14a   : > { %v427_v38 = vrot.slane %v425_v20, 4  ;;  %v4274_v23 = vrot.slane %v4272_v37, 4  ;;  %v4277_v53 = vrot.slane %v4275_v44, 5  ;;  %v2750_v26 = vrot.slane %v2749_v15, 4  ;;  %v3544_v44 = vld [vmem:[#allocation2 + $0x20] sm:$0x3] }
 0x14b   : > { %v426_v39 = vsel %vm7518_vm11, %v424_v8, %v425_v20  ;;  %v4283_v29 = vrot.slane %v9939_v45, 5  ;;  %v4287_v32 = vrot.slane %v9940_v13, 4  ;;  %v2745_v55 = vsel %vm7833_vm3, %v2740_v40, %v2744_v51  ;;  %v7292_v15 = vld [vmem:[#allocation2 + $0x18] sm:$0xe]  ;;  %v8439_v20 = vpop.f32.mrf.mxu1 }
 0x14c   : > { %525 = vst.msk [vmem:[#allocation2 + $0xd0] sm:$0xf] %vm219_vm1, %v426_v39  ;;  %v4278_v43 = vor.u32 %v4277_v53, %v4274_v23  ;;  %v4291_v37 = vshll.u32 %v4225_v62, 16  ;;  %v3561_v52 = vshrl.u32 %v7292_v15, 16  ;;  %10008 = vst [vmem:[#allocation3_spill] sm:$0xff] %v8439_v20  ;;  %v2755_v8 = vsel %vm7833_vm3, %v2750_v26, %v2754_v50 }
 0x14d   : > { %526 = vst.msk [vmem:[#allocation2 + $0xd4] sm:$0x1] %vm480_vm9, %v427_v38  ;;  %v4288_v45 = vor.u32 %v4287_v32, %v4283_v29  ;;  %v3564_v13 = vshll.u32 %v7292_v15, 16  ;;  %v3569_v51 = vrot.slane %v2410_v28, 5  ;;  %v6568_v40 = vcombine.low %v2745_v55, %v2755_v8  ;;  %v4226_v62 = vld [vmem:[#allocation2 + $0x30] sm:$0xf]  ;;  %v8450_v28 = vpop.f32.mrf.mxu0  ;;  %v8452_v55 = vpop.f32.mrf.mxu1 }
 0x14e   : > { %v4279_v39 = vrot.slane %v4278_v43, 4  ;;  %v4293_v38 = vrot.slane %v4291_v37, 5  ;;  %v3563_v23 = vrot.slane %v3561_v52, 5  ;;  %v3570_v33 = vrot.slane %v2406_v31, 6  ;;  %10009 = vst [vmem:[#allocation14_spill] sm:$0xff] %v8452_v55 }
 0x14f   : > { %v4289_v53 = vrot.slane %v4288_v45, 4  ;;  %v3566_v48 = vrot.slane %v3564_v13, 6  ;;  %v3575_v54 = vshrl.u32 %v3544_v44, 16  ;;  %7074 = vmatprep.mubr.msk.bf16.mxu1 %vm1193_vm5, %v6568_v40  ;;  %v3578_v32 = vshll.u32 %v3544_v44, 16  ;;  %v8461_v7 = vpop.f32.mrf.mxu0  ;;  %v4237_v55 = vld [vmem:[#allocation2 + $0x5c] sm:$0x1] }
 0x150   : > { %v3089_v41 = vld [vmem:[#allocation2 + $0xcc] sm:$0xe]  ;;  %v4284_v26 = vsel %vm7833_vm3, %v4279_v39, %v4283_v29  ;;  %v4296_v0 = vshrl.u32 %v4226_v62, 16  ;;  %v3571_v37 = vor.u32 %v3570_v33, %v3569_v51 }
 0x151   : > { %v2393_v50 = vld [vmem:[#allocation2 + $0xcc] sm:$0xf]  ;;  %v4294_v45 = vsel %vm7833_vm3, %v4289_v53, %v4293_v38  ;;  %v6601_v31 = vrot.slane %v3089_v41, 9  ;;  %v3567_v13 = vor.u32 %v3566_v48, %v3563_v23  ;;  %v3577_v15 = vrot.slane %v3575_v54, 5  ;;  %v8463_v38 = vpop.f32.mrf.mxu1  ;;  %v8475_v46 = vpop.f32.mrf.mxu0 }
 0x152   : > { %v2757_v52 = vshrl.u32 %v2393_v50, 16  ;;  %v2760_v43 = vshll.u32 %v2393_v50, 16  ;;  %v6669_v44 = vcombine.low %v4284_v26, %v4294_v45  ;;  %10010 = vst [vmem:[#allocation15_spill] sm:$0xff] %v8463_v38  ;;  %v3573_v48 = vrot.slane %v3571_v37, 4 }
 0x153   : > { %v8456_v8 = vld [vmem:[#allocation2 + $0xd0] sm:$0xf]  ;;  %v3568_v54 = vrot.slane %v3567_v13, 4 }
 0x154   : > { %v2395_v40 = vld [vmem:[#allocation2 + $0xd4] sm:$0x1]  ;;  %v2759_v60 = vrot.slane %v2757_v52, 4  ;;  %v2762_v29 = vrot.slane %v2760_v43, 5  ;;  %v3245_v39 = vrot.slane %v8456_v8, 5  ;;  %v9949_v63 = vshll.u32 %v8456_v8, 16 }
 0x155   : > { %v3248_v56 = vrot.slane %v2395_v40, 5  ;;  %v9950_v50 = vshrl.u32 %v8456_v8, 16  ;;  %v2776_v33 = vshll.u32 %v2395_v40, 16  ;;  %v4227_v52 = vld [vmem:[#allocation2 + $0x34] sm:$0xf]  ;;  %v3572_v47 = vsel %vm7742_vm2, %v3568_v54, %v3571_v37 }
 0x156   : > { %v2763_v41 = vor.u32 %v2762_v29, %v2759_v60  ;;  %v3246_v51 = vsel %vm7488_vm10, %v6601_v31, %v3245_v39  ;;  %v3247_v23 = vrot.slane %v3245_v39, 4  ;;  %v2768_v53 = vrot.slane %v9949_v63, 5  ;;  %v4228_v40 = vld [vmem:[#allocation2 + $0x38] sm:$0x1]  ;;  %v8477_v63 = vpop.f32.mrf.mxu1 }
 0x157   : > { %v2772_v26 = vrot.slane %v9950_v50, 4  ;;  %v2778_v45 = vrot.slane %v2776_v33, 5  ;;  %v3580_v60 = vrot.slane %v3578_v32, 6  ;;  %v4298_v31 = vrot.slane %v4296_v0, 4  ;;  %10011 = vst [vmem:[#allocation16_spill] sm:$0xff] %v8477_v63 }
 0x158   : > { %v2764_v43 = vrot.slane %v2763_v41, 4  ;;  %v3249_v13 = vsel %vm7488_vm10, %v3247_v23, %v3248_v56  ;;  %v4299_v39 = vshll.u32 %v4226_v62, 16  ;;  %v4305_v50 = vshll.u32 %v4227_v52, 16 }
 0x159   : > { %v2773_v29 = vor.u32 %v2772_v26, %v2768_v53  ;;  %v6618_v35 = vcombine.low %v3246_v51, %v3249_v13  ;;  %v3581_v33 = vor.u32 %v3580_v60, %v3577_v15  ;;  %v4309_v32 = vshrl.u32 %v4227_v52, 16  ;;  %v3545_v26 = vld [vmem:[#allocation2 + $0x2c] sm:$0x3]  ;;  %v8489_v52 = vpop.f32.mrf.mxu1  ;;  %v7293_v13 = vld [vmem:[#allocation2 + $0x24] sm:$0xe] }
 0x15a   : > { %v2769_v41 = vsel %vm7833_vm3, %v2764_v43, %v2768_v53  ;;  %v4301_v37 = vrot.slane %v4299_v39, 5  ;;  %v4315_v54 = vshll.u32 %v4228_v40, 16  ;;  %v4307_v62 = vrot.slane %v4305_v50, 5  ;;  %v8487_v43 = vpop.f32.mrf.mxu0  ;;  %10012 = vst [vmem:[#allocation17_spill] sm:$0xff] %v8489_v52 }
 0x15b   : > { %v2774_v12 = vrot.slane %v2773_v29, 4  ;;  %7109 = vmatmul.mubr.msk.bf16.gmra.mxu0 %vm1193_vm5, %v6618_v35  ;;  %v3582_v56 = vsel %vm7742_vm2, %v3573_v48, %v3581_v33  ;;  %v5468_v0 = vrot.slane %v4305_v50, 6  ;;  %v4311_v15 = vrot.slane %v4309_v32, 4 }
 0x15c   : > { %7148 = vmatprep.mubr.msk.bf16.mxu0 %vm1193_vm5, %v6669_v44  ;;  %v6636_v51 = vcombine.low %v3572_v47, %v3582_v56  ;;  %v4302_v53 = vor.u32 %v4301_v37, %v4298_v31  ;;  %v4317_v35 = vrot.slane %v4315_v54, 5  ;;  %v5467_v40 = vrot.slane %v4309_v32, 5 }
 0x15d   : > { %v2779_v23 = vsel %vm7833_vm3, %v2774_v12, %v2778_v45  ;;  %v3584_v48 = vshrl.u32 %v7293_v13, 16  ;;  %v4312_v50 = vor.u32 %v4311_v15, %v4307_v62  ;;  %v3587_v39 = vshll.u32 %v7293_v13, 16  ;;  %v8503_v15 = vpop.f32.mrf.mxu0 }
 0x15e   : > { %v6569_v60 = vcombine.low %v2769_v41, %v2779_v23  ;;  %v4303_v29 = vrot.slane %v4302_v53, 4  ;;  %v10013_v12 = vshrl.u32 %v8109_v9, 16  ;;  %v8494_v47 = vor.u32 %v5468_v0, %v5467_v40  ;;  %v4229_v41 = vld [vmem:[#allocation2 + $0x3c] sm:$0xf]  ;;  %v8501_v53 = vld [vmem:[#allocation2 + $0x40] sm:$0xf]  ;;  %v8505_v0 = vpop.f32.mrf.mxu1 }
 0x15f   : > { %v3586_v44 = vrot.slane %v3584_v48, 5  ;;  %v10014_v31 = vshll.u32 %v8109_v9, 16  ;;  %v3598_v37 = vshrl.u32 %v3545_v26, 16  ;;  %v4313_v54 = vrot.slane %v4312_v50, 4  ;;  %10015 = vst [vmem:[#allocation18_spill] sm:$0xff] %v8505_v0  ;;  %v8517_v52 = vpop.f32.mrf.mxu0 }
 0x160   : > { %v3592_v45 = vrot.slane %v10013_v12, 5  ;;  %7075 = vmatmul.mubr.msk.bf16.gmra.mxu1 %vm1193_vm5, %v6569_v60  ;;  %v4308_v32 = vsel %vm7833_vm3, %v4303_v29, %v4307_v62  ;;  %v3589_v56 = vrot.slane %v3587_v39, 6  ;;  %v3601_v23 = vshll.u32 %v3545_v26, 16  ;;  %v4231_v29 = vld [vmem:[#allocation2 + $0x44] sm:$0x1]  ;;  %10016 = vst [vmem:[#allocation19_spill] sm:$0xff] %v8517_v52 }
 0x161   : > { %v3593_v33 = vrot.slane %v10014_v31, 6  ;;  %7114 = vmatprep.mubr.msk.bf16.mxu1 %vm1193_vm5, %v6636_v51  ;;  %v3600_v40 = vrot.slane %v3598_v37, 5  ;;  %v5224_v9 = vsel %vm1242_vm0, %v8165_v10, 0  ;;  %v7294_v51 = vld [vmem:[%s9910_s1 + $0x10] sm:$0x3]  ;;  %v4318_v26 = vsel %vm7833_vm3, %v4313_v54, %v4317_v35 }
 0x162   : > { %v5902_v62 = vsel %vm1242_vm0, %v7294_v51, 0  ;;  %v3590_v13 = vor.u32 %v3589_v56, %v3586_v44  ;;  %v3603_v48 = vrot.slane %v3601_v23, 6  ;;  %v4320_v50 = vshrl.u32 %v4229_v41, 16  ;;  %v8519_v51 = vpop.f32.mrf.mxu1  ;;  %v7295_v54 = vld [vmem:[#allocation2 + $0x30] sm:$0xe] }
 0x163   : > { %v3594_v60 = vor.u32 %v3593_v33, %v3592_v45  ;;  %v6670_v39 = vcombine.low %v4308_v32, %v4318_v26  ;;  %v4323_v45 = vshll.u32 %v4229_v41, 16  ;;  %v9951_v31 = vshll.u32 %v8501_v53, 16  ;;  %10017 = vst [vmem:[#allocation20_spill] sm:$0xff] %v8519_v51  ;;  %v3546_v26 = vld [vmem:[#allocation2 + $0x38] sm:$0x3] }
 0x164   : > { %v3591_v33 = vrot.slane %v3590_v13, 4  ;;  %v3604_v10 = vor.u32 %v3603_v48, %v3600_v40  ;;  %v4322_v37 = vrot.slane %v4320_v50, 4  ;;  %v9952_v0 = vshrl.u32 %v8501_v53, 16  ;;  %v4232_v48 = vld [vmem:[#allocation2 + $0x48] sm:$0xf] }
 0x165   : > { %v3596_v12 = vrot.slane %v3594_v60, 4  ;;  %7149 = vmatmul.mubr.msk.bf16.vlgmr.msra.gmra.mxu0 %vm1193_vm5, %v6670_v39  ;;  %v4325_v35 = vrot.slane %v4323_v45, 5  ;;  %v4331_v44 = vrot.slane %v9951_v31, 5  ;;  %v4339_v32 = vshll.u32 %v4231_v29, 16 }
 0x166   : > { %v3607_v41 = vshrl.u32 %v7295_v54, 16  ;;  %v3595_v56 = vsel %vm7742_vm2, %v3591_v33, %v3594_v60  ;;  %7215 = vmatpush3.bf16.msra.mxu0 %v5902_v62  ;;  %v4335_v40 = vrot.slane %v9952_v0, 4  ;;  %v3610_v13 = vshll.u32 %v7295_v54, 16  ;;  %v8536_v62 = vpop.f32.mrf.mxu1 }
 0x167   : > { %v3605_v23 = vsel %vm7742_vm2, %v3596_v12, %v3604_v10  ;;  %v4326_v39 = vor.u32 %v4325_v35, %v4322_v37  ;;  %v4341_v45 = vrot.slane %v4339_v32, 5  ;;  %v10018_v63 = vshrl.u32 %v8124_v16, 16  ;;  %v8534_v12 = vpop.f32.mrf.mxu0  ;;  %10021 = vst [vmem:[#allocation22_spill] sm:$0xff] %v8536_v62 }
 0x168   : > { %v6637_v50 = vcombine.low %v3595_v56, %v3605_v23  ;;  %v3609_v31 = vrot.slane %v3607_v41, 5  ;;  %v4336_v29 = vor.u32 %v4335_v40, %v4331_v44  ;;  %v3612_v51 = vrot.slane %v3610_v13, 6  ;;  %10020 = vst [vmem:[#allocation21_spill] sm:$0xff] %v8534_v12  ;;  %v8539_v23 = vld [vmem:[#allocation2 + $0x4c] sm:$0xf] }
 0x169   : > { %v3615_v38 = vrot.slane %v10018_v63, 5  ;;  %v10019_v60 = vshll.u32 %v8124_v16, 16  ;;  %v4327_v10 = vrot.slane %v4326_v39, 4  ;;  %v3621_v54 = vshrl.u32 %v3546_v26, 16  ;;  %v8541_v40 = vpop.f32.mrf.mxu0  ;;  %v8543_v16 = vpop.f32.mrf.mxu1  ;;  %v4234_v39 = vld [vmem:[#allocation2 + $0x50] sm:$0x1] }
 0x16a   : > { %7115 = vmatmul.mubr.msk.bf16.vlgmr.msra.gmra.mxu1 %vm1193_vm5, %v6637_v50  ;;  %v3624_v56 = vshll.u32 %v3546_v26, 16  ;;  %v4344_v37 = vshrl.u32 %v4232_v48, 16  ;;  %v4337_v35 = vrot.slane %v4336_v29, 4  ;;  %v3613_v32 = vor.u32 %v3612_v51, %v3609_v31  ;;  %10022 = vst [vmem:[#allocation23_spill] sm:$0xff] %v8541_v40  ;;  %10023 = vst [vmem:[#allocation24_spill] sm:$0xff] %v8543_v16 }
 0x16b   : > { %v3616_v33 = vrot.slane %v10019_v60, 6  ;;  %7181 = vmatpush3.bf16.msra.mxu1 %v5224_v9  ;;  %v4347_v63 = vshll.u32 %v4232_v48, 16  ;;  %v4332_v13 = vsel %vm7833_vm3, %v4327_v10, %v4331_v44  ;;  %v3623_v60 = vrot.slane %v3621_v54, 5  ;;  %v8549_v51 = vpop.f32.mrf.mxu0  ;;  %v7301_v12 = vld [vmem:[#allocation2 + $0x78] sm:$0xe] }
 0x16c   : > { %v3626_v50 = vrot.slane %v3624_v56, 6  ;;  %v4346_v0 = vrot.slane %v4344_v37, 4  ;;  %v4342_v9 = vsel %vm7833_vm3, %v4337_v35, %v4341_v45  ;;  %v3614_v26 = vrot.slane %v3613_v32, 4  ;;  %10024 = vst [vmem:[#allocation25_spill] sm:$0xff] %v8549_v51  ;;  %v8555_v56 = vpop.f32.mrf.mxu1 }
 0x16d   : > { %v3617_v41 = vor.u32 %v3616_v33, %v3615_v38  ;;  %v4349_v38 = vrot.slane %v4347_v63, 5  ;;  %v6671_v48 = vcombine.low %v4332_v13, %v4342_v9  ;;  %v9954_v33 = vshll.u32 %v8539_v23, 16  ;;  %10025 = vst [vmem:[#allocation26_spill] sm:$0xff] %v8555_v56  ;;  %v8557_v37 = vpop.f32.mrf.mxu0  ;;  %v3547_v63 = vld [vmem:[#allocation2 + $0x44] sm:$0x3] }
 0x16e   : > { %v3627_v29 = vor.u32 %v3626_v50, %v3623_v60  ;;  %v9953_v16 = vshrl.u32 %v8539_v23, 16  ;;  %v4363_v54 = vshll.u32 %v4234_v39, 16  ;;  %10026 = vst [vmem:[#allocation27_spill] sm:$0xff] %v8557_v37  ;;  %v7296_v60 = vld [vmem:[#allocation2 + $0x3c] sm:$0xe]  ;;  %vm6328_vm0 = vcmask 64544  }
 0x16f   : > { %v3619_v31 = vrot.slane %v3617_v41, 4  ;;  %v3618_v44 = vsel %vm7742_vm2, %v3614_v26, %v3617_v41  ;;  %v4350_v10 = vor.u32 %v4349_v38, %v4346_v0  ;;  %7152 = vmatprep.mubr.msk.bf16.mxu0 %vm1193_vm5, %v6671_v48  ;;  %v4355_v35 = vrot.slane %v9954_v33, 5  ;;  %v4235_v39 = vld [vmem:[#allocation2 + $0x54] sm:$0xf]  ;;  %v8570_v37 = vld [vmem:[#allocation2 + $0x58] sm:$0xf] }
 0x170   : > { %v4359_v32 = vrot.slane %v9953_v16, 4  ;;  %v4365_v0 = vrot.slane %v4363_v54, 5  ;;  %v3630_v50 = vshrl.u32 %v7296_v60, 16  ;;  %v3633_v26 = vshll.u32 %v7296_v60, 16  ;;  %v8575_v16 = vpop.f32.mrf.mxu1 }
 0x171   : > { %v3628_v45 = vsel %vm7742_vm2, %v3619_v31, %v3627_v29  ;;  %v4351_v41 = vrot.slane %v4350_v10, 4  ;;  %v10027_v38 = vshrl.u32 %v8157_v57, 16  ;;  %v10028_v31 = vshll.u32 %v8157_v57, 16  ;;  %10029 = vst [vmem:[#allocation28_spill] sm:$0xff] %v8575_v16  ;;  %v7297_v16 = vld [vmem:[#allocation2 + $0x48] sm:$0xe] }
 0x172   : > { %v6638_v13 = vcombine.low %v3618_v44, %v3628_v45  ;;  %v4360_v9 = vor.u32 %v4359_v32, %v4355_v35  ;;  %v3632_v10 = vrot.slane %v3630_v50, 5  ;;  %v3644_v54 = vshrl.u32 %v3547_v63, 16  ;;  %v8577_v32 = vpop.f32.mrf.mxu0  ;;  %v8580_v59 = vpop.f32.mrf.mxu1 }
 0x173   : > { %v3638_v48 = vrot.slane %v10027_v38, 5  ;;  %v3639_v29 = vrot.slane %v10028_v31, 6  ;;  %v4356_v44 = vsel %vm7833_vm3, %v4351_v41, %v4355_v35  ;;  %v3647_v45 = vshll.u32 %v3547_v63, 16  ;;  %10030 = vst [vmem:[#allocation29_spill] sm:$0xff] %v8577_v32  ;;  %10031 = vst [vmem:[#allocation30_spill] sm:$0xff] %v8580_v59 }
 0x174   : > { %7118 = vmatprep.mubr.msk.bf16.mxu1 %vm1193_vm5, %v6638_v13  ;;  %v4361_v60 = vrot.slane %v4360_v9, 4  ;;  %v3635_v33 = vrot.slane %v3633_v26, 6  ;;  %v4368_v62 = vshrl.u32 %v4235_v39, 16  ;;  %v3646_v57 = vrot.slane %v3644_v54, 5  ;;  %v8582_v35 = vpop.f32.mrf.mxu0  ;;  %v8588_v54 = vpop.f32.mrf.mxu1 }
 0x175   : > { %v3640_v38 = vor.u32 %v3639_v29, %v3638_v48  ;;  %v3649_v31 = vrot.slane %v3647_v45, 6  ;;  %v4371_v20 = vshll.u32 %v4235_v39, 16  ;;  %v9955_v13 = vshll.u32 %v8570_v37, 16  ;;  %10032 = vst [vmem:[#allocation31_spill] sm:$0xff] %v8582_v35  ;;  %10033 = vst [vmem:[#allocation32_spill] sm:$0xff] %v8588_v54 }
 0x176   : > { %v4366_v63 = vsel %vm7833_vm3, %v4361_v60, %v4365_v0  ;;  %v3636_v41 = vor.u32 %v3635_v33, %v3632_v10  ;;  %v4370_v32 = vrot.slane %v4368_v62, 4  ;;  %v9956_v45 = vshrl.u32 %v8570_v37, 16  ;;  %v8591_v30 = vpop.f32.mrf.mxu0  ;;  %v4238_v60 = vld [vmem:[#allocation2 + $0x60] sm:$0xf] }
 0x177   : > { %v3642_v50 = vrot.slane %v3640_v38, 4  ;;  %v6672_v9 = vcombine.low %v4356_v44, %v4366_v63  ;;  %v3650_v26 = vor.u32 %v3649_v31, %v3646_v57  ;;  %v4373_v48 = vrot.slane %v4371_v20, 5  ;;  %10034 = vst [vmem:[#allocation33_spill] sm:$0xff] %v8591_v30  ;;  %v3548_v20 = vld [vmem:[#allocation2 + $0x50] sm:$0x3] }
 0x178   : > { %v4379_v29 = vrot.slane %v9955_v13, 5  ;;  %v3637_v39 = vrot.slane %v3636_v41, 4  ;;  %v4387_v59 = vshll.u32 %v4237_v55, 16  ;;  %v3653_v35 = vshrl.u32 %v7297_v16, 16  ;;  %v8606_v30 = vld [vmem:[#allocation2 + $0x64] sm:$0xf] }
 0x179   : > { %7153 = vmatmul.mubr.msk.bf16.gmra.mxu0 %vm1193_vm5, %v6672_v9  ;;  %v3651_v62 = vsel %vm7742_vm2, %v3642_v50, %v3650_v26  ;;  %v4374_v33 = vor.u32 %v4373_v48, %v4370_v32  ;;  %v3656_v0 = vshll.u32 %v7297_v16, 16  ;;  %v10035_v44 = vshrl.u32 %v8173_v61, 16  ;;  %v8604_v26 = vpop.f32.mrf.mxu1 }
 0x17a   : > { %v3641_v57 = vsel %vm7742_vm2, %v3637_v39, %v3640_v38  ;;  %v4383_v55 = vrot.slane %v9956_v45, 4  ;;  %v4389_v31 = vrot.slane %v4387_v59, 5  ;;  %v3655_v63 = vrot.slane %v3653_v35, 5  ;;  %10037 = vst [vmem:[#allocation34_spill] sm:$0xff] %v8604_v26  ;;  %v8608_v38 = vpop.f32.mrf.mxu0 }
 0x17b   : > { %v3661_v10 = vrot.slane %v10035_v44, 5  ;;  %v6639_v41 = vcombine.low %v3641_v57, %v3651_v62  ;;  %v4375_v9 = vrot.slane %v4374_v33, 4  ;;  %v3658_v13 = vrot.slane %v3656_v0, 6  ;;  %10038 = vst [vmem:[#allocation35_spill] sm:$0xff] %v8608_v38  ;;  %v4240_v62 = vld [vmem:[#allocation2 + $0x68] sm:$0x1]  ;;  %v8614_v21 = vpop.f32.mrf.mxu1 }
 0x17c   : > { %v10036_v50 = vshll.u32 %v8173_v61, 16  ;;  %v4384_v16 = vor.u32 %v4383_v55, %v4379_v29  ;;  %v3667_v48 = vshrl.u32 %v3548_v20, 16  ;;  %v3670_v44 = vshll.u32 %v3548_v20, 16 }
 0x17d   : > { %v4392_v54 = vshrl.u32 %v4238_v60, 16  ;;  %7119 = vmatmul.mubr.msk.bf16.gmra.mxu1 %vm1193_vm5, %v6639_v41  ;;  %v4380_v59 = vsel %vm7833_vm3, %v4375_v9, %v4379_v29  ;;  %v3659_v35 = vor.u32 %v3658_v13, %v3655_v63  ;;  %v4395_v61 = vshll.u32 %v4238_v60, 16 }
 0x17e   : > { %v3662_v32 = vrot.slane %v10036_v50, 6  ;;  %v4385_v33 = vrot.slane %v4384_v16, 4  ;;  %v3669_v0 = vrot.slane %v3667_v48, 5  ;;  %v3672_v57 = vrot.slane %v3670_v44, 6  ;;  %v3549_v48 = vld [vmem:[#allocation2 + $0x5c] sm:$0x3] }
 0x17f   : > { %v4394_v55 = vrot.slane %v4392_v54, 4  ;;  %v3660_v50 = vrot.slane %v3659_v35, 4  ;;  %v4397_v45 = vrot.slane %v4395_v61, 5  ;;  %v9958_v26 = vshll.u32 %v8606_v30, 16  ;;  %v4241_v61 = vld [vmem:[#allocation2 + $0x6c] sm:$0xf] }
 0x180   : > { %v3663_v39 = vor.u32 %v3662_v32, %v3661_v10  ;;  %v4390_v41 = vsel %vm7833_vm3, %v4385_v33, %v4389_v31  ;;  %v3673_v34 = vor.u32 %v3672_v57, %v3669_v0  ;;  %v9957_v13 = vshrl.u32 %v8606_v30, 16  ;;  %v8619_v10 = vpop.f32.mrf.mxu0  ;;  %v8625_v32 = vpop.f32.mrf.mxu1 }
 0x181   : > { %v4411_v29 = vshll.u32 %v4240_v62, 16  ;;  %10039 = vst [vmem:[#allocation36_spill] sm:$0xff] %v8619_v10  ;;  %v6673_v60 = vcombine.low %v4380_v59, %v4390_v41  ;;  %v4398_v63 = vor.u32 %v4397_v45, %v4394_v55  ;;  %v4403_v9 = vrot.slane %v9958_v26, 5  ;;  %v7298_v45 = vld [vmem:[#allocation2 + $0x54] sm:$0xe] }
 0x182   : > { %v3665_v20 = vrot.slane %v3663_v39, 4  ;;  %v3664_v54 = vsel %vm7742_vm2, %v3660_v50, %v3663_v39  ;;  %v4407_v31 = vrot.slane %v9957_v13, 4  ;;  %v8631_v44 = vpop.f32.mrf.mxu0  ;;  %v3676_v62 = vshrl.u32 %v7298_v45, 16  ;;  %v8640_v41 = vpop.f32.mrf.mxu1  ;;  %v4243_v26 = vld [vmem:[#allocation2 + $0x74] sm:$0x1] }
 0x183   : > { %10040 = vst [vmem:[#allocation37_spill] sm:$0xff] %v8631_v44  ;;  %7156 = vmatprep.mubr.msk.bf16.mxu0 %vm1193_vm5, %v6673_v60  ;;  %v4399_v35 = vrot.slane %v4398_v63, 4  ;;  %v4413_v39 = vrot.slane %v4411_v29, 5  ;;  %v3679_v0 = vshll.u32 %v7298_v45, 16  ;;  %v10041_v57 = vshrl.u32 %v8202_v24, 16 }
 0x184   : > { %v3674_v16 = vsel %vm7742_vm2, %v3665_v20, %v3673_v34  ;;  %v4408_v33 = vor.u32 %v4407_v31, %v4403_v9  ;;  %v10042_v34 = vshll.u32 %v8202_v24, 16  ;;  %v8638_v20 = vld [vmem:[#allocation2 + $0x70] sm:$0xf]  ;;  %v3678_v60 = vrot.slane %v3676_v62, 5  ;;  %v8650_v62 = vpop.f32.mrf.mxu1  ;;  %v8672_v10 = vld [vmem:[#allocation2 + $0x7c] sm:$0xf] }
 0x185   : > { %v6640_v59 = vcombine.low %v3664_v54, %v3674_v16  ;;  %v3684_v55 = vrot.slane %v10041_v57, 5  ;;  %v4404_v29 = vsel %vm7833_vm3, %v4399_v35, %v4403_v9  ;;  %v3690_v54 = vshrl.u32 %v3549_v48, 16  ;;  %v8645_v16 = vpop.f32.mrf.mxu0 }
 0x186   : > { %v3685_v50 = vrot.slane %v10042_v34, 6  ;;  %v3693_v63 = vshll.u32 %v3549_v48, 16  ;;  %10043 = vst [vmem:[#allocation38_spill] sm:$0xff] %v8645_v16  ;;  %v4409_v31 = vrot.slane %v4408_v33, 4  ;;  %v3681_v45 = vrot.slane %v3679_v0, 6 }
 0x187   : > { %7122 = vmatprep.mubr.msk.bf16.mxu1 %vm1193_vm5, %v6640_v59  ;;  %v4416_v13 = vshrl.u32 %v4241_v61, 16  ;;  %v3692_v24 = vrot.slane %v3690_v54, 5  ;;  %v4419_v36 = vshll.u32 %v4241_v61, 16  ;;  %v9959_v2 = vshll.u32 %v8638_v20, 16 }
 0x188   : > { %v3686_v57 = vor.u32 %v3685_v50, %v3684_v55  ;;  %v3695_v34 = vrot.slane %v3693_v63, 6  ;;  %v4414_v59 = vsel %vm7833_vm3, %v4409_v31, %v4413_v39  ;;  %v3682_v56 = vor.u32 %v3681_v45, %v3678_v60  ;;  %v8654_v55 = vpop.f32.mrf.mxu0  ;;  %v7299_v63 = vld [vmem:[#allocation2 + $0x60] sm:$0xe]  ;;  %v4244_v45 = vld [vmem:[#allocation2 + $0x78] sm:$0xf] }
 0x189   : > { %v4418_v35 = vrot.slane %v4416_v13, 4  ;;  %v6674_v48 = vcombine.low %v4404_v29, %v4414_v59  ;;  %v4421_v33 = vrot.slane %v4419_v36, 5  ;;  %v4427_v0 = vrot.slane %v9959_v2, 5  ;;  %10044 = vst [vmem:[#allocation39_spill] sm:$0xff] %v8654_v55  ;;  %v3550_v29 = vld [vmem:[#allocation2 + $0x68] sm:$0x3]  ;;  %v8666_v59 = vpop.f32.mrf.mxu1 }
 0x18a   : > { %v3688_v9 = vrot.slane %v3686_v57, 4  ;;  %v3696_v16 = vor.u32 %v3695_v34, %v3692_v24  ;;  %v3683_v50 = vrot.slane %v3682_v56, 4  ;;  %v9960_v61 = vshrl.u32 %v8638_v20, 16 }
 0x18b   : > { %v4435_v54 = vshll.u32 %v4243_v26, 16  ;;  %v3699_v44 = vshrl.u32 %v7299_v63, 16  ;;  %7157 = vmatmul.mubr.msk.bf16.gmra.mxu0 %vm1193_vm5, %v6674_v48  ;;  %v4422_v39 = vor.u32 %v4421_v33, %v4418_v35  ;;  %v3702_v60 = vshll.u32 %v7299_v63, 16  ;;  %v8670_v33 = vpop.f32.mrf.mxu0 }
 0x18c   : > { %v3697_v13 = vsel %vm7742_vm2, %v3688_v9, %v3696_v16  ;;  %v10045_v36 = vshrl.u32 %v8223_v27, 16  ;;  %v3687_v56 = vsel %vm7742_vm2, %v3683_v50, %v3686_v57  ;;  %v4431_v26 = vrot.slane %v9960_v61, 4  ;;  %10047 = vst [vmem:[#allocation40_spill] sm:$0xff] %v8670_v33  ;;  %v8674_v50 = vpop.f32.mrf.mxu1 }
 0x18d   : > { %v4437_v24 = vrot.slane %v4435_v54, 5  ;;  %v3701_v34 = vrot.slane %v3699_v44, 5  ;;  %v6641_v48 = vcombine.low %v3687_v56, %v3697_v13  ;;  %v4423_v2 = vrot.slane %v4422_v39, 4  ;;  %v4246_v39 = vld [vmem:[#allocation2 + $0x80] sm:$0x1] }
 0x18e   : > { %v3707_v31 = vrot.slane %v10045_v36, 5  ;;  %v3704_v16 = vrot.slane %v3702_v60, 6  ;;  %v10046_v9 = vshll.u32 %v8223_v27, 16  ;;  %v4432_v63 = vor.u32 %v4431_v26, %v4427_v0  ;;  %v8679_v60 = vpop.f32.mrf.mxu0  ;;  %v8682_v40 = vpop.f32.mrf.mxu1 }
 0x18f   : > { %v3713_v36 = vshrl.u32 %v3550_v29, 16  ;;  %v3716_v55 = vshll.u32 %v3550_v29, 16  ;;  %v4440_v57 = vshrl.u32 %v4244_v45, 16  ;;  %7123 = vmatmul.mubr.msk.bf16.gmra.mxu1 %vm1193_vm5, %v6641_v48  ;;  %v4428_v44 = vsel %vm7833_vm3, %v4423_v2, %v4427_v0  ;;  %10048 = vst [vmem:[#allocation41_spill] sm:$0xff] %v8679_v60 }
 0x190   : > { %v3708_v35 = vrot.slane %v10046_v9, 6  ;;  %v3705_v54 = vor.u32 %v3704_v16, %v3701_v34  ;;  %v4443_v27 = vshll.u32 %v4244_v45, 16  ;;  %v4433_v56 = vrot.slane %v4432_v63, 4  ;;  %v8687_v34 = vpop.f32.mrf.mxu0 }
 0x191   : > { %v3715_v26 = vrot.slane %v3713_v36, 5  ;;  %v3718_v9 = vrot.slane %v3716_v55, 6  ;;  %v4442_v29 = vrot.slane %v4440_v57, 4  ;;  %v9962_v38 = vshll.u32 %v8672_v10, 16  ;;  %10049 = vst [vmem:[#allocation42_spill] sm:$0xff] %v8687_v34 }
 0x192   : > { %v3709_v13 = vor.u32 %v3708_v35, %v3707_v31  ;;  %v3706_v61 = vrot.slane %v3705_v54, 4  ;;  %v4445_v51 = vrot.slane %v4443_v27, 5  ;;  %v4438_v2 = vsel %vm7833_vm3, %v4433_v56, %v4437_v24  ;;  %v3551_v36 = vld [vmem:[#allocation2 + $0x74] sm:$0x3]  ;;  %v4247_v56 = vld [vmem:[#allocation2 + $0x84] sm:$0xf] }
 0x193   : > { %v3719_v0 = vor.u32 %v3718_v9, %v3715_v26  ;;  %v9961_v31 = vshrl.u32 %v8672_v10, 16  ;;  %v4459_v45 = vshll.u32 %v4246_v39, 16  ;;  %v6675_v48 = vcombine.low %v4428_v44, %v4438_v2  ;;  %v7300_v44 = vld [vmem:[#allocation2 + $0x6c] sm:$0xe]  ;;  %v8704_v2 = vld [vmem:[#allocation2 + $0x88] sm:$0xf] }
 0x194   : > { %v3711_v33 = vrot.slane %v3709_v13, 4  ;;  %v3710_v55 = vsel %vm7742_vm2, %v3706_v61, %v3709_v13  ;;  %v4446_v16 = vor.u32 %v4445_v51, %v4442_v29  ;;  %v4451_v35 = vrot.slane %v9962_v38, 5  ;;  %v8698_v61 = vpop.f32.mrf.mxu1 }
 0x195   : > { %v4455_v24 = vrot.slane %v9961_v31, 4  ;;  %7160 = vmatprep.mubr.msk.bf16.mxu0 %vm1193_vm5, %v6675_v48  ;;  %v4461_v39 = vrot.slane %v4459_v45, 5  ;;  %v3722_v27 = vshrl.u32 %v7300_v44, 16  ;;  %v3725_v13 = vshll.u32 %v7300_v44, 16 }
 0x196   : > { %v3720_v63 = vsel %vm7742_vm2, %v3711_v33, %v3719_v0  ;;  %v4447_v54 = vrot.slane %v4446_v16, 4  ;;  %v10050_v26 = vshrl.u32 %v8242_v11, 16  ;;  %v10051_v33 = vshll.u32 %v8242_v11, 16  ;;  %v8706_v0 = vpop.f32.mrf.mxu0  ;;  %v4249_v11 = vld [vmem:[#allocation2 + $0x8c] sm:$0x1]  ;;  %v8712_v60 = vpop.f32.mrf.mxu1 }
 0x197   : > { %v6642_v57 = vcombine.low %v3710_v55, %v3720_v63  ;;  %v4456_v51 = vor.u32 %v4455_v24, %v4451_v35  ;;  %10052 = vst [vmem:[#allocation43_spill] sm:$0xff] %v8706_v0  ;;  %v3724_v48 = vrot.slane %v3722_v27, 5  ;;  %v3736_v55 = vshrl.u32 %v3551_v36, 16  ;;  %10053 = vst [vmem:[#allocation44_spill] sm:$0xff] %v8712_v60 }
 0x198   : > { %v3730_v9 = vrot.slane %v10050_v26, 5  ;;  %v3731_v29 = vrot.slane %v10051_v33, 6  ;;  %v4452_v45 = vsel %vm7833_vm3, %v4447_v54, %v4451_v35  ;;  %v3739_v16 = vshll.u32 %v3551_v36, 16  ;;  %v8716_v27 = vpop.f32.mrf.mxu0 }
 0x199   : > { %7126 = vmatprep.mubr.msk.bf16.mxu1 %vm1193_vm5, %v6642_v57  ;;  %v4457_v63 = vrot.slane %v4456_v51, 4  ;;  %v3727_v24 = vrot.slane %v3725_v13, 6  ;;  %v4464_v31 = vshrl.u32 %v4247_v56, 16  ;;  %v3738_v26 = vrot.slane %v3736_v55, 5  ;;  %10054 = vst [vmem:[#allocation45_spill] sm:$0xff] %v8716_v27 }
 0x19a   : > { %v3732_v44 = vor.u32 %v3731_v29, %v3730_v9  ;;  %v3741_v38 = vrot.slane %v3739_v16, 6  ;;  %v4467_v33 = vshll.u32 %v4247_v56, 16  ;;  %v9963_v34 = vshll.u32 %v8704_v2, 16  ;;  %v8720_v29 = vpop.f32.mrf.mxu1 }
 0x19b   : > { %v4462_v57 = vsel %vm7833_vm3, %v4457_v63, %v4461_v39  ;;  %v3728_v0 = vor.u32 %v3727_v24, %v3724_v48  ;;  %v4466_v54 = vrot.slane %v4464_v31, 4  ;;  %10055 = vst [vmem:[#allocation46_spill] sm:$0xff] %v8720_v29  ;;  %v9964_v55 = vshrl.u32 %v8704_v2, 16  ;;  %v8723_v39 = vpop.f32.mrf.mxu0  ;;  %v8740_v29 = vld [vmem:[#allocation2 + $0x94] sm:$0xf] }
 0x19c   : > { %v3734_v35 = vrot.slane %v3732_v44, 4  ;;  %v6676_v36 = vcombine.low %v4452_v45, %v4462_v57  ;;  %v3742_v51 = vor.u32 %v3741_v38, %v3738_v26  ;;  %v4469_v13 = vrot.slane %v4467_v33, 5  ;;  %10056 = vst [vmem:[#allocation47_spill] sm:$0xff] %v8723_v39  ;;  %v3552_v45 = vld [vmem:[#allocation2 + $0x80] sm:$0x3] }
 0x19d   : > { %v4475_v9 = vrot.slane %v9963_v34, 5  ;;  %v3729_v56 = vrot.slane %v3728_v0, 4  ;;  %v4483_v16 = vshll.u32 %v4249_v11, 16  ;;  %v3745_v60 = vshrl.u32 %v7301_v12, 16  ;;  %v4250_v26 = vld [vmem:[#allocation2 + $0x90] sm:$0xf]  ;;  %v8734_v34 = vpop.f32.mrf.mxu1 }
 0x19e   : > { %7161 = vmatmul.mubr.msk.bf16.gmra.mxu0 %vm1193_vm5, %v6676_v36  ;;  %v3743_v31 = vsel %vm7742_vm2, %v3734_v35, %v3742_v51  ;;  %v4470_v38 = vor.u32 %v4469_v13, %v4466_v54  ;;  %v3748_v48 = vshll.u32 %v7301_v12, 16  ;;  %v10057_v63 = vshrl.u32 %v8259_v3, 16  ;;  %10058 = vst [vmem:[#allocation48_spill] sm:$0xff] %v8734_v34  ;;  %v8738_v51 = vpop.f32.mrf.mxu0 }
 0x19f   : > { %v3733_v0 = vsel %vm7742_vm2, %v3729_v56, %v3732_v44  ;;  %v4479_v11 = vrot.slane %v9964_v55, 4  ;;  %v4485_v33 = vrot.slane %v4483_v16, 5  ;;  %v3747_v57 = vrot.slane %v3745_v60, 5  ;;  %10060 = vst [vmem:[#allocation49_spill] sm:$0xff] %v8738_v51  ;;  %v8745_v55 = vpop.f32.mrf.mxu1 }
 0x1a0   : > { %v3753_v24 = vrot.slane %v10057_v63, 5  ;;  %v6643_v36 = vcombine.low %v3733_v0, %v3743_v31  ;;  %v4471_v39 = vrot.slane %v4470_v38, 4  ;;  %v3750_v35 = vrot.slane %v3748_v48, 6  ;;  %v4252_v31 = vld [vmem:[#allocation2 + $0x98] sm:$0x1]  ;;  %10061 = vst [vmem:[#allocation50_spill] sm:$0xff] %v8745_v55  ;;  %v8748_v52 = vpop.f32.mrf.mxu0 }
 0x1a1   : > { %v10059_v54 = vshll.u32 %v8259_v3, 16  ;;  %v4480_v13 = vor.u32 %v4479_v11, %v4475_v9  ;;  %v3759_v63 = vshrl.u32 %v3552_v45, 16  ;;  %v3762_v27 = vshll.u32 %v3552_v45, 16  ;;  %10062 = vst [vmem:[#allocation51_spill] sm:$0xff] %v8748_v52 }
 0x1a2   : > { %v4488_v44 = vshrl.u32 %v4250_v26, 16  ;;  %7127 = vmatmul.mubr.msk.bf16.gmra.mxu1 %vm1193_vm5, %v6643_v36  ;;  %v4476_v60 = vsel %vm7833_vm3, %v4471_v39, %v4475_v9  ;;  %v3751_v56 = vor.u32 %v3750_v35, %v3747_v57  ;;  %v4491_v38 = vshll.u32 %v4250_v26, 16 }
 0x1a3   : > { %v3754_v12 = vrot.slane %v10059_v54, 6  ;;  %v4481_v48 = vrot.slane %v4480_v13, 4  ;;  %v3761_v3 = vrot.slane %v3759_v63, 5  ;;  %v3764_v0 = vrot.slane %v3762_v27, 6  ;;  %v3553_v63 = vld [vmem:[#allocation2 + $0x8c] sm:$0x3] }
 0x1a4   : > { %v4490_v54 = vrot.slane %v4488_v44, 4  ;;  %v3752_v11 = vrot.slane %v3751_v56, 4  ;;  %v4493_v51 = vrot.slane %v4491_v38, 5  ;;  %v9966_v34 = vshll.u32 %v8740_v29, 16  ;;  %v8764_v38 = vpop.f32.mrf.mxu0 }
 0x1a5   : > { %v3755_v16 = vor.u32 %v3754_v12, %v3753_v24  ;;  %v4486_v9 = vsel %vm7833_vm3, %v4481_v48, %v4485_v33  ;;  %v3765_v39 = vor.u32 %v3764_v0, %v3761_v3  ;;  %v9965_v24 = vshrl.u32 %v8740_v29, 16  ;;  %v8761_v33 = vpop.f32.mrf.mxu1  ;;  %10064 = vst [vmem:[#allocation53_spill] sm:$0xff] %v8764_v38 }
 0x1a6   : > { %v4507_v26 = vshll.u32 %v4252_v31, 16  ;;  %v6677_v57 = vcombine.low %v4476_v60, %v4486_v9  ;;  %v4494_v36 = vor.u32 %v4493_v51, %v4490_v54  ;;  %v4499_v35 = vrot.slane %v9966_v34, 5  ;;  %10063 = vst [vmem:[#allocation52_spill] sm:$0xff] %v8761_v33  ;;  %v7302_v31 = vld [vmem:[#allocation2 + $0x84] sm:$0xe] }
 0x1a7   : > { %v3757_v45 = vrot.slane %v3755_v16, 4  ;;  %v3756_v27 = vsel %vm7742_vm2, %v3752_v11, %v3755_v16  ;;  %v4503_v13 = vrot.slane %v9965_v24, 4  ;;  %v3768_v16 = vshrl.u32 %v7302_v31, 16  ;;  %v4253_v51 = vld [vmem:[#allocation2 + $0x9c] sm:$0xf] }
 0x1a8   : > { %7164 = vmatprep.mubr.msk.bf16.mxu0 %vm1193_vm5, %v6677_v57  ;;  %v4495_v60 = vrot.slane %v4494_v36, 4  ;;  %v4509_v56 = vrot.slane %v4507_v26, 5  ;;  %v3771_v3 = vshll.u32 %v7302_v31, 16  ;;  %v10065_v0 = vshrl.u32 %v8270_v17, 16  ;;  %v8770_v9 = vld [vmem:[#allocation2 + $0xa0] sm:$0xf] }
 0x1a9   : > { %v3766_v12 = vsel %vm7742_vm2, %v3757_v45, %v3765_v39  ;;  %v4504_v48 = vor.u32 %v4503_v13, %v4499_v35  ;;  %v10066_v11 = vshll.u32 %v8270_v17, 16  ;;  %v8772_v39 = vpop.f32.mrf.mxu1  ;;  %v3770_v57 = vrot.slane %v3768_v16, 5  ;;  %v4255_v34 = vld [vmem:[#allocation2 + $0xa4] sm:$0x1] }
 0x1aa   : > { %v6644_v44 = vcombine.low %v3756_v27, %v3766_v12  ;;  %v3776_v54 = vrot.slane %v10065_v0, 5  ;;  %10067 = vst [vmem:[#allocation54_spill] sm:$0xff] %v8772_v39  ;;  %v4500_v26 = vsel %vm7833_vm3, %v4495_v60, %v4499_v35  ;;  %v3782_v27 = vshrl.u32 %v3553_v63, 16  ;;  %v8777_v12 = vpop.f32.mrf.mxu0 }
 0x1ab   : > { %v3777_v45 = vrot.slane %v10066_v11, 6  ;;  %v3785_v36 = vshll.u32 %v3553_v63, 16  ;;  %10068 = vst [vmem:[#allocation55_spill] sm:$0xff] %v8777_v12  ;;  %v4505_v13 = vrot.slane %v4504_v48, 4  ;;  %v3773_v31 = vrot.slane %v3771_v3, 6  ;;  %v8780_v39 = vpop.f32.mrf.mxu1 }
 0x1ac   : > { %7130 = vmatprep.mubr.msk.bf16.mxu1 %vm1193_vm5, %v6644_v44  ;;  %v4512_v24 = vshrl.u32 %v4253_v51, 16  ;;  %v3784_v17 = vrot.slane %v3782_v27, 5  ;;  %v4515_v38 = vshll.u32 %v4253_v51, 16  ;;  %v9967_v52 = vshll.u32 %v8770_v9, 16  ;;  %10069 = vst [vmem:[#allocation56_spill] sm:$0xff] %v8780_v39  ;;  %v8784_v16 = vpop.f32.mrf.mxu0 }
 0x1ad   : > { %v3778_v0 = vor.u32 %v3777_v45, %v3776_v54  ;;  %v3787_v11 = vrot.slane %v3785_v36, 6  ;;  %v4510_v35 = vsel %vm7833_vm3, %v4505_v13, %v4509_v56  ;;  %v3774_v44 = vor.u32 %v3773_v31, %v3770_v57  ;;  %10070 = vst [vmem:[#allocation57_spill] sm:$0xff] %v8784_v16  ;;  %v7303_v12 = vld [vmem:[#allocation2 + $0x90] sm:$0xe]  ;;  %v3554_v57 = vld [vmem:[#allocation2 + $0x98] sm:$0x3] }
 0x1ae   : > { %v4514_v63 = vrot.slane %v4512_v24, 4  ;;  %v6678_v48 = vcombine.low %v4500_v26, %v4510_v35  ;;  %v4517_v54 = vrot.slane %v4515_v38, 5  ;;  %v4523_v45 = vrot.slane %v9967_v52, 5  ;;  %v4256_v31 = vld [vmem:[#allocation2 + $0xa8] sm:$0xf] }
 0x1af   : > { %v3780_v60 = vrot.slane %v3778_v0, 4  ;;  %v3788_v3 = vor.u32 %v3787_v11, %v3784_v17  ;;  %v3775_v27 = vrot.slane %v3774_v44, 4  ;;  %v9968_v51 = vshrl.u32 %v8770_v9, 16  ;;  %v8794_v17 = vpop.f32.mrf.mxu1 }
 0x1b0   : > { %v4531_v36 = vshll.u32 %v4255_v34, 16  ;;  %v3791_v39 = vshrl.u32 %v7303_v12, 16  ;;  %7165 = vmatmul.mubr.msk.bf16.gmra.mxu0 %vm1193_vm5, %v6678_v48  ;;  %v4518_v24 = vor.u32 %v4517_v54, %v4514_v63  ;;  %v3794_v13 = vshll.u32 %v7303_v12, 16  ;;  %10072 = vst [vmem:[#allocation58_spill] sm:$0xff] %v8794_v17  ;;  %v8800_v48 = vpop.f32.mrf.mxu0  ;;  %v8804_v17 = vld [vmem:[#allocation2 + $0xac] sm:$0xf] }
 0x1b1   : > { %v3789_v56 = vsel %vm7742_vm2, %v3780_v60, %v3788_v3  ;;  %v10071_v26 = vshrl.u32 %v8297_v4, 16  ;;  %v3779_v11 = vsel %vm7742_vm2, %v3775_v27, %v3778_v0  ;;  %v4527_v34 = vrot.slane %v9968_v51, 4  ;;  %10073 = vst [vmem:[#allocation59_spill] sm:$0xff] %v8800_v48 }
 0x1b2   : > { %v4533_v35 = vrot.slane %v4531_v36, 5  ;;  %v3793_v44 = vrot.slane %v3791_v39, 5  ;;  %v6645_v60 = vcombine.low %v3779_v11, %v3789_v56  ;;  %v4519_v63 = vrot.slane %v4518_v24, 4  ;;  %v4258_v36 = vld [vmem:[#allocation2 + $0xb0] sm:$0x1]  ;;  %v8809_v24 = vpop.f32.mrf.mxu1 }
 0x1b3   : > { %v3799_v38 = vrot.slane %v10071_v26, 5  ;;  %v3796_v3 = vrot.slane %v3794_v13, 6  ;;  %v10074_v12 = vshll.u32 %v8297_v4, 16  ;;  %v4528_v26 = vor.u32 %v4527_v34, %v4523_v45  ;;  %10075 = vst [vmem:[#allocation60_spill] sm:$0xff] %v8809_v24 }
 0x1b4   : > { %v3805_v52 = vshrl.u32 %v3554_v57, 16  ;;  %v3808_v16 = vshll.u32 %v3554_v57, 16  ;;  %v4536_v33 = vshrl.u32 %v4256_v31, 16  ;;  %7131 = vmatmul.mubr.msk.bf16.gmra.mxu1 %vm1193_vm5, %v6645_v60  ;;  %v4524_v0 = vsel %vm7833_vm3, %v4519_v63, %v4523_v45  ;;  %v8814_v55 = vpop.f32.mrf.mxu1 }
 0x1b5   : > { %v3800_v54 = vrot.slane %v10074_v12, 6  ;;  %v3797_v39 = vor.u32 %v3796_v3, %v3793_v44  ;;  %v4539_v56 = vshll.u32 %v4256_v31, 16  ;;  %v4529_v13 = vrot.slane %v4528_v26, 4  ;;  %v8811_v12 = vpop.f32.mrf.mxu0  ;;  %10077 = vst [vmem:[#allocation62_spill] sm:$0xff] %v8814_v55  ;;  %v3555_v26 = vld [vmem:[#allocation2 + $0xa4] sm:$0x3] }
 0x1b6   : > { %v3807_v4 = vrot.slane %v3805_v52, 5  ;;  %v3810_v11 = vrot.slane %v3808_v16, 6  ;;  %v4538_v34 = vrot.slane %v4536_v33, 4  ;;  %10076 = vst [vmem:[#allocation61_spill] sm:$0xff] %v8811_v12  ;;  %v9970_v60 = vshll.u32 %v8804_v17, 16 }
 0x1b7   : > { %v3801_v27 = vor.u32 %v3800_v54, %v3799_v38  ;;  %v3798_v57 = vrot.slane %v3797_v39, 4  ;;  %v4541_v48 = vrot.slane %v4539_v56, 5  ;;  %v4534_v45 = vsel %vm7833_vm3, %v4529_v13, %v4533_v35  ;;  %v8819_v63 = vpop.f32.mrf.mxu0  ;;  %v8829_v39 = vpop.f32.mrf.mxu1  ;;  %v7304_v13 = vld [vmem:[#allocation2 + $0x9c] sm:$0xe] }
 0x1b8   : > { %v3811_v38 = vor.u32 %v3810_v11, %v3807_v4  ;;  %v9969_v31 = vshrl.u32 %v8804_v17, 16  ;;  %v4555_v44 = vshll.u32 %v4258_v36, 16  ;;  %10078 = vst [vmem:[#allocation63_spill] sm:$0xff] %v8819_v63  ;;  %v6679_v52 = vcombine.low %v4524_v0, %v4534_v45  ;;  %10079 = vst [vmem:[#allocation64_spill] sm:$0xff] %v8829_v39 }
 0x1b9   : > { %v3803_v51 = vrot.slane %v3801_v27, 4  ;;  %v3802_v33 = vsel %vm7742_vm2, %v3798_v57, %v3801_v27  ;;  %v4542_v16 = vor.u32 %v4541_v48, %v4538_v34  ;;  %v4547_v3 = vrot.slane %v9970_v60, 5  ;;  %v4259_v48 = vld [vmem:[#allocation2 + $0xb4] sm:$0xf]  ;;  %v8832_v4 = vpop.f32.mrf.mxu0 }
 0x1ba   : > { %v4551_v35 = vrot.slane %v9969_v31, 4  ;;  %7168 = vmatprep.mubr.msk.bf16.mxu0 %vm1193_vm5, %v6679_v52  ;;  %v4557_v56 = vrot.slane %v4555_v44, 5  ;;  %v3814_v27 = vshrl.u32 %v7304_v13, 16  ;;  %10080 = vst [vmem:[#allocation65_spill] sm:$0xff] %v8832_v4  ;;  %v3817_v34 = vshll.u32 %v7304_v13, 16  ;;  %v8843_v4 = vpop.f32.mrf.mxu1 }
 0x1bb   : > { %v3812_v54 = vsel %vm7742_vm2, %v3803_v51, %v3811_v38  ;;  %v4543_v0 = vrot.slane %v4542_v16, 4  ;;  %v10081_v51 = vshrl.u32 %v8318_v5, 16  ;;  %v10082_v45 = vshll.u32 %v8318_v5, 16  ;;  %v8838_v31 = vld [vmem:[#allocation2 + $0xb8] sm:$0xf]  ;;  %10083 = vst [vmem:[#allocation66_spill] sm:$0xff] %v8843_v4  ;;  %v8846_v39 = vpop.f32.mrf.mxu0 }
 0x1bc   : > { %v6646_v36 = vcombine.low %v3802_v33, %v3812_v54  ;;  %v4552_v11 = vor.u32 %v4551_v35, %v4547_v3  ;;  %v3816_v52 = vrot.slane %v3814_v27, 5  ;;  %v3828_v33 = vshrl.u32 %v3555_v26, 16  ;;  %v4261_v5 = vld [vmem:[#allocation2 + $0xbc] sm:$0x1]  ;;  %10084 = vst [vmem:[#allocation67_spill] sm:$0xff] %v8846_v39  ;;  %v8853_v55 = vpop.f32.mrf.mxu1 }
 0x1bd   : > { %v3822_v57 = vrot.slane %v10081_v51, 5  ;;  %v3823_v38 = vrot.slane %v10082_v45, 6  ;;  %v4548_v44 = vsel %vm7833_vm3, %v4543_v0, %v4547_v3  ;;  %v3831_v16 = vshll.u32 %v3555_v26, 16  ;;  %10085 = vst [vmem:[#allocation68_spill] sm:$0xff] %v8853_v55  ;;  %v8872_v55 = vld [vmem:[#allocation2 + $0xc4] sm:$0xf] }
 0x1be   : > { %7134 = vmatprep.mubr.msk.bf16.mxu1 %vm1193_vm5, %v6646_v36  ;;  %v4553_v54 = vrot.slane %v4552_v11, 4  ;;  %v3819_v60 = vrot.slane %v3817_v34, 6  ;;  %v4560_v13 = vshrl.u32 %v4259_v48, 16  ;;  %v3830_v51 = vrot.slane %v3828_v33, 5 }
 0x1bf   : > { %v3824_v35 = vor.u32 %v3823_v38, %v3822_v57  ;;  %v3833_v63 = vrot.slane %v3831_v16, 6  ;;  %v4563_v45 = vshll.u32 %v4259_v48, 16  ;;  %v9971_v12 = vshll.u32 %v8838_v31, 16  ;;  %v7305_v16 = vld [vmem:[#allocation2 + $0xa8] sm:$0xe] }
 0x1c0   : > { %v4558_v3 = vsel %vm7833_vm3, %v4553_v54, %v4557_v56  ;;  %v3820_v36 = vor.u32 %v3819_v60, %v3816_v52  ;;  %v4562_v26 = vrot.slane %v4560_v13, 4  ;;  %v9972_v33 = vshrl.u32 %v8838_v31, 16  ;;  %v4262_v13 = vld [vmem:[#allocation2 + $0xc0] sm:$0xf] }
 0x1c1   : > { %v3826_v0 = vrot.slane %v3824_v35, 4  ;;  %v6680_v27 = vcombine.low %v4548_v44, %v4558_v3  ;;  %v3834_v11 = vor.u32 %v3833_v63, %v3830_v51  ;;  %v4565_v34 = vrot.slane %v4563_v45, 5  ;;  %v3556_v44 = vld [vmem:[#allocation2 + $0xb0] sm:$0x3]  ;;  %v8860_v51 = vpop.f32.mrf.mxu0 }
 0x1c2   : > { %v4571_v57 = vrot.slane %v9971_v12, 5  ;;  %v3821_v38 = vrot.slane %v3820_v36, 4  ;;  %v4579_v48 = vshll.u32 %v4261_v5, 16  ;;  %v3837_v4 = vshrl.u32 %v7305_v16, 16  ;;  %10087 = vst [vmem:[#allocation69_spill] sm:$0xff] %v8860_v51 }
 0x1c3   : > { %7169 = vmatmul.mubr.msk.bf16.gmra.mxu0 %vm1193_vm5, %v6680_v27  ;;  %v3835_v60 = vsel %vm7742_vm2, %v3826_v0, %v3834_v11  ;;  %v4566_v56 = vor.u32 %v4565_v34, %v4562_v26  ;;  %v3840_v63 = vshll.u32 %v7305_v16, 16  ;;  %v10086_v52 = vshrl.u32 %v8337_v22, 16  ;;  %v8866_v27 = vpop.f32.mrf.mxu1 }
 0x1c4   : > { %v3825_v5 = vsel %vm7742_vm2, %v3821_v38, %v3824_v35  ;;  %v4575_v45 = vrot.slane %v9972_v33, 4  ;;  %v4581_v3 = vrot.slane %v4579_v48, 5  ;;  %v3839_v36 = vrot.slane %v3837_v4, 5  ;;  %10088 = vst [vmem:[#allocation70_spill] sm:$0xff] %v8866_v27 }
 0x1c5   : > { %v3845_v54 = vrot.slane %v10086_v52, 5  ;;  %v6647_v0 = vcombine.low %v3825_v5, %v3835_v60  ;;  %v4567_v26 = vrot.slane %v4566_v56, 4  ;;  %v3842_v11 = vrot.slane %v3840_v63, 6  ;;  %v8870_v52 = vpop.f32.mrf.mxu0  ;;  %v4264_v60 = vld [vmem:[#allocation2 + $0xc8] sm:$0x1]  ;;  %v8877_v63 = vpop.f32.mrf.mxu1 }
 0x1c6   : > { %v10089_v34 = vshll.u32 %v8337_v22, 16  ;;  %10090 = vst [vmem:[#allocation71_spill] sm:$0xff] %v8870_v52  ;;  %v4576_v12 = vor.u32 %v4575_v45, %v4571_v57  ;;  %v3851_v51 = vshrl.u32 %v3556_v44, 16  ;;  %v3854_v39 = vshll.u32 %v3556_v44, 16  ;;  %10091 = vst [vmem:[#allocation72_spill] sm:$0xff] %v8877_v63 }
 0x1c7   : > { %v4584_v35 = vshrl.u32 %v4262_v13, 16  ;;  %7135 = vmatmul.mubr.msk.bf16.gmra.mxu1 %vm1193_vm5, %v6647_v0  ;;  %v4572_v4 = vsel %vm7833_vm3, %v4567_v26, %v4571_v57  ;;  %v3843_v38 = vor.u32 %v3842_v11, %v3839_v36  ;;  %v4587_v56 = vshll.u32 %v4262_v13, 16  ;;  %v8879_v33 = vpop.f32.mrf.mxu0  ;;  %v8889_v11 = vpop.f32.mrf.mxu1 }
 0x1c8   : > { %v3846_v16 = vrot.slane %v10089_v34, 6  ;;  %v4577_v22 = vrot.slane %v4576_v12, 4  ;;  %v3853_v5 = vrot.slane %v3851_v51, 5  ;;  %v3856_v34 = vrot.slane %v3854_v39, 6  ;;  %10092 = vst [vmem:[#allocation73_spill] sm:$0xff] %v8879_v33  ;;  %10093 = vst [vmem:[#allocation74_spill] sm:$0xff] %v8889_v11 }
 0x1c9   : > { %v4586_v45 = vrot.slane %v4584_v35, 4  ;;  %v3844_v44 = vrot.slane %v3843_v38, 4  ;;  %v4589_v27 = vrot.slane %v4587_v56, 5  ;;  %v9974_v0 = vshll.u32 %v8872_v55, 16  ;;  %v3557_v35 = vld [vmem:[#allocation2 + $0xbc] sm:$0x3]  ;;  %v8895_v38 = vpop.f32.mrf.mxu0 }
 0x1ca   : > { %v3847_v48 = vor.u32 %v3846_v16, %v3845_v54  ;;  %v4582_v57 = vsel %vm7833_vm3, %v4577_v22, %v4581_v3  ;;  %v3857_v36 = vor.u32 %v3856_v34, %v3853_v5  ;;  %v9973_v54 = vshrl.u32 %v8872_v55, 16  ;;  %10094 = vst [vmem:[#allocation75_spill] sm:$0xff] %v8895_v38  ;;  %v4265_v22 = vld [vmem:[#allocation2 + $0xcc] sm:$0xf]  ;;  %v4267_v38 = vld [vmem:[#allocation2 + $0xd4] sm:$0x1] }
 0x1cb   : > { %v4603_v13 = vshll.u32 %v4264_v60, 16  ;;  %v6681_v26 = vcombine.low %v4572_v4, %v4582_v57  ;;  %v4590_v39 = vor.u32 %v4589_v27, %v4586_v45  ;;  %v4595_v51 = vrot.slane %v9974_v0, 5  ;;  %v7306_v27 = vld [vmem:[#allocation2 + $0xb4] sm:$0xe] }
 0x1cc   : > { %v3849_v52 = vrot.slane %v3847_v48, 4  ;;  %v3848_v12 = vsel %vm7742_vm2, %v3844_v44, %v3847_v48  ;;  %v4599_v3 = vrot.slane %v9973_v54, 4  ;;  %v3860_v56 = vshrl.u32 %v7306_v27, 16 }
 0x1cd   : > { %7172 = vmatprep.mubr.msk.bf16.mxu0 %vm1193_vm5, %v6681_v26  ;;  %v4591_v60 = vrot.slane %v4590_v39, 4  ;;  %v4605_v48 = vrot.slane %v4603_v13, 5  ;;  %v3863_v34 = vshll.u32 %v7306_v27, 16  ;;  %v10095_v45 = vshrl.u32 %v8362_v14, 16 }
 0x1ce   : > { %v3858_v16 = vsel %vm7742_vm2, %v3849_v52, %v3857_v36  ;;  %v4600_v5 = vor.u32 %v4599_v3, %v4595_v51  ;;  %v10096_v52 = vshll.u32 %v8362_v14, 16  ;;  %v8902_v36 = vld [vmem:[#allocation2 + $0xd0] sm:$0xf]  ;;  %v3874_v13 = vshrl.u32 %v3557_v35, 16 }
 0x1cf   : > { %v6648_v4 = vcombine.low %v3848_v12, %v3858_v16  ;;  %v3868_v44 = vrot.slane %v10095_v45, 5  ;;  %v4596_v26 = vsel %vm7833_vm3, %v4591_v60, %v4595_v51  ;;  %v3862_v12 = vrot.slane %v3860_v56, 5  ;;  %v8907_v16 = vpop.f32.mrf.mxu1  ;;  %v8909_v45 = vpop.f32.mrf.mxu0 }
 0x1d0   : > { %v3869_v57 = vrot.slane %v10096_v52, 6  ;;  %v3877_v39 = vshll.u32 %v3557_v35, 16  ;;  %10097 = vst [vmem:[#allocation76_spill] sm:$0xff] %v8907_v16  ;;  %v4601_v3 = vrot.slane %v4600_v5, 4  ;;  %v3865_v27 = vrot.slane %v3863_v34, 6  ;;  %10098 = vst [vmem:[#allocation77_spill] sm:$0xff] %v8909_v45 }
 0x1d1   : > { %7138 = vmatprep.mubr.msk.bf16.mxu1 %vm1193_vm5, %v6648_v4  ;;  %v4608_v0 = vshrl.u32 %v4265_v22, 16  ;;  %v3876_v14 = vrot.slane %v3874_v13, 5  ;;  %v4611_v33 = vshll.u32 %v4265_v22, 16  ;;  %v9975_v4 = vshll.u32 %v8902_v36, 16  ;;  %v8912_v11 = vpop.f32.mrf.mxu1  ;;  %v8916_v5 = vpop.f32.mrf.mxu0  ;;  %v6168_v45 = vld [vmem:[%s8933_s24] sm:$0xff] }
 0x1d2   : > { %v3870_v54 = vor.u32 %v3869_v57, %v3868_v44  ;;  %v3879_v52 = vrot.slane %v3877_v39, 6  ;;  %10099 = vst [vmem:[#allocation78_spill] sm:$0xff] %v8912_v11  ;;  %v4606_v51 = vsel %vm7833_vm3, %v4601_v3, %v4605_v48  ;;  %v3866_v35 = vor.u32 %v3865_v27, %v3862_v12  ;;  %10100 = vst [vmem:[#allocation79_spill] sm:$0xff] %v8916_v5  ;;  %v7307_v12 = vld [vmem:[#allocation2 + $0xc0] sm:$0xe] }
 0x1d3   : > { %v4610_v56 = vrot.slane %v4608_v0, 4  ;;  %v6682_v34 = vcombine.low %v4596_v26, %v4606_v51  ;;  %v4613_v57 = vrot.slane %v4611_v33, 5  ;;  %v8920_v13 = vrot.slane %v9975_v4, 5  ;;  %v8922_v22 = vpop.f32.mrf.mxu1  ;;  %v4268_v27 = vld [vmem:[#allocation2 + $0xd8] sm:$0xf]  ;;  %v8926_v0 = vpop.f32.mrf.mxu0  ;;  %v6170_v4 = vld [vmem:[%s8933_s24 + $0x10] sm:$0xff]  ;;  %6232 = vrot.lane.b32.xlu0 %v6168_v45, %s7350_s25 }
 0x1d4   : > { %v3872_v60 = vrot.slane %v3870_v54, 4  ;;  %v3880_v44 = vor.u32 %v3879_v52, %v3876_v14  ;;  %10101 = vst [vmem:[#allocation80_spill] sm:$0xff] %v8922_v22  ;;  %v3867_v39 = vrot.slane %v3866_v35, 4  ;;  %v4627_v48 = vshll.u32 %v4267_v38, 16  ;;  %10102 = vst [vmem:[#allocation81_spill] sm:$0xff] %v8926_v0  ;;  %6236 = vrot.lane.b32.xlu1 %v6170_v4, %s7350_s25 }
 0x1d5   : > { %v3883_v3 = vshrl.u32 %v7307_v12, 16  ;;  %7173 = vmatmul.mubr.msk.bf16.gmra.mxu0 %vm1193_vm5, %v6682_v34  ;;  %v4614_v26 = vor.u32 %v4613_v57, %v4610_v56  ;;  %v3558_v38 = vld [vmem:[#allocation2 + $0xc8] sm:$0x3]  ;;  %v3886_v14 = vshll.u32 %v7307_v12, 16  ;;  %v10103_v52 = vshrl.u32 %v8377_v19, 16  ;;  %v8940_v35 = vpop.f32.mrf.mxu1  ;;  %v8948_v56 = vpop.f32.mrf.mxu0 }
 0x1d6   : > { %v3881_v33 = vsel %vm7742_vm2, %v3872_v60, %v3880_v44  ;;  %10104 = vst [vmem:[#allocation82_spill] sm:$0xff] %v8940_v35  ;;  %v3871_v5 = vsel %vm7742_vm2, %v3867_v39, %v3870_v54  ;;  %v10105_v34 = vshrl.u32 %v8902_v36, 16  ;;  %v4629_v11 = vrot.slane %v4627_v48, 5  ;;  %10106 = vst [vmem:[#allocation83_spill] sm:$0xff] %v8948_v56  ;;  %v6171_v54 = vld [vmem:[%s8933_s24 + $0x18] sm:$0xff]  ;;  %v6169_v39 = vld [vmem:[%s8933_s24 + $0x8] sm:$0xff] }
 0x1d7   : > { %v3891_v51 = vrot.slane %v10103_v52, 5  ;;  %v3885_v60 = vrot.slane %v3883_v3, 5  ;;  %v6649_v44 = vcombine.low %v3871_v5, %v3881_v33  ;;  %v4615_v57 = vrot.slane %v4614_v26, 4  ;;  %v8954_v63 = vpop.f32.mrf.mxu1  ;;  %v8959_v56 = vld [vmem:[#allocation2 + $0xdc] sm:$0xf]  ;;  %v8961_v4 = vpop.f32.mrf.mxu0  ;;  %6234 = vrot.lane.b32.xlu0 %v6169_v39, %s7350_s25 }
 0x1d8   : > { %v4623_v22 = vrot.slane %v10105_v34, 4  ;;  %v3888_v12 = vrot.slane %v3886_v14, 6  ;;  %v10107_v52 = vshll.u32 %v8377_v19, 16  ;;  %10108 = vst [vmem:[#allocation84_spill] sm:$0xff] %v8954_v63  ;;  %v3897_v3 = vshrl.u32 %v3558_v38, 16  ;;  %10109 = vst [vmem:[#allocation85_spill] sm:$0xff] %v8961_v4  ;;  %6238 = vrot.lane.b32.xlu1 %v6171_v54, %s7350_s25 }
 0x1d9   : > { %v3900_v34 = vshll.u32 %v3558_v38, 16  ;;  %v4632_v24 = vshrl.u32 %v4268_v27, 16  ;;  %7139 = vmatmul.mubr.msk.bf16.gmra.mxu1 %vm1193_vm5, %v6649_v44  ;;  %v4620_v19 = vsel %vm7833_vm3, %v4615_v57, %v8920_v13  ;;  %v4270_v33 = vld [vmem:[#allocation2 + $0xe0] sm:$0x1]  ;;  %v4635_v26 = vshll.u32 %v4268_v27, 16  ;;  %v8969_v0 = vpop.f32.mrf.mxu0  ;;  %v6173_v27 = vld [vmem:[%s8933_s24 + $0x28] sm:$0xff] }
 0x1da   : > { %v3892_v16 = vrot.slane %v10107_v52, 6  ;;  %v4624_v48 = vor.u32 %v4623_v22, %v8920_v13  ;;  %v3889_v45 = vor.u32 %v3888_v12, %v3885_v60  ;;  %v8967_v22 = vpop.f32.mrf.mxu1  ;;  %v3899_v14 = vrot.slane %v3897_v3, 5  ;;  %10111 = vst [vmem:[#allocation87_spill] sm:$0xff] %v8969_v0  ;;  %v6172_v57 = vld [vmem:[%s8933_s24 + $0x20] sm:$0xff] }
 0x1db   : > { %10110 = vst [vmem:[#allocation86_spill] sm:$0xff] %v8967_v22  ;;  %v3902_v52 = vrot.slane %v3900_v34, 6  ;;  %v4634_v63 = vrot.slane %v4632_v24, 4  ;;  %v4637_v60 = vrot.slane %v4635_v26, 5  ;;  %v9976_v24 = vshrl.u32 %v8959_v56, 16  ;;  %v8981_v34 = vpop.f32.mrf.mxu0  ;;  %6240 = vrot.lane.b32.xlu0 %v6172_v57, %s7350_s25 }
 0x1dc   : > { %v3893_v5 = vor.u32 %v3892_v16, %v3891_v51  ;;  %v4625_v38 = vrot.slane %v4624_v48, 4  ;;  %v3890_v44 = vrot.slane %v3889_v45, 4  ;;  %v9977_v16 = vshll.u32 %v8959_v56, 16  ;;  %v8974_v51 = vpop.f32.mrf.mxu1  ;;  %10113 = vst [vmem:[#allocation89_spill] sm:$0xff] %v8981_v34  ;;  %6242 = vrot.lane.b32.xlu1 %v6173_v27, %s7350_s25 }
 0x1dd   : > { %10112 = vst [vmem:[#allocation88_spill] sm:$0xff] %v8974_v51  ;;  %v3903_v48 = vor.u32 %v3902_v52, %v3899_v14  ;;  %v4651_v3 = vshll.u32 %v4270_v33, 16  ;;  %v4638_v45 = vor.u32 %v4637_v60, %v4634_v63  ;;  %v4647_v33 = vrot.slane %v9976_v24, 4  ;;  %v8993_v14 = vld [vmem:[#allocation2 + $0x24] sm:$0xe] }
 0x1de   : > { %v3895_v13 = vrot.slane %v3893_v5, 4  ;;  %v4630_v12 = vsel %vm7833_vm3, %v4625_v38, %v4629_v11  ;;  %v3894_v39 = vsel %vm7742_vm2, %v3890_v44, %v3893_v5  ;;  %v4643_v26 = vrot.slane %v9977_v16, 5  ;;  %v8987_v0 = vpop.f32.mrf.mxu1  ;;  %v3559_v38 = vld [vmem:[#allocation2 + $0xd4] sm:$0x3]  ;;  %v7308_v44 = vld [vmem:[#allocation2 + $0xcc] sm:$0xe] }
 0x1df   : > { %v6683_v54 = vcombine.low %v4620_v19, %v4630_v12  ;;  %10114 = vst [vmem:[#allocation90_spill] sm:$0xff] %v8987_v0  ;;  %v8995_v19 = vpop.f32.mrf.mxu0  ;;  %v4639_v5 = vrot.slane %v4638_v45, 4  ;;  %v4653_v52 = vrot.slane %v4651_v3, 5  ;;  %v3906_v60 = vshrl.u32 %v7308_v44, 16  ;;  %v6175_v12 = vld [vmem:[%s8933_s24 + $0x38] sm:$0xff] }
 0x1e0   : > { %v3904_v11 = vsel %vm7742_vm2, %v3895_v13, %v3903_v48  ;;  %10115 = vst [vmem:[#allocation91_spill] sm:$0xff] %v8995_v19  ;;  %v9000_v13 = vpop.f32.mrf.mxu1  ;;  %v6174_v48 = vld [vmem:[%s8933_s24 + $0x30] sm:$0xff]  ;;  %v4648_v24 = vor.u32 %v4647_v33, %v4643_v26  ;;  %v3909_v16 = vshll.u32 %v7308_v44, 16  ;;  %v10117_v34 = vshrl.u32 %v8456_v8, 16  ;;  %v5419_v51 = vld [vmem:[#allocation2 + $0x2c] sm:$0x3]  ;;  %6246 = vrot.lane.b32.xlu1 %v6175_v12, %s7350_s25 }
 0x1e1   : > { %7176 = vmatprep.mubr.msk.bf16.mxu0 %vm1193_vm5, %v6683_v54  ;;  %v6650_v63 = vcombine.low %v3894_v39, %v3904_v11  ;;  %10116 = vst [vmem:[#allocation92_spill] sm:$0xff] %v9000_v13  ;;  %v10118_v27 = vshll.u32 %v8456_v8, 16  ;;  %v9008_v57 = vpop.f32.mrf.mxu0  ;;  %v4644_v3 = vsel %vm7833_vm3, %v4639_v5, %v4643_v26  ;;  %v3908_v54 = vrot.slane %v3906_v60, 5  ;;  %6244 = vrot.lane.b32.xlu0 %v6174_v48, %s7350_s25 }
 0x1e2   : > { %v3914_v4 = vrot.slane %v10117_v34, 5  ;;  %10119 = vst [vmem:[#allocation93_spill] sm:$0xff] %v9008_v57  ;;  %v3920_v39 = vshrl.u32 %v3559_v38, 16  ;;  %v3923_v45 = vshll.u32 %v3559_v38, 16  ;;  %v9013_v11 = vpop.f32.mrf.mxu1  ;;  %v4649_v33 = vrot.slane %v4648_v24, 4 }
 0x1e3   : > { %v3915_v0 = vrot.slane %v10118_v27, 6  ;;  %7142 = vmatprep.mubr.msk.bf16.mxu1 %vm1193_vm5, %v6650_v63  ;;  %10120 = vst [vmem:[#allocation94_spill] sm:$0xff] %v9013_v11  ;;  %v3911_v44 = vrot.slane %v3909_v16, 6  ;;  %v5436_v8 = vshrl.u32 %v8993_v14, 16  ;;  %v9016_v27 = vpop.f32.mrf.mxu0  ;;  %v5439_v5 = vshll.u32 %v8993_v14, 16  ;;  %v6177_v16 = vld [vmem:[%s8933_s24 + $0x48] sm:$0xff] }
 0x1e4   : > { %10121 = vst [vmem:[#allocation95_spill] sm:$0xff] %v9016_v27  ;;  %v3922_v26 = vrot.slane %v3920_v39, 5  ;;  %v3925_v63 = vrot.slane %v3923_v45, 6  ;;  %v10122_v38 = vshrl.u32 %v8414_v6, 16  ;;  %v9023_v22 = vpop.f32.mrf.mxu1  ;;  %v10125_v19 = vshll.u32 %v8414_v6, 16  ;;  %6250 = vrot.lane.b32.xlu1 %v6177_v16, %s7350_s25 }
 0x1e5   : > { %v3916_v34 = vor.u32 %v3915_v0, %v3914_v4  ;;  %10123 = vst [vmem:[#allocation96_spill] sm:$0xff] %v9023_v22  ;;  %v6176_v0 = vld [vmem:[%s8933_s24 + $0x40] sm:$0xff]  ;;  %v4654_v4 = vsel %vm7833_vm3, %v4649_v33, %v4653_v52  ;;  %v3912_v24 = vor.u32 %v3911_v44, %v3908_v54  ;;  %v5438_v57 = vrot.slane %v5436_v8, 5  ;;  %v9029_v12 = vpop.f32.mrf.mxu0  ;;  %v7309_v54 = vld [vmem:[#allocation2 + $0x28] sm:$0xf]  ;;  %v6178_v8 = vld [vmem:[%s8933_s24 + $0x50] sm:$0xff] }
 0x1e6   : > { %v5444_v60 = vrot.slane %v10122_v38, 5  ;;  %10124 = vst [vmem:[#allocation97_spill] sm:$0xff] %v9029_v12  ;;  %v6684_v48 = vcombine.low %v4644_v3, %v4654_v4  ;;  %v3926_v39 = vor.u32 %v3925_v63, %v3922_v26  ;;  %v5441_v45 = vrot.slane %v5439_v5, 6  ;;  %v9033_v13 = vpop.f32.mrf.mxu1  ;;  %6248 = vrot.lane.b32.xlu0 %v6176_v0, %s7350_s25  ;;  %v9043_v44 = vld [vmem:[#allocation2 + $0x30] sm:$0xe] }
 0x1e7   : > { %v3918_v27 = vrot.slane %v3916_v34, 4  ;;  %v5445_v11 = vrot.slane %v10125_v19, 6  ;;  %v3913_v38 = vrot.slane %v3912_v24, 4  ;;  %v5450_v22 = vshrl.u32 %v5419_v51, 16  ;;  %v9036_v52 = vpop.f32.mrf.mxu0  ;;  %v7310_v16 = vld [vmem:[#allocation2 + $0x2c] sm:$0x1] }
 0x1e8   : > { %v5453_v35 = vshll.u32 %v5419_v51, 16  ;;  %v6701_v49 = vrot.slane %v8993_v14, 9  ;;  %10126 = vst [vmem:[#allocation98_spill] sm:$0xff] %v9036_v52  ;;  %7177 = vmatmul.mubr.msk.bf16.gmra.mxu0 %vm1193_vm5, %v6684_v48  ;;  %v5442_v19 = vor.u32 %v5441_v45, %v5438_v57  ;;  %v5015_v33 = vrot.slane %v7309_v54, 5  ;;  %v9045_v51 = vpop.f32.mrf.mxu1  ;;  %v6179_v14 = vld [vmem:[%s8933_s24 + $0x58] sm:$0xff] }
 0x1e9   : > { %v3927_v6 = vsel %vm7742_vm2, %v3918_v27, %v3926_v39  ;;  %v5446_v3 = vor.u32 %v5445_v11, %v5444_v60  ;;  %v3917_v26 = vsel %vm7742_vm2, %v3913_v38, %v3916_v34  ;;  %v5452_v63 = vrot.slane %v5450_v22, 5  ;;  %v5420_v4 = vld [vmem:[#allocation2 + $0x38] sm:$0x3]  ;;  %v9051_v24 = vpop.f32.mrf.mxu0  ;;  %6254 = vrot.lane.b32.xlu1 %v6179_v14, %s7350_s25 }
 0x1ea   : > { %v5455_v5 = vrot.slane %v5453_v35, 6  ;;  %v5018_v0 = vrot.slane %v7310_v16, 5  ;;  %10127 = vst [vmem:[#allocation99_spill] sm:$0xff] %v9051_v24  ;;  %v6651_v57 = vcombine.low %v3917_v26, %v3927_v6  ;;  %v5443_v11 = vrot.slane %v5442_v19, 4  ;;  %v9055_v48 = vpop.f32.mrf.mxu1  ;;  %6252 = vrot.lane.b32.xlu0 %v6178_v8, %s7350_s25  ;;  %v6180_v26 = vld [vmem:[%s8933_s24 + $0x60] sm:$0xff] }
 0x1eb   : > { %v5448_v27 = vrot.slane %v5446_v3, 4  ;;  %v5016_v60 = vsel %vm7488_vm10, %v6701_v49, %v5015_v33  ;;  %v5017_v45 = vrot.slane %v5015_v33, 4  ;;  %v5459_v22 = vshrl.u32 %v9043_v44, 16  ;;  %v9059_v34 = vpop.f32.mrf.mxu0  ;;  %v6181_v33 = vld [vmem:[%s8933_s24 + $0x68] sm:$0xff]  ;;  %v9075_v16 = vld [vmem:[#allocation2 + $0x3c] sm:$0xe] }
 0x1ec   : > { %v5456_v39 = vor.u32 %v5455_v5, %v5452_v63  ;;  %v5462_v35 = vshll.u32 %v9043_v44, 16  ;;  %10128 = vst [vmem:[#allocation100_spill] sm:$0xff] %v9059_v34  ;;  %7143 = vmatmul.mubr.msk.bf16.gmra.mxu1 %vm1193_vm5, %v6651_v57  ;;  %v5447_v38 = vsel %vm7742_vm2, %v5443_v11, %v5446_v3  ;;  %v5471_v49 = vrot.slane %v8494_v47, 4  ;;  %v9067_v54 = vpop.f32.mrf.mxu1  ;;  %v7311_v52 = vld [vmem:[#allocation2 + $0x38] sm:$0x1] }
 0x1ed   : > { %v5473_v6 = vshrl.u32 %v5420_v4, 16  ;;  %v5476_v19 = vshll.u32 %v5420_v4, 16  ;;  %v5019_v14 = vsel %vm7488_vm10, %v5017_v45, %v5018_v0  ;;  %v5461_v8 = vrot.slane %v5459_v22, 5  ;;  %v9077_v57 = vpop.f32.mrf.mxu0  ;;  %v7312_v0 = vld [vmem:[#allocation2 + $0x34] sm:$0xf]  ;;  %6258 = vrot.lane.b32.xlu1 %v6181_v33, %s7350_s25 }
 0x1ee   : > { %v5457_v63 = vsel %vm7742_vm2, %v5448_v27, %v5456_v39  ;;  %v5464_v5 = vrot.slane %v5462_v35, 6  ;;  %10129 = vst [vmem:[#allocation101_spill] sm:$0xff] %v9077_v57  ;;  %v6718_v11 = vcombine.low %v5016_v60, %v5019_v14  ;;  %v9079_v24 = vpop.f32.mrf.mxu1  ;;  %v5025_v12 = vrot.slane %v7311_v52, 5  ;;  %6256 = vrot.lane.b32.xlu0 %v6180_v26, %s7350_s25  ;;  %v5421_v35 = vld [vmem:[#allocation2 + $0x44] sm:$0x3] }
 0x1ef   : > { %v6751_v3 = vcombine.low %v5447_v38, %v5457_v63  ;;  %v5475_v34 = vrot.slane %v5473_v6, 5  ;;  %v5478_v4 = vrot.slane %v5476_v19, 6  ;;  %10130 = vst [vmem:[#allocation102_spill] sm:$0xff] %v9079_v24  ;;  %v6702_v39 = vrot.slane %v9043_v44, 9  ;;  %v9082_v22 = vpop.f32.mrf.mxu0  ;;  %v6183_v6 = vld [vmem:[%s8933_s24 + $0x78] sm:$0xff]  ;;  %v6182_v44 = vld [vmem:[%s8933_s24 + $0x70] sm:$0xff] }
 0x1f0   : > { %v5465_v27 = vor.u32 %v5464_v5, %v5461_v8  ;;  %v5022_v45 = vrot.slane %v7312_v0, 5  ;;  %10131 = vst [vmem:[#allocation103_spill] sm:$0xff] %v9082_v22  ;;  %7182 = vmatprep.mubr.msk.bf16.mxu1 %vm1193_vm5, %v6718_v11  ;;  %v5482_v38 = vshrl.u32 %v9075_v16, 16  ;;  %v9089_v52 = vpop.f32.mrf.mxu1  ;;  %v10133_v19 = vshll.u32 %v8539_v23, 16 }
 0x1f1   : > { %7216 = vmatprep.mubr.msk.bf16.mxu0 %vm1193_vm5, %v6751_v3  ;;  %v5479_v60 = vor.u32 %v5478_v4, %v5475_v34  ;;  %10132 = vst [vmem:[#allocation104_spill] sm:$0xff] %v9089_v52  ;;  %v9097_v8 = vpop.f32.mrf.mxu0  ;;  %v5485_v3 = vshll.u32 %v9075_v16, 16  ;;  %v10135_v11 = vshrl.u32 %v8501_v53, 16  ;;  %6262 = vrot.lane.b32.xlu1 %v6183_v6, %s7350_s25  ;;  %v5499_v57 = vshll.u32 %v5421_v35, 16 }
 0x1f2   : > { %v5514_v63 = vrot.slane %v10133_v19, 6  ;;  %v5466_v14 = vrot.slane %v5465_v27, 4  ;;  %v5023_v33 = vsel %vm7488_vm10, %v6702_v39, %v5022_v45  ;;  %v5024_v26 = vrot.slane %v5022_v45, 4  ;;  %10134 = vst [vmem:[#allocation105_spill] sm:$0xff] %v9097_v8  ;;  %v9104_v0 = vpop.f32.mrf.mxu1  ;;  %6260 = vrot.lane.b32.xlu0 %v6182_v44, %s7350_s25 }
 0x1f3   : > { %v5480_v34 = vsel %vm7742_vm2, %v5471_v49, %v5479_v60  ;;  %v5484_v5 = vrot.slane %v5482_v38, 5  ;;  %v5490_v4 = vrot.slane %v10135_v11, 5  ;;  %10136 = vst [vmem:[#allocation106_spill] sm:$0xff] %v9104_v0  ;;  %v10137_v45 = vshll.u32 %v8501_v53, 16  ;;  %v9113_v38 = vld [vmem:[#allocation2 + $0x48] sm:$0xe]  ;;  %v9115_v19 = vpop.f32.mrf.mxu0 }
 0x1f4   : > { %v5470_v27 = vsel %vm7742_vm2, %v5466_v14, %v8494_v47  ;;  %v5026_v39 = vsel %vm7488_vm10, %v5024_v26, %v5025_v12  ;;  %v5496_v60 = vshrl.u32 %v5421_v35, 16  ;;  %10138 = vst [vmem:[#allocation107_spill] sm:$0xff] %v9115_v19  ;;  %v5487_v22 = vrot.slane %v5485_v3, 6  ;;  %v9119_v47 = vpop.f32.mrf.mxu1  ;;  %v6185_v14 = vld [vmem:[%s8933_s24 + $0x88] sm:$0xff]  ;;  %v6184_v12 = vld [vmem:[%s8933_s24 + $0x80] sm:$0xff] }
 0x1f5   : > { %v5491_v49 = vrot.slane %v10137_v45, 6  ;;  %v6752_v11 = vcombine.low %v5470_v27, %v5480_v34  ;;  %v6719_v8 = vcombine.low %v5023_v33, %v5026_v39  ;;  %v6703_v45 = vrot.slane %v9075_v16, 9  ;;  %v7313_v0 = vld [vmem:[#allocation2 + $0x40] sm:$0xf]  ;;  %v9124_v24 = vpop.f32.mrf.mxu0  ;;  %v7314_v33 = vld [vmem:[#allocation2 + $0x44] sm:$0x1]  ;;  %6266 = vrot.lane.b32.xlu1 %v6185_v14, %s7350_s25 }
 0x1f6   : > { %v5498_v53 = vrot.slane %v5496_v60, 5  ;;  %v5029_v52 = vrot.slane %v7313_v0, 5  ;;  %10139 = vst [vmem:[#allocation108_spill] sm:$0xff] %v9124_v24  ;;  %v5488_v6 = vor.u32 %v5487_v22, %v5484_v5  ;;  %v5501_v44 = vrot.slane %v5499_v57, 6  ;;  %v5422_v34 = vld [vmem:[#allocation2 + $0x50] sm:$0x3]  ;;  %6264 = vrot.lane.b32.xlu0 %v6184_v12, %s7350_s25 }
 0x1f7   : > { %v5492_v26 = vor.u32 %v5491_v49, %v5490_v4  ;;  %7217 = vmatmul.mubr.msk.bf16.vlgmr.msra.gmra.mxu0 %vm1193_vm5, %v6752_v11  ;;  %7183 = vmatmul.mubr.msk.bf16.vlgmr.msra.gmra.mxu1 %vm1193_vm5, %v6719_v8  ;;  %v5032_v35 = vrot.slane %v7314_v33, 5  ;;  %v5505_v3 = vshrl.u32 %v9113_v38, 16  ;;  %v9129_v4 = vpop.f32.mrf.mxu1  ;;  %v5508_v39 = vshll.u32 %v9113_v38, 16  ;;  %v9134_v49 = vpop.f32.mrf.mxu0  ;;  %v6187_v33 = vld [vmem:[%s8933_s24 + $0x98] sm:$0xff]  ;;  %v6186_v24 = vld [vmem:[%s8933_s24 + $0x90] sm:$0xff] }
 0x1f8   : > { %10140 = vst [vmem:[#allocation109_spill] sm:$0xff] %v9129_v4  ;;  %v5030_v0 = vsel %vm7488_vm10, %v6703_v45, %v5029_v52  ;;  %v5031_v27 = vrot.slane %v5029_v52, 4  ;;  %10141 = vst [vmem:[#allocation110_spill] sm:$0xff] %v9134_v49  ;;  %v5489_v57 = vrot.slane %v5488_v6, 4  ;;  %v5502_v22 = vor.u32 %v5501_v44, %v5498_v53 }
 0x1f9   : > { %v5494_v16 = vrot.slane %v5492_v26, 4  ;;  %v5507_v8 = vrot.slane %v5505_v3, 5  ;;  %v10142_v5 = vshrl.u32 %v8539_v23, 16  ;;  %v9140_v11 = vpop.f32.mrf.mxu1  ;;  %v5510_v45 = vrot.slane %v5508_v39, 6  ;;  %v9146_v4 = vpop.f32.mrf.mxu0  ;;  %v4953_v39 = vld [vmem:[#allocation2 + $0x54] sm:$0xe]  ;;  %6270 = vrot.lane.b32.xlu1 %v6187_v33, %s7350_s25 }
 0x1fa   : > { %v5033_v52 = vsel %vm7488_vm10, %v5031_v27, %v5032_v35  ;;  %v5519_v19 = vshrl.u32 %v5422_v34, 16  ;;  %v5522_v49 = vshll.u32 %v5422_v34, 16  ;;  %10143 = vst [vmem:[#allocation111_spill] sm:$0xff] %v9146_v4  ;;  %v5493_v14 = vsel %vm7742_vm2, %v5489_v57, %v5492_v26  ;;  %6268 = vrot.lane.b32.xlu0 %v6186_v24, %s7350_s25  ;;  %v7315_v26 = vld [vmem:[#allocation2 + $0x50] sm:$0x1] }
 0x1fb   : > { %v5513_v60 = vrot.slane %v10142_v5, 5  ;;  %v5503_v12 = vsel %vm7742_vm2, %v5494_v16, %v5502_v22  ;;  %v6720_v23 = vcombine.low %v5030_v0, %v5033_v52  ;;  %v9152_v6 = vpop.f32.mrf.mxu1  ;;  %v5511_v3 = vor.u32 %v5510_v45, %v5507_v8  ;;  %v9154_v34 = vpop.f32.mrf.mxu0  ;;  %v7316_v0 = vld [vmem:[#allocation2 + $0x4c] sm:$0xf] }
 0x1fc   : > { %v6753_v44 = vcombine.low %v5493_v14, %v5503_v12  ;;  %v5521_v35 = vrot.slane %v5519_v19, 5  ;;  %v5524_v27 = vrot.slane %v5522_v49, 6  ;;  %10144 = vst [vmem:[#allocation112_spill] sm:$0xff] %v9154_v34  ;;  %v5039_v57 = vrot.slane %v7315_v26, 5  ;;  %v6189_v19 = vld [vmem:[%s8933_s24 + $0xa8] sm:$0xff]  ;;  %v6188_v49 = vld [vmem:[%s8933_s24 + $0xa0] sm:$0xff] }
 0x1fd   : > { %v5515_v53 = vor.u32 %v5514_v63, %v5513_v60  ;;  %7186 = vmatprep.mubr.msk.bf16.mxu1 %vm1193_vm5, %v6720_v23  ;;  %v6704_v16 = vrot.slane %v9113_v38, 9  ;;  %v5036_v22 = vrot.slane %v7316_v0, 5  ;;  %v9160_v8 = vpop.f32.mrf.mxu1  ;;  %v5512_v5 = vrot.slane %v5511_v3, 4  ;;  %v9165_v33 = vpop.f32.mrf.mxu0  ;;  %v5423_v14 = vld [vmem:[#allocation2 + $0x5c] sm:$0x3]  ;;  %6274 = vrot.lane.b32.xlu1 %v6189_v19, %s7350_s25 }
 0x1fe   : > { %7220 = vmatprep.mubr.msk.bf16.mxu0 %vm1193_vm5, %v6753_v44  ;;  %v5525_v60 = vor.u32 %v5524_v27, %v5521_v35  ;;  %10145 = vst [vmem:[#allocation113_spill] sm:$0xff] %v9165_v33  ;;  %v10146_v24 = vshll.u32 %v8606_v30, 16  ;;  %v5528_v12 = vshrl.u32 %v4953_v39, 16  ;;  %v5531_v3 = vshll.u32 %v4953_v39, 16  ;;  %6272 = vrot.lane.b32.xlu0 %v6188_v49, %s7350_s25  ;;  %v6190_v49 = vld [vmem:[%s8933_s24 + $0xb0] sm:$0xff] }
 0x1ff   : > { %v5517_v63 = vrot.slane %v5515_v53, 4  ;;  %v5037_v45 = vsel %vm7488_vm10, %v6704_v16, %v5036_v22  ;;  %v5038_v38 = vrot.slane %v5036_v22, 4  ;;  %v5516_v23 = vsel %vm7742_vm2, %v5512_v5, %v5515_v53  ;;  %v9183_v5 = vld [vmem:[#allocation2 + $0x60] sm:$0xe]  ;;  %v9188_v19 = vpop.f32.mrf.mxu0 }
 0x200   : > { %v5560_v52 = vrot.slane %v10146_v24, 6  ;;  %v10147_v35 = vshrl.u32 %v8570_v37, 16  ;;  %v5530_v0 = vrot.slane %v5528_v12, 5  ;;  %v10148_v22 = vshll.u32 %v8570_v37, 16  ;;  %10150 = vst [vmem:[#allocation115_spill] sm:$0xff] %v9188_v19 }
 0x201   : > { %v5526_v44 = vsel %vm7742_vm2, %v5517_v63, %v5525_v60  ;;  %v5040_v16 = vsel %vm7488_vm10, %v5038_v38, %v5039_v57  ;;  %v9185_v63 = vpop.f32.mrf.mxu1  ;;  %v6191_v60 = vld [vmem:[%s8933_s24 + $0xb8] sm:$0xff]  ;;  %v5533_v33 = vrot.slane %v5531_v3, 6  ;;  %v5545_v34 = vshll.u32 %v5423_v14, 16  ;;  %v5424_v3 = vld [vmem:[#allocation2 + $0x68] sm:$0x3] }
 0x202   : > { %v5536_v27 = vrot.slane %v10147_v35, 5  ;;  %v6754_v26 = vcombine.low %v5516_v23, %v5526_v44  ;;  %v5537_v53 = vrot.slane %v10148_v22, 6  ;;  %10149 = vst [vmem:[#allocation114_spill] sm:$0xff] %v9185_v63  ;;  %v6721_v24 = vcombine.low %v5037_v45, %v5040_v16  ;;  %v7317_v38 = vld [vmem:[#allocation2 + $0x58] sm:$0xf]  ;;  %6278 = vrot.lane.b32.xlu1 %v6191_v60, %s7350_s25  ;;  %6276 = vrot.lane.b32.xlu0 %v6190_v49, %s7350_s25  ;;  %v6192_v60 = vld [vmem:[%s8933_s24 + $0xc0] sm:$0xff] }
 0x203   : > { %v5542_v35 = vshrl.u32 %v5423_v14, 16  ;;  %v6705_v57 = vrot.slane %v4953_v39, 9  ;;  %v5043_v12 = vrot.slane %v7317_v38, 5  ;;  %v7318_v37 = vld [vmem:[#allocation2 + $0x5c] sm:$0x1]  ;;  %v5534_v22 = vor.u32 %v5533_v33, %v5530_v0  ;;  %v6193_v33 = vld [vmem:[%s8933_s24 + $0xc8] sm:$0xff] }
 0x204   : > { %7221 = vmatmul.mubr.msk.bf16.gmra.mxu0 %vm1193_vm5, %v6754_v26  ;;  %v5538_v23 = vor.u32 %v5537_v53, %v5536_v27  ;;  %v5046_v44 = vrot.slane %v7318_v37, 5  ;;  %7187 = vmatmul.mubr.msk.bf16.gmra.mxu1 %vm1193_vm5, %v6721_v24  ;;  %v5547_v45 = vrot.slane %v5545_v34, 6  ;;  %v5551_v14 = vshrl.u32 %v9183_v5, 16  ;;  %v9198_v53 = vpop.f32.mrf.mxu1  ;;  %v9204_v37 = vpop.f32.mrf.mxu0 }
 0x205   : > { %v5544_v4 = vrot.slane %v5542_v35, 5  ;;  %v5044_v39 = vsel %vm7488_vm10, %v6705_v57, %v5043_v12  ;;  %v5045_v27 = vrot.slane %v5043_v12, 4  ;;  %v5554_v26 = vshll.u32 %v9183_v5, 16  ;;  %10152 = vst [vmem:[#allocation116_spill] sm:$0xff] %v9204_v37 }
 0x206   : > { %v5540_v16 = vrot.slane %v5538_v23, 4  ;;  %v5535_v0 = vrot.slane %v5534_v22, 4  ;;  %v5553_v24 = vrot.slane %v5551_v14, 5  ;;  %v10151_v35 = vshrl.u32 %v8606_v30, 16  ;;  %6282 = vrot.lane.b32.xlu1 %v6193_v33, %s7350_s25  ;;  %6280 = vrot.lane.b32.xlu0 %v6192_v60, %s7350_s25 }
 0x207   : > { %v5548_v34 = vor.u32 %v5547_v45, %v5544_v4  ;;  %v5047_v57 = vsel %vm7488_vm10, %v5045_v27, %v5046_v44  ;;  %v5556_v12 = vrot.slane %v5554_v26, 6  ;;  %v5565_v19 = vshrl.u32 %v5424_v3, 16  ;;  %v4955_v44 = vld [vmem:[#allocation2 + $0x6c] sm:$0xe]  ;;  %v9214_v27 = vpop.f32.mrf.mxu1  ;;  %v7319_v26 = vld [vmem:[#allocation2 + $0x68] sm:$0x1] }
 0x208   : > { %v5559_v38 = vrot.slane %v10151_v35, 5  ;;  %v5568_v63 = vshll.u32 %v5424_v3, 16  ;;  %v5539_v49 = vsel %vm7742_vm2, %v5535_v0, %v5538_v23  ;;  %v6722_v22 = vcombine.low %v5044_v39, %v5047_v57  ;;  %v6195_v3 = vld [vmem:[%s8933_s24 + $0xd8] sm:$0xff]  ;;  %v7320_v39 = vld [vmem:[#allocation2 + $0x64] sm:$0xf]  ;;  %v9220_v0 = vpop.f32.mrf.mxu0 }
 0x209   : > { %v5549_v4 = vsel %vm7742_vm2, %v5540_v16, %v5548_v34  ;;  %v5557_v14 = vor.u32 %v5556_v12, %v5553_v24  ;;  %v5567_v35 = vrot.slane %v5565_v19, 5  ;;  %v5053_v23 = vrot.slane %v7319_v26, 5  ;;  %10153 = vst [vmem:[#allocation117_spill] sm:$0xff] %v9220_v0  ;;  %v6194_v34 = vld [vmem:[%s8933_s24 + $0xd0] sm:$0xff] }
 0x20a   : > { %v5561_v45 = vor.u32 %v5560_v52, %v5559_v38  ;;  %v6755_v30 = vcombine.low %v5539_v49, %v5549_v4  ;;  %v5570_v37 = vrot.slane %v5568_v63, 6  ;;  %7190 = vmatprep.mubr.msk.bf16.mxu1 %vm1193_vm5, %v6722_v22  ;;  %v6706_v52 = vrot.slane %v9183_v5, 9  ;;  %v5425_v12 = vld [vmem:[#allocation2 + $0x74] sm:$0x3]  ;;  %6286 = vrot.lane.b32.xlu1 %v6195_v3, %s7350_s25 }
 0x20b   : > { %v5050_v33 = vrot.slane %v7320_v39, 5  ;;  %v5558_v63 = vrot.slane %v5557_v14, 4  ;;  %v10154_v24 = vshll.u32 %v8672_v10, 16  ;;  %v5574_v5 = vshrl.u32 %v4955_v44, 16  ;;  %v9235_v14 = vpop.f32.mrf.mxu1  ;;  %6284 = vrot.lane.b32.xlu0 %v6194_v34, %s7350_s25 }
 0x20c   : > { %v5563_v16 = vrot.slane %v5561_v45, 4  ;;  %7224 = vmatprep.mubr.msk.bf16.mxu0 %vm1193_vm5, %v6755_v30  ;;  %v5571_v19 = vor.u32 %v5570_v37, %v5567_v35  ;;  %v5577_v22 = vshll.u32 %v4955_v44, 16  ;;  %v10155_v37 = vshrl.u32 %v8638_v20, 16  ;;  %10156 = vst [vmem:[#allocation118_spill] sm:$0xff] %v9235_v14  ;;  %v6197_v35 = vld [vmem:[%s8933_s24 + $0xe8] sm:$0xff] }
 0x20d   : > { %v5606_v38 = vrot.slane %v10154_v24, 6  ;;  %v5051_v60 = vsel %vm7488_vm10, %v6706_v52, %v5050_v33  ;;  %v5052_v57 = vrot.slane %v5050_v33, 4  ;;  %v5562_v49 = vsel %vm7742_vm2, %v5558_v63, %v5561_v45  ;;  %v9243_v33 = vld [vmem:[#allocation2 + $0x78] sm:$0xe]  ;;  %v6196_v63 = vld [vmem:[%s8933_s24 + $0xe0] sm:$0xff] }
 0x20e   : > { %v5572_v4 = vsel %vm7742_vm2, %v5563_v16, %v5571_v19  ;;  %v5582_v30 = vrot.slane %v10155_v37, 5  ;;  %v5576_v3 = vrot.slane %v5574_v5, 5  ;;  %v10157_v39 = vshll.u32 %v8638_v20, 16  ;;  %v9245_v16 = vpop.f32.mrf.mxu0  ;;  %6290 = vrot.lane.b32.xlu1 %v6197_v35, %s7350_s25 }
 0x20f   : > { %v6756_v26 = vcombine.low %v5562_v49, %v5572_v4  ;;  %v5054_v52 = vsel %vm7488_vm10, %v5052_v57, %v5053_v23  ;;  %10158 = vst [vmem:[#allocation119_spill] sm:$0xff] %v9245_v16  ;;  %v5579_v24 = vrot.slane %v5577_v22, 6  ;;  %v5588_v37 = vshrl.u32 %v5425_v12, 16  ;;  %v7321_v4 = vld [vmem:[#allocation2 + $0x70] sm:$0xf]  ;;  %6288 = vrot.lane.b32.xlu0 %v6196_v63, %s7350_s25 }
 0x210   : > { %v5583_v45 = vrot.slane %v10157_v39, 6  ;;  %v6723_v19 = vcombine.low %v5051_v60, %v5054_v52  ;;  %v5591_v0 = vshll.u32 %v5425_v12, 16  ;;  %v6707_v49 = vrot.slane %v4955_v44, 9  ;;  %v7322_v57 = vld [vmem:[#allocation2 + $0x74] sm:$0x1]  ;;  %v9252_v52 = vpop.f32.mrf.mxu1  ;;  %v6199_v44 = vld [vmem:[%s8933_s24 + $0xf8] sm:$0xff] }
 0x211   : > { %7225 = vmatmul.mubr.msk.bf16.gmra.mxu0 %vm1193_vm5, %v6756_v26  ;;  %v5057_v23 = vrot.slane %v7321_v4, 5  ;;  %v5060_v5 = vrot.slane %v7322_v57, 5  ;;  %v5580_v20 = vor.u32 %v5579_v24, %v5576_v3  ;;  %v5590_v39 = vrot.slane %v5588_v37, 5  ;;  %v5426_v22 = vld [vmem:[#allocation2 + $0x80] sm:$0x3]  ;;  %10159 = vst [vmem:[#allocation120_spill] sm:$0xff] %v9252_v52  ;;  %v9259_v4 = vpop.f32.mrf.mxu0 }
 0x212   : > { %v5584_v34 = vor.u32 %v5583_v45, %v5582_v30  ;;  %7191 = vmatmul.mubr.msk.bf16.gmra.mxu1 %vm1193_vm5, %v6723_v19  ;;  %v5593_v60 = vrot.slane %v5591_v0, 6  ;;  %v5597_v12 = vshrl.u32 %v9243_v33, 16  ;;  %v5600_v35 = vshll.u32 %v9243_v33, 16  ;;  %10160 = vst [vmem:[#allocation121_spill] sm:$0xff] %v9259_v4  ;;  %v6198_v3 = vld [vmem:[%s8933_s24 + $0xf0] sm:$0xff]  ;;  %6294 = vrot.lane.b32.xlu1 %v6199_v44, %s7350_s25 }
 0x213   : > { %v5058_v26 = vsel %vm7488_vm10, %v6707_v49, %v5057_v23  ;;  %v5059_v45 = vrot.slane %v5057_v23, 4  ;;  %v5581_v19 = vrot.slane %v5580_v20, 4  ;;  %v10161_v37 = vshrl.u32 %v8672_v10, 16  ;;  %6292 = vrot.lane.b32.xlu0 %v6198_v3, %s7350_s25  ;;  %v7323_v44 = vld [vmem:[#allocation2 + $0x80] sm:$0x1] }
 0x214   : > { %v5586_v30 = vrot.slane %v5584_v34, 4  ;;  %v5594_v0 = vor.u32 %v5593_v60, %v5590_v39  ;;  %v5599_v24 = vrot.slane %v5597_v12, 5  ;;  %v5602_v16 = vrot.slane %v5600_v35, 6  ;;  %v9271_v60 = vpop.f32.mrf.mxu1  ;;  %v4957_v35 = vld [vmem:[#allocation2 + $0x84] sm:$0xe] }
 0x215   : > { %v5605_v57 = vrot.slane %v10161_v37, 5  ;;  %v5061_v63 = vsel %vm7488_vm10, %v5059_v45, %v5060_v5  ;;  %v5611_v52 = vshrl.u32 %v5426_v22, 16  ;;  %v5614_v14 = vshll.u32 %v5426_v22, 16  ;;  %v9274_v22 = vpop.f32.mrf.mxu0 }
 0x216   : > { %v5585_v49 = vsel %vm7742_vm2, %v5581_v19, %v5584_v34  ;;  %v5595_v23 = vsel %vm7742_vm2, %v5586_v30, %v5594_v0  ;;  %v6724_v20 = vcombine.low %v5058_v26, %v5061_v63  ;;  %v5603_v12 = vor.u32 %v5602_v16, %v5599_v24  ;;  %10162 = vst [vmem:[#allocation122_spill] sm:$0xff] %v9274_v22  ;;  %v7324_v26 = vld [vmem:[#allocation2 + $0x7c] sm:$0xf]  ;;  %v5427_v24 = vld [vmem:[#allocation2 + $0x8c] sm:$0x3]  ;;  %v9283_v63 = vpop.f32.mrf.mxu1 }
 0x217   : > { %v5607_v39 = vor.u32 %v5606_v38, %v5605_v57  ;;  %v6757_v10 = vcombine.low %v5585_v49, %v5595_v23  ;;  %v5613_v5 = vrot.slane %v5611_v52, 5  ;;  %v5616_v45 = vrot.slane %v5614_v14, 6 }
 0x218   : > { %v5067_v37 = vrot.slane %v7323_v44, 5  ;;  %7194 = vmatprep.mubr.msk.bf16.mxu1 %vm1193_vm5, %v6724_v20  ;;  %v6708_v30 = vrot.slane %v9243_v33, 9  ;;  %v5064_v38 = vrot.slane %v7324_v26, 5  ;;  %v5604_v19 = vrot.slane %v5603_v12, 4  ;;  %v9291_v12 = vpop.f32.mrf.mxu0 }
 0x219   : > { %v5609_v34 = vrot.slane %v5607_v39, 4  ;;  %7228 = vmatprep.mubr.msk.bf16.mxu0 %vm1193_vm5, %v6757_v10  ;;  %v5617_v3 = vor.u32 %v5616_v45, %v5613_v5  ;;  %v10163_v16 = vshll.u32 %v8740_v29, 16  ;;  %v5620_v57 = vshrl.u32 %v4957_v35, 16  ;;  %10165 = vst [vmem:[#allocation123_spill] sm:$0xff] %v9291_v12  ;;  %v7326_v12 = vld [vmem:[#allocation2 + $0x8c] sm:$0x1] }
 0x21a   : > { %v5065_v14 = vsel %vm7488_vm10, %v6708_v30, %v5064_v38  ;;  %v5066_v0 = vrot.slane %v5064_v38, 4  ;;  %v5608_v33 = vsel %vm7742_vm2, %v5604_v19, %v5607_v39  ;;  %v5623_v23 = vshll.u32 %v4957_v35, 16  ;;  %v4958_v38 = vld [vmem:[#allocation2 + $0x90] sm:$0xe] }
 0x21b   : > { %v5652_v52 = vrot.slane %v10163_v16, 6  ;;  %v5618_v49 = vsel %vm7742_vm2, %v5609_v34, %v5617_v3  ;;  %v10164_v20 = vshrl.u32 %v8704_v2, 16  ;;  %v5622_v44 = vrot.slane %v5620_v57, 5  ;;  %v5428_v57 = vld [vmem:[#allocation2 + $0x98] sm:$0x3] }
 0x21c   : > { %v6758_v5 = vcombine.low %v5608_v33, %v5618_v49  ;;  %v5068_v45 = vsel %vm7488_vm10, %v5066_v0, %v5067_v37  ;;  %v10166_v30 = vshll.u32 %v8704_v2, 16  ;;  %v5625_v39 = vrot.slane %v5623_v23, 6  ;;  %v9298_v49 = vpop.f32.mrf.mxu1  ;;  %v9301_v23 = vpop.f32.mrf.mxu0 }
 0x21d   : > { %v5628_v10 = vrot.slane %v10164_v20, 5  ;;  %v6725_v16 = vcombine.low %v5065_v14, %v5068_v45  ;;  %v5634_v19 = vshrl.u32 %v5427_v24, 16  ;;  %v5637_v22 = vshll.u32 %v5427_v24, 16  ;;  %v7325_v20 = vld [vmem:[#allocation2 + $0x88] sm:$0xf]  ;;  %10167 = vst [vmem:[#allocation124_spill] sm:$0xff] %v9298_v49 }
 0x21e   : > { %v5629_v26 = vrot.slane %v10166_v30, 6  ;;  %7229 = vmatmul.mubr.msk.bf16.gmra.mxu0 %vm1193_vm5, %v6758_v5  ;;  %v6709_v3 = vrot.slane %v4957_v35, 9  ;;  %v5071_v4 = vrot.slane %v7325_v20, 5  ;;  %v5074_v33 = vrot.slane %v7326_v12, 5  ;;  %10168 = vst [vmem:[#allocation125_spill] sm:$0xff] %v9301_v23 }
 0x21f   : > { %7195 = vmatmul.mubr.msk.bf16.gmra.mxu1 %vm1193_vm5, %v6725_v16  ;;  %v5626_v37 = vor.u32 %v5625_v39, %v5622_v44  ;;  %v5636_v2 = vrot.slane %v5634_v19, 5  ;;  %v5639_v0 = vrot.slane %v5637_v22, 6  ;;  %v5643_v14 = vshrl.u32 %v4958_v38, 16  ;;  %v9309_v19 = vpop.f32.mrf.mxu1  ;;  %v7328_v49 = vld [vmem:[#allocation2 + $0x94] sm:$0xf] }
 0x220   : > { %v5630_v34 = vor.u32 %v5629_v26, %v5628_v10  ;;  %v5072_v10 = vsel %vm7488_vm10, %v6709_v3, %v5071_v4  ;;  %v5073_v35 = vrot.slane %v5071_v4, 4  ;;  %v5646_v5 = vshll.u32 %v4958_v38, 16  ;;  %10170 = vst [vmem:[#allocation126_spill] sm:$0xff] %v9309_v19 }
 0x221   : > { %v5627_v45 = vrot.slane %v5626_v37, 4  ;;  %v5640_v30 = vor.u32 %v5639_v0, %v5636_v2  ;;  %v5645_v12 = vrot.slane %v5643_v14, 5  ;;  %v10169_v26 = vshrl.u32 %v8740_v29, 16  ;;  %v9315_v2 = vpop.f32.mrf.mxu0 }
 0x222   : > { %v5632_v24 = vrot.slane %v5630_v34, 4  ;;  %v5075_v44 = vsel %vm7488_vm10, %v5073_v35, %v5074_v33  ;;  %v5648_v22 = vrot.slane %v5646_v5, 6  ;;  %v5657_v16 = vshrl.u32 %v5428_v57, 16  ;;  %10171 = vst [vmem:[#allocation127_spill] sm:$0xff] %v9315_v2  ;;  %v4959_v33 = vld [vmem:[#allocation2 + $0x9c] sm:$0xe] }
 0x223   : > { %v5651_v20 = vrot.slane %v10169_v26, 5  ;;  %v5660_v39 = vshll.u32 %v5428_v57, 16  ;;  %v5631_v23 = vsel %vm7742_vm2, %v5627_v45, %v5630_v34  ;;  %v6726_v3 = vcombine.low %v5072_v10, %v5075_v44  ;;  %v7327_v35 = vld [vmem:[#allocation2 + $0x98] sm:$0x1]  ;;  %v4961_v2 = vld [vmem:[#allocation2 + $0xb4] sm:$0xe] }
 0x224   : > { %v5641_v4 = vsel %vm7742_vm2, %v5632_v24, %v5640_v30  ;;  %v5649_v0 = vor.u32 %v5648_v22, %v5645_v12  ;;  %v5659_v14 = vrot.slane %v5657_v16, 5  ;;  %v5081_v5 = vrot.slane %v7327_v35, 5  ;;  %v9325_v22 = vpop.f32.mrf.mxu0 }
 0x225   : > { %v5653_v37 = vor.u32 %v5652_v52, %v5651_v20  ;;  %v6759_v29 = vcombine.low %v5631_v23, %v5641_v4  ;;  %v5662_v26 = vrot.slane %v5660_v39, 6  ;;  %7198 = vmatprep.mubr.msk.bf16.mxu1 %vm1193_vm5, %v6726_v3  ;;  %v6710_v19 = vrot.slane %v4958_v38, 9  ;;  %v9319_v52 = vpop.f32.mrf.mxu1  ;;  %v5429_v20 = vld [vmem:[#allocation2 + $0xa4] sm:$0x3]  ;;  %10174 = vst [vmem:[#allocation129_spill] sm:$0xff] %v9325_v22 }
 0x226   : > { %v5078_v34 = vrot.slane %v7328_v49, 5  ;;  %v5650_v24 = vrot.slane %v5649_v0, 4  ;;  %10172 = vst [vmem:[#allocation128_spill] sm:$0xff] %v9319_v52  ;;  %v10173_v23 = vshll.u32 %v8804_v17, 16  ;;  %v5666_v44 = vshrl.u32 %v4959_v33, 16 }
 0x227   : > { %v5655_v57 = vrot.slane %v5653_v37, 4  ;;  %7232 = vmatprep.mubr.msk.bf16.mxu0 %vm1193_vm5, %v6759_v29  ;;  %v5663_v10 = vor.u32 %v5662_v26, %v5659_v14  ;;  %v5669_v16 = vshll.u32 %v4959_v33, 16  ;;  %v10175_v39 = vshrl.u32 %v8770_v9, 16  ;;  %v4960_v26 = vld [vmem:[#allocation2 + $0xa8] sm:$0xe] }
 0x228   : > { %v5698_v45 = vrot.slane %v10173_v23, 6  ;;  %v5079_v30 = vsel %vm7488_vm10, %v6710_v19, %v5078_v34  ;;  %v5080_v12 = vrot.slane %v5078_v34, 4  ;;  %v5654_v38 = vsel %vm7742_vm2, %v5650_v24, %v5653_v37  ;;  %v9337_v24 = vpop.f32.mrf.mxu1 }
 0x229   : > { %v5664_v49 = vsel %vm7742_vm2, %v5655_v57, %v5663_v10  ;;  %v5674_v4 = vrot.slane %v10175_v39, 5  ;;  %v5668_v19 = vrot.slane %v5666_v44, 5  ;;  %v10176_v0 = vshll.u32 %v8770_v9, 16  ;;  %10177 = vst [vmem:[#allocation130_spill] sm:$0xff] %v9337_v24  ;;  %v7329_v39 = vld [vmem:[#allocation2 + $0xa0] sm:$0xf] }
 0x22a   : > { %v6760_v3 = vcombine.low %v5654_v38, %v5664_v49  ;;  %v5082_v29 = vsel %vm7488_vm10, %v5080_v12, %v5081_v5  ;;  %v5671_v34 = vrot.slane %v5669_v16, 6  ;;  %v5680_v23 = vshrl.u32 %v5429_v20, 16  ;;  %v7330_v49 = vld [vmem:[#allocation2 + $0xa4] sm:$0x1]  ;;  %v9340_v5 = vpop.f32.mrf.mxu0  ;;  %v5430_v44 = vld [vmem:[#allocation2 + $0xb0] sm:$0x3] }
 0x22b   : > { %v5675_v14 = vrot.slane %v10176_v0, 6  ;;  %v6727_v35 = vcombine.low %v5079_v30, %v5082_v29  ;;  %v5683_v37 = vshll.u32 %v5429_v20, 16  ;;  %v6711_v10 = vrot.slane %v4959_v33, 9  ;;  %10178 = vst [vmem:[#allocation131_spill] sm:$0xff] %v9340_v5  ;;  %v9347_v5 = vpop.f32.mrf.mxu1 }
 0x22c   : > { %7233 = vmatmul.mubr.msk.bf16.gmra.mxu0 %vm1193_vm5, %v6760_v3  ;;  %v5085_v38 = vrot.slane %v7329_v39, 5  ;;  %v5088_v22 = vrot.slane %v7330_v49, 5  ;;  %v5672_v9 = vor.u32 %v5671_v34, %v5668_v19  ;;  %v5682_v12 = vrot.slane %v5680_v23, 5  ;;  %10180 = vst [vmem:[#allocation132_spill] sm:$0xff] %v9347_v5  ;;  %v7331_v5 = vld [vmem:[#allocation2 + $0xb0] sm:$0x1] }
 0x22d   : > { %v5676_v57 = vor.u32 %v5675_v14, %v5674_v4  ;;  %7199 = vmatmul.mubr.msk.bf16.gmra.mxu1 %vm1193_vm5, %v6727_v35  ;;  %v5685_v30 = vrot.slane %v5683_v37, 6  ;;  %v5689_v16 = vshrl.u32 %v4960_v26, 16  ;;  %v5692_v4 = vshll.u32 %v4960_v26, 16  ;;  %v9351_v37 = vpop.f32.mrf.mxu0  ;;  %v9358_v52 = vpop.f32.mrf.mxu1 }
 0x22e   : > { %v5086_v29 = vsel %vm7488_vm10, %v6711_v10, %v5085_v38  ;;  %v5087_v3 = vrot.slane %v5085_v38, 4  ;;  %v5673_v33 = vrot.slane %v5672_v9, 4  ;;  %v10179_v39 = vshrl.u32 %v8804_v17, 16 }
 0x22f   : > { %v5678_v20 = vrot.slane %v5676_v57, 4  ;;  %v5686_v0 = vor.u32 %v5685_v30, %v5682_v12  ;;  %v5691_v14 = vrot.slane %v5689_v16, 5  ;;  %v5694_v35 = vrot.slane %v5692_v4, 6  ;;  %v7332_v4 = vld [vmem:[#allocation2 + $0xac] sm:$0xf] }
 0x230   : > { %v5697_v49 = vrot.slane %v10179_v39, 5  ;;  %v5089_v19 = vsel %vm7488_vm10, %v5087_v3, %v5088_v22  ;;  %v5703_v34 = vshrl.u32 %v5430_v44, 16  ;;  %v5706_v23 = vshll.u32 %v5430_v44, 16 }
 0x231   : > { %v5677_v10 = vsel %vm7742_vm2, %v5673_v33, %v5676_v57  ;;  %v5687_v38 = vsel %vm7742_vm2, %v5678_v20, %v5686_v0  ;;  %v6728_v9 = vcombine.low %v5086_v29, %v5089_v19  ;;  %v5695_v30 = vor.u32 %v5694_v35, %v5691_v14  ;;  %v5431_v14 = vld [vmem:[#allocation2 + $0xbc] sm:$0x3] }
 0x232   : > { %v5699_v12 = vor.u32 %v5698_v45, %v5697_v49  ;;  %v6761_v17 = vcombine.low %v5677_v10, %v5687_v38  ;;  %v5705_v16 = vrot.slane %v5703_v34, 5  ;;  %v5708_v39 = vrot.slane %v5706_v23, 6  ;;  %v9361_v45 = vpop.f32.mrf.mxu0 }
 0x233   : > { %v5095_v22 = vrot.slane %v7331_v5, 5  ;;  %7202 = vmatprep.mubr.msk.bf16.mxu1 %vm1193_vm5, %v6728_v9  ;;  %v6712_v3 = vrot.slane %v4960_v26, 9  ;;  %v5092_v24 = vrot.slane %v7332_v4, 5  ;;  %v5696_v57 = vrot.slane %v5695_v30, 4  ;;  %10181 = vst [vmem:[#allocation133_spill] sm:$0xff] %v9361_v45 }
 0x234   : > { %v5701_v44 = vrot.slane %v5699_v12, 4  ;;  %7236 = vmatprep.mubr.msk.bf16.mxu0 %vm1193_vm5, %v6761_v17  ;;  %v5709_v20 = vor.u32 %v5708_v39, %v5705_v16  ;;  %v10182_v29 = vshll.u32 %v8872_v55, 16  ;;  %v5712_v49 = vshrl.u32 %v4961_v2, 16  ;;  %v4962_v30 = vld [vmem:[#allocation2 + $0xc0] sm:$0xe]  ;;  %v9377_v16 = vpop.f32.mrf.mxu1 }
 0x235   : > { %v5093_v5 = vsel %vm7488_vm10, %v6712_v3, %v5092_v24  ;;  %v5094_v0 = vrot.slane %v5092_v24, 4  ;;  %v5700_v26 = vsel %vm7742_vm2, %v5696_v57, %v5699_v12  ;;  %v5715_v35 = vshll.u32 %v4961_v2, 16  ;;  %v7335_v45 = vld [vmem:[#allocation2 + $0xc8] sm:$0x1] }
 0x236   : > { %v5744_v33 = vrot.slane %v10182_v29, 6  ;;  %v5710_v19 = vsel %vm7742_vm2, %v5701_v44, %v5709_v20  ;;  %v10183_v34 = vshrl.u32 %v8838_v31, 16  ;;  %v5714_v9 = vrot.slane %v5712_v49, 5  ;;  %v9379_v44 = vpop.f32.mrf.mxu0  ;;  %v7333_v29 = vld [vmem:[#allocation2 + $0xb8] sm:$0xf] }
 0x237   : > { %v6762_v10 = vcombine.low %v5700_v26, %v5710_v19  ;;  %v5096_v38 = vsel %vm7488_vm10, %v5094_v0, %v5095_v22  ;;  %v10184_v17 = vshll.u32 %v8838_v31, 16  ;;  %v5717_v12 = vrot.slane %v5715_v35, 6  ;;  %10185 = vst [vmem:[#allocation134_spill] sm:$0xff] %v9379_v44  ;;  %v7334_v22 = vld [vmem:[#allocation2 + $0xbc] sm:$0x1] }
 0x238   : > { %v5720_v23 = vrot.slane %v10183_v34, 5  ;;  %v6729_v39 = vcombine.low %v5093_v5, %v5096_v38  ;;  %v5726_v3 = vshrl.u32 %v5431_v14, 16  ;;  %v5729_v4 = vshll.u32 %v5431_v14, 16  ;;  %v5432_v34 = vld [vmem:[#allocation2 + $0xc8] sm:$0x3] }
 0x239   : > { %v5721_v24 = vrot.slane %v10184_v17, 6  ;;  %7237 = vmatmul.mubr.msk.bf16.gmra.mxu0 %vm1193_vm5, %v6762_v10  ;;  %v6713_v20 = vrot.slane %v4961_v2, 9  ;;  %v5099_v26 = vrot.slane %v7333_v29, 5  ;;  %v5102_v0 = vrot.slane %v7334_v22, 5  ;;  %v9385_v10 = vpop.f32.mrf.mxu1  ;;  %v4963_v44 = vld [vmem:[#allocation2 + $0xcc] sm:$0xe] }
 0x23a   : > { %7203 = vmatmul.mubr.msk.bf16.gmra.mxu1 %vm1193_vm5, %v6729_v39  ;;  %v5718_v31 = vor.u32 %v5717_v12, %v5714_v9  ;;  %v5728_v49 = vrot.slane %v5726_v3, 5  ;;  %v5731_v19 = vrot.slane %v5729_v4, 6  ;;  %v5735_v5 = vshrl.u32 %v4962_v30, 16  ;;  %v9389_v39 = vpop.f32.mrf.mxu0 }
 0x23b   : > { %v5722_v57 = vor.u32 %v5721_v24, %v5720_v23  ;;  %v5100_v14 = vsel %vm7488_vm10, %v6713_v20, %v5099_v26  ;;  %v5101_v38 = vrot.slane %v5099_v26, 4  ;;  %v5738_v17 = vshll.u32 %v4962_v30, 16  ;;  %10187 = vst [vmem:[#allocation135_spill] sm:$0xff] %v9389_v39  ;;  %v9397_v39 = vpop.f32.mrf.mxu1 }
 0x23c   : > { %v5719_v2 = vrot.slane %v5718_v31, 4  ;;  %v5732_v23 = vor.u32 %v5731_v19, %v5728_v49  ;;  %v5737_v24 = vrot.slane %v5735_v5, 5  ;;  %v10186_v29 = vshrl.u32 %v8872_v55, 16  ;;  %10188 = vst [vmem:[#allocation136_spill] sm:$0xff] %v9397_v39 }
 0x23d   : > { %v5724_v35 = vrot.slane %v5722_v57, 4  ;;  %v5103_v9 = vsel %vm7488_vm10, %v5101_v38, %v5102_v0  ;;  %v5740_v12 = vrot.slane %v5738_v17, 6  ;;  %v5749_v3 = vshrl.u32 %v5432_v34, 16  ;;  %v7336_v17 = vld [vmem:[#allocation2 + $0xc4] sm:$0xf] }
 0x23e   : > { %v5743_v22 = vrot.slane %v10186_v29, 5  ;;  %v5752_v4 = vshll.u32 %v5432_v34, 16  ;;  %v5723_v20 = vsel %vm7742_vm2, %v5719_v2, %v5722_v57  ;;  %v6730_v31 = vcombine.low %v5100_v14, %v5103_v9  ;;  %v9400_v2 = vpop.f32.mrf.mxu0 }
 0x23f   : > { %v5733_v26 = vsel %vm7742_vm2, %v5724_v35, %v5732_v23  ;;  %v5741_v5 = vor.u32 %v5740_v12, %v5737_v24  ;;  %v5751_v55 = vrot.slane %v5749_v3, 5  ;;  %v5109_v0 = vrot.slane %v7335_v45, 5  ;;  %10189 = vst [vmem:[#allocation137_spill] sm:$0xff] %v9400_v2  ;;  %v5433_v45 = vld [vmem:[#allocation2 + $0xd4] sm:$0x3] }
 0x240   : > { %v5745_v49 = vor.u32 %v5744_v33, %v5743_v22  ;;  %v6763_v19 = vcombine.low %v5723_v20, %v5733_v26  ;;  %v5754_v29 = vrot.slane %v5752_v4, 6  ;;  %7206 = vmatprep.mubr.msk.bf16.mxu1 %vm1193_vm5, %v6730_v31  ;;  %v6714_v38 = vrot.slane %v4962_v30, 9  ;;  %v9413_v26 = vpop.f32.mrf.mxu1 }
 0x241   : > { %v5106_v57 = vrot.slane %v7336_v17, 5  ;;  %v5742_v33 = vrot.slane %v5741_v5, 4  ;;  %v10190_v14 = vshll.u32 %v8959_v56, 16  ;;  %v5758_v9 = vshrl.u32 %v4963_v44, 16  ;;  %10192 = vst [vmem:[#allocation138_spill] sm:$0xff] %v9413_v26  ;;  %v9419_v17 = vpop.f32.mrf.mxu0 }
 0x242   : > { %v5747_v34 = vrot.slane %v5745_v49, 4  ;;  %7240 = vmatprep.mubr.msk.bf16.mxu0 %vm1193_vm5, %v6763_v19  ;;  %v5755_v35 = vor.u32 %v5754_v29, %v5751_v55  ;;  %v5761_v3 = vshll.u32 %v4963_v44, 16  ;;  %v10191_v4 = vshrl.u32 %v8902_v36, 16  ;;  %v9423_v26 = vpop.f32.mrf.mxu1 }
 0x243   : > { %v5790_v23 = vrot.slane %v10190_v14, 6  ;;  %v5107_v24 = vsel %vm7488_vm10, %v6714_v38, %v5106_v57  ;;  %v5108_v22 = vrot.slane %v5106_v57, 4  ;;  %v5746_v30 = vsel %vm7742_vm2, %v5742_v33, %v5745_v49  ;;  %v4964_v38 = vld [vmem:[#allocation2 + $0xd8] sm:$0xe] }
 0x244   : > { %v5756_v12 = vsel %vm7742_vm2, %v5747_v34, %v5755_v35  ;;  %v5766_v20 = vrot.slane %v10191_v4, 5  ;;  %v5760_v5 = vrot.slane %v5758_v9, 5  ;;  %v10193_v55 = vshll.u32 %v8902_v36, 16  ;;  %v7337_v4 = vld [vmem:[#allocation2 + $0xd0] sm:$0xf] }
 0x245   : > { %v6764_v31 = vcombine.low %v5746_v30, %v5756_v12  ;;  %v5110_v19 = vsel %vm7488_vm10, %v5108_v22, %v5109_v0  ;;  %v5763_v57 = vrot.slane %v5761_v3, 6  ;;  %v5772_v34 = vshrl.u32 %v5433_v45, 16  ;;  %v7338_v12 = vld [vmem:[#allocation2 + $0xd4] sm:$0x1]  ;;  %v5434_v9 = vld [vmem:[#allocation2 + $0xe0] sm:$0x3] }
 0x246   : > { %v5767_v29 = vrot.slane %v10193_v55, 6  ;;  %v6731_v49 = vcombine.low %v5107_v24, %v5110_v19  ;;  %v5775_v33 = vshll.u32 %v5433_v45, 16  ;;  %v6715_v14 = vrot.slane %v4963_v44, 9  ;;  %v9427_v44 = vpop.f32.mrf.mxu0 }
 0x247   : > { %7241 = vmatmul.mubr.msk.bf16.gmra.mxu0 %vm1193_vm5, %v6764_v31  ;;  %v5113_v30 = vrot.slane %v7337_v4, 5  ;;  %v5116_v2 = vrot.slane %v7338_v12, 5  ;;  %v5764_v0 = vor.u32 %v5763_v57, %v5760_v5  ;;  %v5774_v36 = vrot.slane %v5772_v34, 5 }
 0x248   : > { %v5768_v35 = vor.u32 %v5767_v29, %v5766_v20  ;;  %7207 = vmatmul.mubr.msk.bf16.gmra.mxu1 %vm1193_vm5, %v6731_v49  ;;  %v5777_v22 = vrot.slane %v5775_v33, 6  ;;  %v5781_v55 = vshrl.u32 %v4964_v38, 16  ;;  %v5784_v20 = vshll.u32 %v4964_v38, 16 }
 0x249   : > { %v5114_v45 = vsel %vm7488_vm10, %v6715_v14, %v5113_v30  ;;  %v5115_v3 = vrot.slane %v5113_v30, 4  ;;  %v5765_v31 = vrot.slane %v5764_v0, 4  ;;  %v10194_v49 = vshrl.u32 %v8959_v56, 16  ;;  %v9437_v0 = vpop.f32.mrf.mxu1 }
 0x24a   : > { %v5770_v24 = vrot.slane %v5768_v35, 4  ;;  %v5778_v19 = vor.u32 %v5777_v22, %v5774_v36  ;;  %v5783_v29 = vrot.slane %v5781_v55, 5  ;;  %v5786_v34 = vrot.slane %v5784_v20, 6 }
 0x24b   : > { %v5789_v5 = vrot.slane %v10194_v49, 5  ;;  %v5117_v57 = vsel %vm7488_vm10, %v5115_v3, %v5116_v2  ;;  %v5795_v33 = vshrl.u32 %v5434_v9, 16  ;;  %v5798_v4 = vshll.u32 %v5434_v9, 16  ;;  %v9439_v49 = vpop.f32.mrf.mxu0  ;;  %v7339_v2 = vld [vmem:[#allocation2 + $0xe0] sm:$0x1] }
 0x24c   : > { %v5769_v12 = vsel %vm7742_vm2, %v5765_v31, %v5768_v35  ;;  %v5779_v14 = vsel %vm7742_vm2, %v5770_v24, %v5778_v19  ;;  %v6732_v30 = vcombine.low %v5114_v45, %v5117_v57  ;;  %v5787_v22 = vor.u32 %v5786_v34, %v5783_v29  ;;  %v7340_v35 = vld [vmem:[#allocation2 + $0xdc] sm:$0xf]  ;;  %v9445_v29 = vpop.f32.mrf.mxu1 }
 0x24d   : > { %v5791_v39 = vor.u32 %v5790_v23, %v5789_v5  ;;  %v6765_v36 = vcombine.low %v5769_v12, %v5779_v14  ;;  %v5797_v56 = vrot.slane %v5795_v33, 5  ;;  %v5800_v55 = vrot.slane %v5798_v4, 6  ;;  %v9451_v34 = vpop.f32.mrf.mxu0 }
 0x24e   : > { %v5123_v3 = vrot.slane %v7339_v2, 5  ;;  %7210 = vmatprep.mubr.msk.bf16.mxu1 %vm1193_vm5, %v6732_v30  ;;  %v6716_v20 = vrot.slane %v4964_v38, 9  ;;  %v5120_v31 = vrot.slane %v7340_v35, 5  ;;  %v5788_v24 = vrot.slane %v5787_v22, 4  ;;  %v4082_v12 = vpop.f32.mrf.mxu1 }
 0x24f   : > { %v5793_v9 = vrot.slane %v5791_v39, 4  ;;  %7244 = vmatprep.mubr.msk.bf16.mxu0 %vm1193_vm5, %v6765_v36  ;;  %v5801_v23 = vor.u32 %v5800_v55, %v5797_v56  ;;  %v9457_v14 = vpop.f32.mrf.mxu0  ;;  %v1565_v25 = vadd.f32 %v8614_v21, %v8401_v1  ;;  %v1557_v18 = vadd.f32 %v8625_v32, %v8419_v42  ;;  %v10195_v42 = vld [vmem:[#allocation19_spill] sm:$0xff]  ;;  %v10196_v32 = vld [vmem:[#allocation44_spill] sm:$0xff] }
 0x250   : > { %v5121_v45 = vsel %vm7488_vm10, %v6716_v20, %v5120_v31  ;;  %v5122_v19 = vrot.slane %v5120_v31, 4  ;;  %v5792_v5 = vsel %vm7742_vm2, %v5788_v24, %v5791_v39  ;;  %v7124_v30 = vpop.f32.mrf.mxu1  ;;  %v1568_v22 = vadd.f32 %v8640_v41, %v8437_v58  ;;  %v10197_v41 = vld [vmem:[#allocation21_spill] sm:$0xff]  ;;  %v10200_v20 = vld [vmem:[#allocation48_spill] sm:$0xff]  ;;  %v10201_v31 = vld [vmem:[#allocation35_spill] sm:$0xff] }
 0x251   : > { %v5802_v57 = vsel %vm7742_vm2, %v5793_v9, %v5801_v23  ;;  %v9459_v36 = vpop.f32.mrf.mxu0  ;;  %v1560_v56 = vadd.f32 %v8650_v62, %v8450_v28  ;;  %v1581_v2 = vadd.f32 %v8666_v59, %v8461_v7  ;;  %v1584_v21 = vadd.f32 %v8682_v40, %v8487_v43  ;;  %v10198_v9 = vld [vmem:[#allocation46_spill] sm:$0xff]  ;;  %v10199_v62 = vld [vmem:[#allocation23_spill] sm:$0xff]  ;;  %v10202_v24 = vld [vmem:[#allocation25_spill] sm:$0xff] }
 0x252   : > { %v6766_v38 = vcombine.low %v5792_v5, %v5802_v57  ;;  %v5124_v33 = vsel %vm7488_vm10, %v5122_v19, %v5123_v3  ;;  %v9463_v39 = vpop.f32.mrf.mxu1  ;;  %v1573_v3 = vadd.f32 %v8674_v50, %v8475_v46  ;;  %v1576_v1 = vadd.f32 %v8698_v61, %v8503_v15  ;;  %v10203_v46 = vld [vmem:[#allocation50_spill] sm:$0xff]  ;;  %v10204_v23 = vld [vmem:[#allocation36_spill] sm:$0xff]  ;;  %v10205_v40 = vld [vmem:[#allocation37_spill] sm:$0xff] }
 0x253   : > { %v6733_v4 = vcombine.low %v5121_v45, %v5124_v33  ;;  %v9471_v55 = vpop.f32.mrf.mxu0  ;;  %v1597_v58 = vadd.f32 %v10196_v32, %v10195_v42  ;;  %v1589_v28 = vadd.f32 %v10198_v9, %v10197_v41  ;;  %v1600_v35 = vadd.f32 %v10200_v20, %v10199_v62  ;;  %v10206_v15 = vld [vmem:[#allocation38_spill] sm:$0xff]  ;;  %v10209_v33 = vld [vmem:[#allocation92_spill] sm:$0xff]  ;;  %v10210_v42 = vld [vmem:[#allocation39_spill] sm:$0xff] }
 0x254   : > { %7245 = vmatmul.mubr.msk.bf16.gmra.mxu0 %vm1193_vm5, %v6766_v38  ;;  %v2322_v7 = vadd.f32 %v10201_v31, %v1565_v25  ;;  %v7125_v59 = vpop.f32.mrf.mxu1  ;;  %v1592_v50 = vadd.f32 %v10203_v46, %v10202_v24  ;;  %v2320_v43 = vadd.f32 %v10204_v23, %v1557_v18  ;;  %v2323_v45 = vadd.f32 %v10205_v40, %v1568_v22  ;;  %v10207_v5 = vld [vmem:[#allocation26_spill] sm:$0xff]  ;;  %v10211_v25 = vld [vmem:[#allocation40_spill] sm:$0xff]  ;;  %v10214_v22 = vld [vmem:[#allocation41_spill] sm:$0xff] }
 0x255   : > { %7211 = vmatmul.mubr.msk.bf16.gmra.mxu1 %vm1193_vm5, %v6733_v4  ;;  %v2321_v61 = vadd.f32 %v10206_v15, %v1560_v56  ;;  %v9493_v19 = vpop.f32.mrf.mxu0  ;;  %v10208_v57 = vld [vmem:[#allocation82_spill] sm:$0xff]  ;;  %v2326_v32 = vadd.f32 %v10210_v42, %v1581_v2  ;;  %v2324_v41 = vadd.f32 %v10211_v25, %v1573_v3  ;;  %v10213_v20 = vld [vmem:[#allocation96_spill] sm:$0xff]  ;;  %v2327_v24 = vadd.f32 %v10214_v22, %v1584_v21  ;;  %v10216_v15 = vld [vmem:[#allocation43_spill] sm:$0xff] }
 0x256   : > { %v1656_v38 = vadd.f32 %v10208_v57, %v10207_v5  ;;  %v3048_v4 = vadd.f32 %v10209_v33, %v2322_v7  ;;  %v10212_v9 = vld [vmem:[#allocation94_spill] sm:$0xff]  ;;  %v3049_v31 = vadd.f32 %v10213_v20, %v2323_v45  ;;  %v2330_v7 = vadd.f32 %v10216_v15, %v1597_v58  ;;  %v4098_v5 = vpop.f32.mrf.mxu1  ;;  %v10217_v3 = vld [vmem:[#allocation45_spill] sm:$0xff]  ;;  %v10221_v25 = vld [vmem:[#allocation104_spill] sm:$0xff] }
 0x257   : > { %v3046_v62 = vadd.f32 %v10212_v9, %v2320_v43  ;;  %v3047_v18 = vadd.f32 %v9033_v13, %v2321_v61  ;;  %v3052_v56 = vadd.f32 %v9045_v51, %v2326_v32  ;;  %v3050_v46 = vadd.f32 %v9055_v48, %v2324_v41  ;;  %v10215_v23 = vld [vmem:[#allocation42_spill] sm:$0xff]  ;;  %v10218_v43 = vld [vmem:[#allocation47_spill] sm:$0xff]  ;;  %v10219_v45 = vld [vmem:[#allocation49_spill] sm:$0xff] }
 0x258   : > { %v2325_v40 = vadd.f32 %v10215_v23, %v1576_v1  ;;  %v3053_v2 = vadd.f32 %v9067_v54, %v2327_v24  ;;  %v2328_v57 = vadd.f32 %v10217_v3, %v1589_v28  ;;  %v2331_v33 = vadd.f32 %v10218_v43, %v1600_v35  ;;  %v10220_v61 = vld [vmem:[#allocation102_spill] sm:$0xff]  ;;  %v10222_v32 = vld [vmem:[#allocation81_spill] sm:$0xff]  ;;  %v10225_v54 = vld [vmem:[#allocation91_spill] sm:$0xff] }
 0x259   : > { %v2329_v42 = vadd.f32 %v10219_v45, %v1592_v50  ;;  %v3056_v51 = vadd.f32 %v10221_v25, %v2330_v7  ;;  %v2345_v48 = vadd.f32 %v10222_v32, %v1656_v38  ;;  %v10223_v41 = vld [vmem:[#allocation106_spill] sm:$0xff]  ;;  %v10224_v9 = vld [vmem:[#allocation109_spill] sm:$0xff]  ;;  %v3518_v22 = vadd.f32 %v10225_v54, %v3048_v4  ;;  %v10227_v50 = vld [vmem:[#allocation95_spill] sm:$0xff] }
 0x25a   : > { %v3051_v21 = vadd.f32 %v10220_v61, %v2325_v40  ;;  %v3054_v1 = vadd.f32 %v10223_v41, %v2328_v57  ;;  %v3057_v58 = vadd.f32 %v9119_v47, %v2331_v33  ;;  %v10226_v35 = vld [vmem:[#allocation93_spill] sm:$0xff]  ;;  %v3519_v23 = vadd.f32 %v10227_v50, %v3049_v31  ;;  %v10229_v38 = vld [vmem:[#allocation98_spill] sm:$0xff]  ;;  %v10230_v57 = vld [vmem:[#allocation99_spill] sm:$0xff] }
 0x25b   : > { %v3055_v20 = vadd.f32 %v10224_v9, %v2329_v42  ;;  %v3071_v28 = vadd.f32 %v9358_v52, %v2345_v48  ;;  %v3516_v24 = vadd.f32 %v10226_v35, %v3046_v62  ;;  %v10228_v15 = vld [vmem:[#allocation97_spill] sm:$0xff]  ;;  %v4196_v7 = vadd.f32 %v9423_v26, %v3518_v22  ;;  %v10231_v47 = vld [vmem:[#allocation100_spill] sm:$0xff]  ;;  %v10235_v9 = vld [vmem:[#allocation107_spill] sm:$0xff] }
 0x25c   : > { %v3517_v40 = vadd.f32 %v10228_v15, %v3047_v18  ;;  %v3522_v43 = vadd.f32 %v10229_v38, %v3052_v56  ;;  %v3520_v45 = vadd.f32 %v10230_v57, %v3050_v46  ;;  %v3523_v33 = vadd.f32 %v10231_v47, %v3053_v2  ;;  %v10232_v62 = vld [vmem:[#allocation101_spill] sm:$0xff]  ;;  %v10233_v18 = vld [vmem:[#allocation103_spill] sm:$0xff]  ;;  %v10236_v35 = vld [vmem:[#allocation108_spill] sm:$0xff] }
 0x25d   : > { %v4194_v4 = vadd.f32 %v9437_v0, %v3516_v24  ;;  %v4197_v52 = vadd.f32 %v9445_v29, %v3519_v23  ;;  %v3521_v25 = vadd.f32 %v10232_v62, %v3051_v21  ;;  %v3526_v48 = vadd.f32 %v10233_v18, %v3056_v51  ;;  %v10234_v41 = vld [vmem:[#allocation105_spill] sm:$0xff]  ;;  %v10238_v51 = vld [vmem:[#allocation52_spill] sm:$0xff]  ;;  %v10247_v62 = vld [vmem:[#allocation55_spill] sm:$0xff] }
 0x25e   : > { %v7162_v13 = vpop.f32.mrf.mxu0  ;;  %v4195_v61 = vadd.f32 %v4082_v12, %v3517_v40  ;;  %v4200_v32 = vadd.f32 %v7124_v30, %v3522_v43  ;;  %v3524_v26 = vadd.f32 %v10234_v41, %v3054_v1  ;;  %v3527_v56 = vadd.f32 %v10235_v9, %v3057_v58  ;;  %v10237_v30 = vld [vmem:[#allocation5_spill] sm:$0xff]  ;;  %v10242_v57 = vld [vmem:[#allocation56_spill] sm:$0xff] }
 0x25f   : > { %v4198_v46 = vadd.f32 %v9463_v39, %v3520_v45  ;;  %v4201_v54 = vadd.f32 %v7125_v59, %v3523_v33  ;;  %v4199_v2 = vadd.f32 %v4098_v5, %v3521_v25  ;;  %v3525_v0 = vadd.f32 %v10236_v35, %v3055_v20  ;;  %v10239_v39 = vld [vmem:[#allocation7_spill] sm:$0xff]  ;;  %v10240_v59 = vld [vmem:[#allocation54_spill] sm:$0xff] }
 0x260   : > { %v4838_v42 = vpop.f32.mrf.mxu0  ;;  %v9536_v21 = vadd.f32 %v9351_v37, %v3071_v28  ;;  %v1613_v23 = vadd.f32 %v10238_v51, %v10237_v30  ;;  %v9541_v58 = vadd.f32 %v9419_v17, %v4196_v7  ;;  %v1605_v5 = vadd.f32 %v10240_v59, %v10239_v39  ;;  %v10244_v33 = vld [vmem:[#allocation11_spill] sm:$0xff]  ;;  %v10255_v39 = vld [vmem:[#allocation60_spill] sm:$0xff] }
 0x261   : > { %v9546_v20 = vadd.f32 %v9427_v44, %v4194_v4  ;;  %v9549_v40 = vadd.f32 %v9439_v49, %v4197_v52  ;;  %v9552_v37 = vadd.f32 %v9451_v34, %v4195_v61  ;;  %v9555_v28 = vadd.f32 %v9457_v14, %v4200_v32  ;;  %v10241_v14 = vld [vmem:[#allocation9_spill] sm:$0xff] }
 0x262   : > { %v7128_v3 = vpop.f32.mrf.mxu1  ;;  %v7163_v12 = vpop.f32.mrf.mxu0  ;;  %v9561_v17 = vadd.f32 %v9471_v55, %v4201_v54  ;;  %v9564_v38 = vadd.f32 %v9493_v19, %v4199_v2  ;;  %v1616_v45 = vadd.f32 %v10242_v57, %v10241_v14  ;;  %v10245_v55 = vld [vmem:[#allocation58_spill] sm:$0xff]  ;;  %v10246_v19 = vld [vmem:[#allocation53_spill] sm:$0xff]  ;;  %v10251_v2 = vld [vmem:[#allocation111_spill] sm:$0xff] }
 0x263   : > { %v4204_v24 = vadd.f32 %v7128_v3, %v3526_v48  ;;  %v9558_v3 = vadd.f32 %v9459_v36, %v4198_v46  ;;  %v10243_v36 = vld [vmem:[#allocation51_spill] sm:$0xff]  ;;  %v1608_v4 = vadd.f32 %v10245_v55, %v10244_v33  ;;  %v2332_v61 = vadd.f32 %v10246_v19, %v1605_v5  ;;  %v10248_v32 = vld [vmem:[#allocation57_spill] sm:$0xff]  ;;  %v10249_v48 = vld [vmem:[#allocation110_spill] sm:$0xff] }
 0x264   : > { %v4111_v31 = vpop.f32.mrf.mxu1  ;;  %v4841_v7 = vpop.f32.mrf.mxu0  ;;  %v2334_v47 = vadd.f32 %v10243_v36, %v1613_v23  ;;  %v2335_v25 = vadd.f32 %v10247_v62, %v1616_v45  ;;  %v10256_v14 = vld [vmem:[#allocation13_spill] sm:$0xff]  ;;  %v10257_v57 = vld [vmem:[#allocation62_spill] sm:$0xff]  ;;  %v10259_v33 = vld [vmem:[#allocation64_spill] sm:$0xff] }
 0x265   : > { %v4202_v29 = vadd.f32 %v4111_v31, %v3524_v26  ;;  %v9566_v44 = vadd.f32 %v7162_v13, %v4204_v24  ;;  %v2333_v18 = vadd.f32 %v10248_v32, %v1608_v4  ;;  %v1621_v45 = vadd.f32 %v10257_v57, %v10256_v14  ;;  %v10260_v4 = vld [vmem:[#allocation59_spill] sm:$0xff]  ;;  %v10261_v19 = vld [vmem:[#allocation14_spill] sm:$0xff]  ;;  %v10263_v62 = vld [vmem:[#allocation61_spill] sm:$0xff] }
 0x266   : > { %v7129_v22 = vpop.f32.mrf.mxu1  ;;  %v3060_v52 = vadd.f32 %v9140_v11, %v2334_v47  ;;  %v3061_v31 = vadd.f32 %v9160_v8, %v2335_v25  ;;  %v10258_v47 = vld [vmem:[#allocation3_spill] sm:$0xff]  ;;  %v10273_v57 = vld [vmem:[#allocation68_spill] sm:$0xff] }
 0x267   : > { %v4205_v50 = vadd.f32 %v7129_v22, %v3527_v56  ;;  %v9568_v49 = vadd.f32 %v4838_v42, %v4202_v29  ;;  %v3058_v42 = vadd.f32 %v9152_v6, %v2332_v61  ;;  %v10250_v56 = vld [vmem:[#allocation114_spill] sm:$0xff]  ;;  %v1632_v55 = vadd.f32 %v10259_v33, %v10258_v47  ;;  %v10272_v14 = vld [vmem:[#allocation15_spill] sm:$0xff] }
 0x268   : > { %v4114_v1 = vpop.f32.mrf.mxu1  ;;  %v3530_v41 = vadd.f32 %v10249_v48, %v3060_v52  ;;  %v3059_v46 = vadd.f32 %v10250_v56, %v2333_v18  ;;  %v10262_v61 = vld [vmem:[#allocation66_spill] sm:$0xff]  ;;  %v2336_v25 = vadd.f32 %v10263_v62, %v1621_v45  ;;  %v10264_v18 = vld [vmem:[#allocation63_spill] sm:$0xff]  ;;  %v1645_v45 = vadd.f32 %v10273_v57, %v10272_v14 }
 0x269   : > { %v4203_v15 = vadd.f32 %v4114_v1, %v3525_v0  ;;  %v9570_v43 = vadd.f32 %v7163_v12, %v4205_v50  ;;  %v3528_v11 = vadd.f32 %v10251_v2, %v3058_v42  ;;  %v10252_v0 = vld [vmem:[#allocation112_spill] sm:$0xff]  ;;  %v10253_v50 = vld [vmem:[#allocation113_spill] sm:$0xff]  ;;  %v2339_v48 = vadd.f32 %v10264_v18, %v1632_v55  ;;  %v10280_v18 = vld [vmem:[#allocation74_spill] sm:$0xff] }
 0x26a   : > { %v3531_v24 = vadd.f32 %v10252_v0, %v3061_v31  ;;  %v3529_v30 = vadd.f32 %v10253_v50, %v3059_v46  ;;  %v10254_v1 = vld [vmem:[#allocation12_spill] sm:$0xff]  ;;  %v3062_v32 = vadd.f32 %v9214_v27, %v2336_v25  ;;  %v10267_v46 = vld [vmem:[#allocation115_spill] sm:$0xff] }
 0x26b   : > { %v9572_v34 = vadd.f32 %v4841_v7, %v4203_v15  ;;  %v1629_v59 = vadd.f32 %v10255_v39, %v10254_v1  ;;  %v10271_v39 = vld [vmem:[#allocation119_spill] sm:$0xff] }
 0x26c   : > { %v10278_v25 = vld [vmem:[#allocation67_spill] sm:$0xff] }
 0x26d   : > { %v2338_v52 = vadd.f32 %v10260_v4, %v1629_v59  ;;  %v10274_v4 = vld [vmem:[#allocation16_spill] sm:$0xff] }
 0x26f   : > { %v3064_v42 = vadd.f32 %v9198_v53, %v2338_v52  ;;  %v10275_v52 = vld [vmem:[#allocation70_spill] sm:$0xff] }
 0x270   : > { %v7166_v13 = vpop.f32.mrf.mxu0 }
 0x272   : > { %v4854_v9 = vpop.f32.mrf.mxu0 }
 0x274   : > { %v7132_v26 = vpop.f32.mrf.mxu1  ;;  %v7167_v29 = vpop.f32.mrf.mxu0 }
 0x275   : > { %v4208_v54 = vadd.f32 %v7132_v26, %v3530_v41  ;;  %v10265_v41 = vld [vmem:[#allocation118_spill] sm:$0xff] }
 0x276   : > { %v4127_v22 = vpop.f32.mrf.mxu1  ;;  %v4857_v7 = vpop.f32.mrf.mxu0  ;;  %v3065_v26 = vadd.f32 %v10265_v41, %v2339_v48 }
 0x277   : > { %v4206_v35 = vadd.f32 %v4127_v22, %v3528_v11  ;;  %v9589_v6 = vadd.f32 %v7166_v13, %v4208_v54  ;;  %v1624_v13 = vadd.f32 %v10262_v61, %v10261_v19  ;;  %v3534_v54 = vadd.f32 %v10267_v46, %v3064_v42  ;;  %v10268_v22 = vld [vmem:[#allocation120_spill] sm:$0xff] }
 0x278   : > { %v7133_v12 = vpop.f32.mrf.mxu1  ;;  %v1637_v19 = vadd.f32 %v10275_v52, %v10274_v4  ;;  %v10277_v42 = vld [vmem:[#allocation72_spill] sm:$0xff] }
 0x279   : > { %v4209_v8 = vadd.f32 %v7133_v12, %v3531_v24  ;;  %v9592_v51 = vadd.f32 %v4854_v9, %v4206_v35  ;;  %v10266_v9 = vld [vmem:[#allocation65_spill] sm:$0xff]  ;;  %v10269_v24 = vld [vmem:[#allocation116_spill] sm:$0xff] }
 0x27a   : > { %v4130_v23 = vpop.f32.mrf.mxu1  ;;  %v2337_v56 = vadd.f32 %v10266_v9, %v1624_v13  ;;  %v3532_v53 = vadd.f32 %v10269_v24, %v3062_v32  ;;  %v10276_v13 = vld [vmem:[#allocation17_spill] sm:$0xff]  ;;  %v10279_v32 = vld [vmem:[#allocation18_spill] sm:$0xff] }
 0x27b   : > { %v4207_v5 = vadd.f32 %v4130_v23, %v3529_v30  ;;  %v9596_v15 = vadd.f32 %v7167_v29, %v4209_v8  ;;  %v10270_v8 = vld [vmem:[#allocation117_spill] sm:$0xff]  ;;  %v1648_v62 = vadd.f32 %v10277_v42, %v10276_v13  ;;  %v1640_v48 = vadd.f32 %v10280_v18, %v10279_v32  ;;  %v10291_v13 = vld [vmem:[#allocation76_spill] sm:$0xff]  ;;  %v10292_v32 = vld [vmem:[#allocation22_spill] sm:$0xff] }
 0x27c   : > { %v3063_v35 = vadd.f32 %v10268_v22, %v2337_v56  ;;  %v3535_v50 = vadd.f32 %v10270_v8, %v3065_v26  ;;  %v10281_v26 = vld [vmem:[#allocation69_spill] sm:$0xff]  ;;  %v10286_v8 = vld [vmem:[#allocation126_spill] sm:$0xff] }
 0x27d   : > { %v9600_v36 = vadd.f32 %v4857_v7, %v4207_v5  ;;  %v2340_v9 = vadd.f32 %v10281_v26, %v1637_v19  ;;  %v10285_v24 = vld [vmem:[#allocation121_spill] sm:$0xff]  ;;  %v10290_v19 = vld [vmem:[#allocation20_spill] sm:$0xff]  ;;  %v10293_v18 = vld [vmem:[#allocation78_spill] sm:$0xff] }
 0x27e   : > { %v3533_v59 = vadd.f32 %v10271_v39, %v3063_v35  ;;  %v10284_v35 = vld [vmem:[#allocation73_spill] sm:$0xff]  ;;  %v1661_v42 = vadd.f32 %v10291_v13, %v10290_v19  ;;  %v10294_v26 = vld [vmem:[#allocation4_spill] sm:$0xff] }
 0x27f   : > { %v3066_v46 = vadd.f32 %v9283_v63, %v2340_v9  ;;  %v10295_v9 = vld [vmem:[#allocation28_spill] sm:$0xff] }
 0x280   : > { %v10310_v19 = vld [vmem:[#allocation84_spill] sm:$0xff] }
 0x283   : > { %v7170_v31 = vpop.f32.mrf.mxu0 }
 0x285   : > { %v4870_v11 = vpop.f32.mrf.mxu0 }
 0x287   : > { %v7136_v2 = vpop.f32.mrf.mxu1  ;;  %v7171_v30 = vpop.f32.mrf.mxu0 }
 0x288   : > { %v4212_v0 = vadd.f32 %v7136_v2, %v3534_v54  ;;  %v10282_v54 = vld [vmem:[#allocation71_spill] sm:$0xff] }
 0x289   : > { %v4143_v29 = vpop.f32.mrf.mxu1  ;;  %v4873_v55 = vpop.f32.mrf.mxu0  ;;  %v2343_v2 = vadd.f32 %v10282_v54, %v1648_v62  ;;  %v10297_v54 = vld [vmem:[#allocation80_spill] sm:$0xff] }
 0x28a   : > { %v4210_v12 = vadd.f32 %v4143_v29, %v3532_v53  ;;  %v9617_v27 = vadd.f32 %v7170_v31, %v4212_v0  ;;  %v2342_v31 = vadd.f32 %v10278_v25, %v1645_v45  ;;  %v2341_v0 = vadd.f32 %v10284_v35, %v1640_v48  ;;  %v10299_v35 = vld [vmem:[#allocation6_spill] sm:$0xff] }
 0x28b   : > { %v7137_v23 = vpop.f32.mrf.mxu1  ;;  %v1653_v48 = vadd.f32 %v10293_v18, %v10292_v32  ;;  %v10313_v18 = vld [vmem:[#allocation127_spill] sm:$0xff] }
 0x28c   : > { %v4213_v1 = vadd.f32 %v7137_v23, %v3535_v50  ;;  %v9620_v5 = vadd.f32 %v4870_v11, %v4210_v12  ;;  %v3068_v41 = vadd.f32 %v9271_v60, %v2342_v31  ;;  %v10283_v11 = vld [vmem:[#allocation124_spill] sm:$0xff]  ;;  %v3067_v50 = vadd.f32 %v10286_v8, %v2341_v0  ;;  %v10287_v23 = vld [vmem:[#allocation122_spill] sm:$0xff] }
 0x28d   : > { %v4146_v7 = vpop.f32.mrf.mxu1  ;;  %v3069_v22 = vadd.f32 %v10283_v11, %v2343_v2  ;;  %v3536_v60 = vadd.f32 %v10287_v23, %v3066_v46  ;;  %v10296_v46 = vld [vmem:[#allocation24_spill] sm:$0xff]  ;;  %v10298_v11 = vld [vmem:[#allocation75_spill] sm:$0xff]  ;;  %v10300_v0 = vld [vmem:[#allocation30_spill] sm:$0xff] }
 0x28e   : > { %v4211_v47 = vadd.f32 %v4146_v7, %v3533_v59  ;;  %v9624_v33 = vadd.f32 %v7171_v30, %v4213_v1  ;;  %v3538_v53 = vadd.f32 %v10285_v24, %v3068_v41  ;;  %v10288_v59 = vld [vmem:[#allocation123_spill] sm:$0xff]  ;;  %v1664_v2 = vadd.f32 %v10297_v54, %v10296_v46 }
 0x28f   : > { %v3539_v7 = vadd.f32 %v10288_v59, %v3069_v22  ;;  %v2346_v22 = vadd.f32 %v10298_v11, %v1661_v42  ;;  %v1541_v24 = vadd.f32 %v10300_v0, %v10299_v35  ;;  %v10306_v59 = vld [vmem:[#allocation130_spill] sm:$0xff]  ;;  %v10311_v42 = vld [vmem:[#allocation29_spill] sm:$0xff]  ;;  %v10317_v35 = vld [vmem:[#allocation88_spill] sm:$0xff] }
 0x290   : > { %v9628_v61 = vadd.f32 %v4873_v55, %v4211_v47  ;;  %v10289_v47 = vld [vmem:[#allocation125_spill] sm:$0xff] }
 0x291   : > { %v3537_v55 = vadd.f32 %v10289_v47, %v3067_v50  ;;  %v10303_v50 = vld [vmem:[#allocation8_spill] sm:$0xff]  ;;  %v10309_v47 = vld [vmem:[#allocation34_spill] sm:$0xff] }
 0x295   : > { %v7174_v56 = vpop.f32.mrf.mxu0 }
 0x297   : > { %v4886_v12 = vpop.f32.mrf.mxu0 }
 0x299   : > { %v7140_v29 = vpop.f32.mrf.mxu1  ;;  %v7175_v14 = vpop.f32.mrf.mxu0 }
 0x29a   : > { %v4216_v30 = vadd.f32 %v7140_v29, %v3538_v53  ;;  %v10301_v53 = vld [vmem:[#allocation128_spill] sm:$0xff] }
 0x29b   : > { %v4159_v1 = vpop.f32.mrf.mxu1  ;;  %v4889_v31 = vpop.f32.mrf.mxu0  ;;  %v3072_v29 = vadd.f32 %v10301_v53, %v2346_v22  ;;  %v10316_v22 = vld [vmem:[#allocation129_spill] sm:$0xff] }
 0x29c   : > { %v4214_v39 = vadd.f32 %v4159_v1, %v3536_v60  ;;  %v9645_v63 = vadd.f32 %v7174_v56, %v4216_v30  ;;  %v1549_v56 = vadd.f32 %v10295_v9, %v10294_v26  ;;  %v10304_v30 = vld [vmem:[#allocation32_spill] sm:$0xff]  ;;  %v10305_v1 = vld [vmem:[#allocation27_spill] sm:$0xff]  ;;  %v10318_v53 = vld [vmem:[#allocation33_spill] sm:$0xff] }
 0x29d   : > { %v7141_v57 = vpop.f32.mrf.mxu1  ;;  %v1552_v23 = vadd.f32 %v10304_v30, %v10303_v50  ;;  %v10314_v26 = vld [vmem:[#allocation31_spill] sm:$0xff] }
 0x29e   : > { %v4217_v45 = vadd.f32 %v7141_v57, %v3539_v7  ;;  %v9648_v4 = vadd.f32 %v4886_v12, %v4214_v39  ;;  %v10302_v12 = vld [vmem:[#allocation77_spill] sm:$0xff]  ;;  %v2318_v39 = vadd.f32 %v10305_v1, %v1549_v56  ;;  %v10315_v56 = vld [vmem:[#allocation86_spill] sm:$0xff]  ;;  %v10319_v30 = vld [vmem:[#allocation83_spill] sm:$0xff] }
 0x29f   : > { %v4162_v52 = vpop.f32.mrf.mxu1  ;;  %v2344_v8 = vadd.f32 %v10302_v12, %v1653_v48  ;;  %v3542_v48 = vadd.f32 %v10313_v18, %v3072_v29  ;;  %v2319_v9 = vadd.f32 %v10314_v26, %v1552_v23  ;;  %v10321_v23 = vld [vmem:[#allocation90_spill] sm:$0xff] }
 0x2a0   : > { %v4215_v62 = vadd.f32 %v4162_v52, %v3537_v55  ;;  %v9652_v25 = vadd.f32 %v7175_v14, %v4217_v45  ;;  %v10307_v14 = vld [vmem:[#allocation79_spill] sm:$0xff]  ;;  %v10308_v45 = vld [vmem:[#allocation10_spill] sm:$0xff]  ;;  %v3044_v13 = vadd.f32 %v10310_v19, %v2318_v39 }
 0x2a1   : > { %v3070_v7 = vadd.f32 %v10306_v59, %v2344_v8  ;;  %v2347_v57 = vadd.f32 %v10307_v14, %v1664_v2  ;;  %v1544_v55 = vadd.f32 %v10309_v47, %v10308_v45  ;;  %v3045_v0 = vadd.f32 %v10317_v35, %v2319_v9  ;;  %v10320_v39 = vld [vmem:[#allocation131_spill] sm:$0xff]  ;;  %v10322_v47 = vld [vmem:[#allocation85_spill] sm:$0xff]  ;;  %v10325_v9 = vld [vmem:[#allocation136_spill] sm:$0xff] }
 0x2a2   : > { %v9656_v41 = vadd.f32 %v4889_v31, %v4215_v62  ;;  %v2316_v62 = vadd.f32 %v10311_v42, %v1541_v24  ;;  %v10312_v31 = vld [vmem:[#allocation132_spill] sm:$0xff]  ;;  %v3514_v24 = vadd.f32 %v10319_v30, %v3044_v13  ;;  %v10323_v13 = vld [vmem:[#allocation87_spill] sm:$0xff] }
 0x2a3   : > { %v3073_v32 = vadd.f32 %v10312_v31, %v2347_v57  ;;  %v3540_v2 = vadd.f32 %v10316_v22, %v3070_v7  ;;  %v2317_v12 = vadd.f32 %v10318_v53, %v1544_v55  ;;  %v3515_v18 = vadd.f32 %v10323_v13, %v3045_v0  ;;  %v10328_v0 = vld [vmem:[#allocation134_spill] sm:$0xff] }
 0x2a4   : > { %v3042_v54 = vadd.f32 %v10315_v56, %v2316_v62  ;;  %v4192_v45 = vadd.f32 %v9377_v16, %v3514_v24  ;;  %v10326_v16 = vld [vmem:[#allocation133_spill] sm:$0xff]  ;;  %v10329_v24 = vld [vmem:[#allocation135_spill] sm:$0xff] }
 0x2a5   : > { %v3543_v59 = vadd.f32 %v10320_v39, %v3073_v32  ;;  %v3043_v14 = vadd.f32 %v10321_v23, %v2317_v12  ;;  %v6237_v39 = vpop.permute.xlu1 %6236 }
 0x2a6   : > { %v3512_v7 = vadd.f32 %v10322_v47, %v3042_v54  ;;  %v4919_v56 = vadd.f32 %v10326_v16, %v4192_v45  ;;  %v6233_v54 = vpop.permute.xlu0 %6232 }
 0x2a8   : > { %v7178_v60 = vpop.f32.mrf.mxu0  ;;  %v4190_v31 = vadd.f32 %v9385_v10, %v3512_v7 }
 0x2aa   : > { %v4902_v52 = vpop.f32.mrf.mxu0  ;;  %v4917_v53 = vadd.f32 %v10328_v0, %v4190_v31 }
 0x2ac   : > { %v7144_v46 = vpop.f32.mrf.mxu1  ;;  %v7179_v50 = vpop.f32.mrf.mxu0 }
 0x2ad   : > { %v4220_v11 = vadd.f32 %v7144_v46, %v3542_v48  ;;  %v10324_v48 = vld [vmem:[#allocation89_spill] sm:$0xff]  ;;  %v4193_v46 = vadd.f32 %v10325_v9, %v3515_v18 }
 0x2ae   : > { %v4175_v8 = vpop.f32.mrf.mxu1  ;;  %v4905_v55 = vpop.f32.mrf.mxu0  ;;  %v3513_v26 = vadd.f32 %v10324_v48, %v3043_v14  ;;  %v10330_v14 = vld [vmem:[#allocation137_spill] sm:$0xff] }
 0x2af   : > { %v4218_v1 = vadd.f32 %v4175_v8, %v3540_v2  ;;  %v9685_v29 = vadd.f32 %v7178_v60, %v4220_v11  ;;  %v10327_v11 = vld [vmem:[#allocation138_spill] sm:$0xff] }
 0x2b0   : > { %v7145_v57 = vpop.f32.mrf.mxu1  ;;  %v4191_v22 = vadd.f32 %v10327_v11, %v3513_v26  ;;  %v6239_v26 = vpop.permute.xlu1 %6238 }
 0x2b1   : > { %v4221_v19 = vadd.f32 %v7145_v57, %v3543_v59  ;;  %v9690_v42 = vadd.f32 %v4902_v52, %v4218_v1  ;;  %v4920_v1 = vadd.f32 %v10329_v24, %v4193_v46 }
 0x2b2   : > { %v4178_v62 = vpop.f32.mrf.mxu1  ;;  %v4918_v57 = vadd.f32 %v10330_v14, %v4191_v22 }
 0x2b3   : > { %v4219_v32 = vadd.f32 %v4178_v62, %v9536_v21  ;;  %v9695_v60 = vadd.f32 %v7179_v50, %v4221_v19  ;;  %v9707_v21 = vld [vmem:[%s9911_s2] ss:$0 sm:$0xff] }
 0x2b5   : > { %v9700_v52 = vadd.f32 %v4905_v55, %v4219_v32  ;;  %v6235_v55 = vpop.permute.xlu0 %6234 }
 0x2b7   : > { %v7218_v2 = vpop.f32.mrf.mxu0  ;;  %v7184_v10 = vpop.f32.mrf.mxu1 }
 0x2b8   : > { %v5389_v35 = vadd.f32 %v7184_v10, %v4919_v56 }
 0x2b9   : > { %v5938_v12 = vpop.f32.mrf.mxu0  ;;  %v5260_v8 = vpop.f32.mrf.mxu1 }
 0x2ba   : > { %v6067_v50 = vadd.f32 %v7218_v2, %v5389_v35  ;;  %v5387_v30 = vadd.f32 %v5260_v8, %v4917_v53  ;;  %v6241_v16 = vpop.permute.xlu0 %6240  ;;  %v6243_v35 = vpop.permute.xlu1 %6242 }
 0x2bb   : > { %v7219_v59 = vpop.f32.mrf.mxu0  ;;  %v7185_v23 = vpop.f32.mrf.mxu1 }
 0x2bc   : > { %v6106_v45 = vadd.f32 %v9707_v21, %v6067_v50  ;;  %v6065_v47 = vadd.f32 %v5938_v12, %v5387_v30  ;;  %v5390_v7 = vadd.f32 %v7185_v23, %v4920_v1 }
 0x2bd   : > { %v5263_v19 = vpop.f32.mrf.mxu1  ;;  %v5941_v18 = vpop.f32.mrf.mxu0 }
 0x2be   : > { %6138 = vst.msk [vmem:[%s9715_s30 + $0x10] sm:$0xff] %vm1193_vm5, %v6106_v45  ;;  %v6104_v62 = vadd.f32 %v9707_v21, %v6065_v47  ;;  %v6068_v31 = vadd.f32 %v7219_v59, %v5390_v7  ;;  %v5388_v13 = vadd.f32 %v5263_v19, %v4918_v57  ;;  %v6247_v23 = vpop.permute.xlu1 %6246 }
 0x2bf   : > { %6331 = vst.msk [vmem:[%s9715_s30 + $0x10] sm:$0xff] %vm6328_vm0, %v6237_v39 }
 0x2c0   : > { %6136 = vst.msk [vmem:[%s9715_s30] sm:$0xff] %vm1193_vm5, %v6104_v62  ;;  %v6107_v32 = vadd.f32 %v9707_v21, %v6068_v31  ;;  %v6066_v48 = vadd.f32 %v5941_v18, %v5388_v13 }
 0x2c1   : > { %6329 = vst.msk [vmem:[%s9715_s30] sm:$0xff] %vm6328_vm0, %v6233_v54 }
 0x2c2   : > { %6139 = vst.msk [vmem:[%s9715_s30 + $0x18] sm:$0xff] %vm1193_vm5, %v6107_v32  ;;  %v6105_v9 = vadd.f32 %v9707_v21, %v6066_v48  ;;  %v6251_v31 = vpop.permute.xlu1 %6250 }
 0x2c3   : > { %6332 = vst.msk [vmem:[%s9715_s30 + $0x18] sm:$0xff] %vm6328_vm0, %v6239_v26 }
 0x2c4   : > { %v7222_v46 = vpop.f32.mrf.mxu0  ;;  %6137 = vst.msk [vmem:[%s9715_s30 + $0x8] sm:$0xff] %vm1193_vm5, %v6105_v9  ;;  %v7188_v56 = vpop.f32.mrf.mxu1 }
 0x2c5   : > { %v5393_v11 = vadd.f32 %v7188_v56, %v9541_v58  ;;  %6330 = vst.msk [vmem:[%s9715_s30 + $0x8] sm:$0xff] %vm6328_vm0, %v6235_v55  ;;  %v6245_v58 = vpop.permute.xlu0 %6244 }
 0x2c6   : > { %v5954_v22 = vpop.f32.mrf.mxu0  ;;  %v5276_v2 = vpop.f32.mrf.mxu1 }
 0x2c7   : > { %v6071_v54 = vadd.f32 %v7222_v46, %v5393_v11  ;;  %v5391_v10 = vadd.f32 %v5276_v2, %v9546_v20 }
 0x2c8   : > { %v7223_v0 = vpop.f32.mrf.mxu0  ;;  %v7189_v53 = vpop.f32.mrf.mxu1 }
 0x2c9   : > { %v6110_v12 = vadd.f32 %v9707_v21, %v6071_v54  ;;  %v6069_v8 = vadd.f32 %v5954_v22, %v5391_v10  ;;  %v5394_v50 = vadd.f32 %v7189_v53, %v9549_v40  ;;  %v6255_v22 = vpop.permute.xlu1 %6254 }
 0x2ca   : > { %v5279_v30 = vpop.f32.mrf.mxu1  ;;  %v5957_v39 = vpop.f32.mrf.mxu0 }
 0x2cb   : > { %6142 = vst.msk [vmem:[%s9715_s30 + $0x30] sm:$0xff] %vm1193_vm5, %v6110_v12  ;;  %v6108_v24 = vadd.f32 %v9707_v21, %v6069_v8  ;;  %v6072_v1 = vadd.f32 %v7223_v0, %v5394_v50  ;;  %v5392_v20 = vadd.f32 %v5279_v30, %v9552_v37  ;;  %v6249_v37 = vpop.permute.xlu0 %6248 }
 0x2cc   : > { %6335 = vst.msk [vmem:[%s9715_s30 + $0x30] sm:$0xff] %vm6328_vm0, %v6245_v58 }
 0x2cd   : > { %6140 = vst.msk [vmem:[%s9715_s30 + $0x20] sm:$0xff] %vm1193_vm5, %v6108_v24  ;;  %v6111_v59 = vadd.f32 %v9707_v21, %v6072_v1  ;;  %v6070_v40 = vadd.f32 %v5957_v39, %v5392_v20  ;;  %v6259_v50 = vpop.permute.xlu1 %6258 }
 0x2ce   : > { %6333 = vst.msk [vmem:[%s9715_s30 + $0x20] sm:$0xff] %vm6328_vm0, %v6241_v16 }
 0x2cf   : > { %6143 = vst.msk [vmem:[%s9715_s30 + $0x38] sm:$0xff] %vm1193_vm5, %v6111_v59  ;;  %v6109_v14 = vadd.f32 %v9707_v21, %v6070_v40 }
 0x2d0   : > { %6336 = vst.msk [vmem:[%s9715_s30 + $0x38] sm:$0xff] %vm6328_vm0, %v6247_v23 }
 0x2d1   : > { %v7226_v57 = vpop.f32.mrf.mxu0  ;;  %6141 = vst.msk [vmem:[%s9715_s30 + $0x28] sm:$0xff] %vm1193_vm5, %v6109_v14 }
 0x2d2   : > { %v7192_v45 = vpop.f32.mrf.mxu1  ;;  %6334 = vst.msk [vmem:[%s9715_s30 + $0x28] sm:$0xff] %vm6328_vm0, %v6243_v35 }
 0x2d3   : > { %v5397_v47 = vadd.f32 %v7192_v45, %v9555_v28  ;;  %v5970_v7 = vpop.f32.mrf.mxu0  ;;  %v6253_v28 = vpop.permute.xlu0 %6252 }
 0x2d4   : > { %v5292_v19 = vpop.f32.mrf.mxu1 }
 0x2d5   : > { %v6075_v55 = vadd.f32 %v7226_v57, %v5397_v47  ;;  %v5395_v62 = vadd.f32 %v5292_v19, %v9558_v3  ;;  %v7227_v13 = vpop.f32.mrf.mxu0  ;;  %v6263_v57 = vpop.permute.xlu1 %6262 }
 0x2d6   : > { %v7193_v18 = vpop.f32.mrf.mxu1 }
 0x2d7   : > { %v6114_v32 = vadd.f32 %v9707_v21, %v6075_v55  ;;  %v6073_v48 = vadd.f32 %v5970_v7, %v5395_v62  ;;  %v5398_v26 = vadd.f32 %v7193_v18, %v9561_v17  ;;  %v5973_v56 = vpop.f32.mrf.mxu0 }
 0x2d8   : > { %v5295_v9 = vpop.f32.mrf.mxu1 }
 0x2d9   : > { %6146 = vst.msk [vmem:[%s9715_s30 + $0x50] sm:$0xff] %vm1193_vm5, %v6114_v32  ;;  %v6112_v46 = vadd.f32 %v9707_v21, %v6073_v48  ;;  %v6076_v16 = vadd.f32 %v7227_v13, %v5398_v26  ;;  %v5396_v3 = vadd.f32 %v5295_v9, %v9564_v38  ;;  %v6257_v38 = vpop.permute.xlu0 %6256  ;;  %v6267_v13 = vpop.permute.xlu1 %6266 }
 0x2da   : > { %6339 = vst.msk [vmem:[%s9715_s30 + $0x50] sm:$0xff] %vm6328_vm0, %v6253_v28 }
 0x2db   : > { %6144 = vst.msk [vmem:[%s9715_s30 + $0x40] sm:$0xff] %vm1193_vm5, %v6112_v46  ;;  %v6115_v11 = vadd.f32 %v9707_v21, %v6076_v16  ;;  %v6074_v17 = vadd.f32 %v5973_v56, %v5396_v3 }
 0x2dc   : > { %6337 = vst.msk [vmem:[%s9715_s30 + $0x40] sm:$0xff] %vm6328_vm0, %v6249_v37 }
 0x2dd   : > { %6147 = vst.msk [vmem:[%s9715_s30 + $0x58] sm:$0xff] %vm1193_vm5, %v6115_v11  ;;  %v6113_v2 = vadd.f32 %v9707_v21, %v6074_v17  ;;  %v6271_v11 = vpop.permute.xlu1 %6270 }
 0x2de   : > { %v7230_v54 = vpop.f32.mrf.mxu0  ;;  %6340 = vst.msk [vmem:[%s9715_s30 + $0x58] sm:$0xff] %vm6328_vm0, %v6255_v22 }
 0x2df   : > { %6145 = vst.msk [vmem:[%s9715_s30 + $0x48] sm:$0xff] %vm1193_vm5, %v6113_v2  ;;  %v7196_v10 = vpop.f32.mrf.mxu1 }
 0x2e0   : > { %v5401_v35 = vadd.f32 %v7196_v10, %v9566_v44  ;;  %6338 = vst.msk [vmem:[%s9715_s30 + $0x48] sm:$0xff] %vm6328_vm0, %v6251_v31  ;;  %v5986_v0 = vpop.f32.mrf.mxu0  ;;  %v6261_v44 = vpop.permute.xlu0 %6260 }
 0x2e1   : > { %v5308_v53 = vpop.f32.mrf.mxu1 }
 0x2e2   : > { %v6079_v12 = vadd.f32 %v7230_v54, %v5401_v35  ;;  %v5399_v8 = vadd.f32 %v5308_v53, %v9568_v49  ;;  %v7231_v58 = vpop.f32.mrf.mxu0  ;;  %v6275_v53 = vpop.permute.xlu1 %6274 }
 0x2e3   : > { %v7197_v30 = vpop.f32.mrf.mxu1 }
 0x2e4   : > { %v6118_v24 = vadd.f32 %v9707_v21, %v6079_v12  ;;  %v6077_v1 = vadd.f32 %v5986_v0, %v5399_v8  ;;  %v5402_v20 = vadd.f32 %v7197_v30, %v9570_v43  ;;  %v5989_v23 = vpop.f32.mrf.mxu0 }
 0x2e5   : > { %v5311_v39 = vpop.f32.mrf.mxu1 }
 0x2e6   : > { %6150 = vst.msk [vmem:[%s9715_s30 + $0x70] sm:$0xff] %vm1193_vm5, %v6118_v24  ;;  %v6116_v59 = vadd.f32 %v9707_v21, %v6077_v1  ;;  %v6080_v40 = vadd.f32 %v7231_v58, %v5402_v20  ;;  %v5400_v49 = vadd.f32 %v5311_v39, %v9572_v34  ;;  %v6265_v34 = vpop.permute.xlu0 %6264 }
 0x2e7   : > { %6343 = vst.msk [vmem:[%s9715_s30 + $0x70] sm:$0xff] %vm6328_vm0, %v6261_v44 }
 0x2e8   : > { %6148 = vst.msk [vmem:[%s9715_s30 + $0x60] sm:$0xff] %vm1193_vm5, %v6116_v59  ;;  %v6119_v14 = vadd.f32 %v9707_v21, %v6080_v40  ;;  %v6078_v43 = vadd.f32 %v5989_v23, %v5400_v49  ;;  %v6279_v59 = vpop.permute.xlu1 %6278 }
 0x2e9   : > { %6341 = vst.msk [vmem:[%s9715_s30 + $0x60] sm:$0xff] %vm6328_vm0, %v6257_v38 }
 0x2ea   : > { %6151 = vst.msk [vmem:[%s9715_s30 + $0x78] sm:$0xff] %vm1193_vm5, %v6119_v14  ;;  %v6117_v37 = vadd.f32 %v9707_v21, %v6078_v43 }
 0x2eb   : > { %6344 = vst.msk [vmem:[%s9715_s30 + $0x78] sm:$0xff] %vm6328_vm0, %v6263_v57 }
 0x2ec   : > { %v7234_v45 = vpop.f32.mrf.mxu0  ;;  %6149 = vst.msk [vmem:[%s9715_s30 + $0x68] sm:$0xff] %vm1193_vm5, %v6117_v37 }
 0x2ed   : > { %v7200_v47 = vpop.f32.mrf.mxu1  ;;  %6342 = vst.msk [vmem:[%s9715_s30 + $0x68] sm:$0xff] %vm6328_vm0, %v6259_v50 }
 0x2ee   : > { %v5405_v7 = vadd.f32 %v7200_v47, %v9589_v6  ;;  %v6002_v19 = vpop.f32.mrf.mxu0  ;;  %v6269_v6 = vpop.permute.xlu0 %6268 }
 0x2ef   : > { %v5324_v55 = vpop.f32.mrf.mxu1 }
 0x2f0   : > { %v6083_v62 = vadd.f32 %v7234_v45, %v5405_v7  ;;  %v5403_v31 = vadd.f32 %v5324_v55, %v9592_v51  ;;  %v7235_v18 = vpop.f32.mrf.mxu0 }
 0x2f1   : > { %v7201_v32 = vpop.f32.mrf.mxu1 }
 0x2f2   : > { %v6122_v48 = vadd.f32 %v9707_v21, %v6083_v62  ;;  %v6081_v26 = vadd.f32 %v6002_v19, %v5403_v31  ;;  %v5406_v28 = vadd.f32 %v7201_v32, %v9596_v15  ;;  %v6005_v3 = vpop.f32.mrf.mxu0 }
 0x2f3   : > { %v5327_v9 = vpop.f32.mrf.mxu1 }
 0x2f4   : > { %6154 = vst.msk [vmem:[%s9715_s30 + $0x90] sm:$0xff] %vm1193_vm5, %v6122_v48  ;;  %v6120_v46 = vadd.f32 %v9707_v21, %v6081_v26  ;;  %v6084_v16 = vadd.f32 %v7235_v18, %v5406_v28  ;;  %v5404_v51 = vadd.f32 %v5327_v9, %v9600_v36  ;;  %v6273_v36 = vpop.permute.xlu0 %6272 }
 0x2f5   : > { %6347 = vst.msk [vmem:[%s9715_s30 + $0x90] sm:$0xff] %vm6328_vm0, %v6269_v6 }
 0x2f6   : > { %6152 = vst.msk [vmem:[%s9715_s30 + $0x80] sm:$0xff] %vm1193_vm5, %v6120_v46  ;;  %v6123_v56 = vadd.f32 %v9707_v21, %v6084_v16  ;;  %v6082_v15 = vadd.f32 %v6005_v3, %v5404_v51 }
 0x2f7   : > { %6345 = vst.msk [vmem:[%s9715_s30 + $0x80] sm:$0xff] %vm6328_vm0, %v6265_v34  ;;  %v6283_v34 = vpop.permute.xlu1 %6282 }
 0x2f8   : > { %6155 = vst.msk [vmem:[%s9715_s30 + $0x98] sm:$0xff] %vm1193_vm5, %v6123_v56  ;;  %v6121_v17 = vadd.f32 %v9707_v21, %v6082_v15 }
 0x2f9   : > { %v7238_v22 = vpop.f32.mrf.mxu0  ;;  %6348 = vst.msk [vmem:[%s9715_s30 + $0x98] sm:$0xff] %vm6328_vm0, %v6271_v11 }
 0x2fa   : > { %6153 = vst.msk [vmem:[%s9715_s30 + $0x88] sm:$0xff] %vm1193_vm5, %v6121_v17  ;;  %v7204_v2 = vpop.f32.mrf.mxu1 }
 0x2fb   : > { %v5409_v54 = vadd.f32 %v7204_v2, %v9617_v27  ;;  %6346 = vst.msk [vmem:[%s9715_s30 + $0x88] sm:$0xff] %vm6328_vm0, %v6267_v13  ;;  %v6018_v38 = vpop.f32.mrf.mxu0  ;;  %v6277_v27 = vpop.permute.xlu0 %6276 }
 0x2fc   : > { %v5340_v10 = vpop.f32.mrf.mxu1  ;;  %v6287_v26 = vpop.permute.xlu1 %6286 }
 0x2fd   : > { %v6087_v35 = vadd.f32 %v7238_v22, %v5409_v54  ;;  %v5407_v0 = vadd.f32 %v5340_v10, %v9620_v5  ;;  %v7239_v12 = vpop.f32.mrf.mxu0 }
 0x2fe   : > { %v7205_v8 = vpop.f32.mrf.mxu1 }
 0x2ff   : > { %v6126_v50 = vadd.f32 %v9707_v21, %v6087_v35  ;;  %v6085_v58 = vadd.f32 %v6018_v38, %v5407_v0  ;;  %v5410_v30 = vadd.f32 %v7205_v8, %v9624_v33  ;;  %v6021_v44 = vpop.f32.mrf.mxu0 }
 0x300   : > { %v5343_v24 = vpop.f32.mrf.mxu1  ;;  %v6291_v15 = vpop.permute.xlu1 %6290 }
 0x301   : > { %6158 = vst.msk [vmem:[%s9715_s30 + $0xb0] sm:$0xff] %vm1193_vm5, %v6126_v50  ;;  %v6124_v1 = vadd.f32 %v9707_v21, %v6085_v58  ;;  %v6088_v20 = vadd.f32 %v7239_v12, %v5410_v30  ;;  %v5408_v5 = vadd.f32 %v5343_v24, %v9628_v61  ;;  %v6281_v61 = vpop.permute.xlu0 %6280 }
 0x302   : > { %6351 = vst.msk [vmem:[%s9715_s30 + $0xb0] sm:$0xff] %vm6328_vm0, %v6277_v27 }
 0x303   : > { %6156 = vst.msk [vmem:[%s9715_s30 + $0xa0] sm:$0xff] %vm1193_vm5, %v6124_v1  ;;  %v6127_v39 = vadd.f32 %v9707_v21, %v6088_v20  ;;  %v6086_v33 = vadd.f32 %v6021_v44, %v5408_v5 }
 0x304   : > { %6349 = vst.msk [vmem:[%s9715_s30 + $0xa0] sm:$0xff] %vm6328_vm0, %v6273_v36 }
 0x305   : > { %6159 = vst.msk [vmem:[%s9715_s30 + $0xb8] sm:$0xff] %vm1193_vm5, %v6127_v39  ;;  %v6125_v40 = vadd.f32 %v9707_v21, %v6086_v33 }
 0x306   : > { %6352 = vst.msk [vmem:[%s9715_s30 + $0xb8] sm:$0xff] %vm6328_vm0, %v6279_v59 }
 0x307   : > { %v7242_v49 = vpop.f32.mrf.mxu0  ;;  %6157 = vst.msk [vmem:[%s9715_s30 + $0xa8] sm:$0xff] %vm1193_vm5, %v6125_v40 }
 0x308   : > { %v7208_v23 = vpop.f32.mrf.mxu1  ;;  %6350 = vst.msk [vmem:[%s9715_s30 + $0xa8] sm:$0xff] %vm6328_vm0, %v6275_v53  ;;  %v6295_v53 = vpop.permute.xlu1 %6294 }
 0x309   : > { %v5413_v14 = vadd.f32 %v7208_v23, %v9645_v63  ;;  %v6034_v43 = vpop.f32.mrf.mxu0  ;;  %v6285_v63 = vpop.permute.xlu0 %6284 }
 0x30a   : > { %v5356_v57 = vpop.f32.mrf.mxu1 }
 0x30b   : > { %v6091_v37 = vadd.f32 %v7242_v49, %v5413_v14  ;;  %v5411_v45 = vadd.f32 %v5356_v57, %v9648_v4  ;;  %v7243_v47 = vpop.f32.mrf.mxu0 }
 0x30c   : > { %v7209_v7 = vpop.f32.mrf.mxu1 }
 0x30d   : > { %v6130_v19 = vadd.f32 %v9707_v21, %v6091_v37  ;;  %v6089_v55 = vadd.f32 %v6034_v43, %v5411_v45  ;;  %v5414_v62 = vadd.f32 %v7209_v7, %v9652_v25  ;;  %v6037_v32 = vpop.f32.mrf.mxu0 }
 0x30e   : > { %v5359_v31 = vpop.f32.mrf.mxu1 }
 0x30f   : > { %6162 = vst.msk [vmem:[%s9715_s30 + $0xd0] sm:$0xff] %vm1193_vm5, %v6130_v19  ;;  %v6128_v13 = vadd.f32 %v9707_v21, %v6089_v55  ;;  %v6092_v18 = vadd.f32 %v7243_v47, %v5414_v62  ;;  %v5412_v4 = vadd.f32 %v5359_v31, %v9656_v41  ;;  %v6289_v41 = vpop.permute.xlu0 %6288 }
 0x310   : > { %6355 = vst.msk [vmem:[%s9715_s30 + $0xd0] sm:$0xff] %vm6328_vm0, %v6285_v63 }
 0x311   : > { %6160 = vst.msk [vmem:[%s9715_s30 + $0xc0] sm:$0xff] %vm1193_vm5, %v6128_v13  ;;  %v6131_v48 = vadd.f32 %v9707_v21, %v6092_v18  ;;  %v6090_v25 = vadd.f32 %v6037_v32, %v5412_v4 }
 0x312   : > { %6353 = vst.msk [vmem:[%s9715_s30 + $0xc0] sm:$0xff] %vm6328_vm0, %v6281_v61 }
 0x313   : > { %6163 = vst.msk [vmem:[%s9715_s30 + $0xd8] sm:$0xff] %vm1193_vm5, %v6131_v48  ;;  %v6129_v28 = vadd.f32 %v9707_v21, %v6090_v25 }
 0x314   : > { %v7246_v6 = vpop.f32.mrf.mxu0  ;;  %6356 = vst.msk [vmem:[%s9715_s30 + $0xd8] sm:$0xff] %vm6328_vm0, %v6287_v26 }
 0x315   : > { %6161 = vst.msk [vmem:[%s9715_s30 + $0xc8] sm:$0xff] %vm1193_vm5, %v6129_v28  ;;  %v7212_v9 = vpop.f32.mrf.mxu1 }
 0x316   : > { %v5417_v46 = vadd.f32 %v7212_v9, %v9685_v29  ;;  %6354 = vst.msk [vmem:[%s9715_s30 + $0xc8] sm:$0xff] %vm6328_vm0, %v6283_v34  ;;  %v6050_v16 = vpop.f32.mrf.mxu0  ;;  %v6293_v29 = vpop.permute.xlu0 %6292 }
 0x317   : > { %v5372_v51 = vpop.f32.mrf.mxu1 }
 0x318   : > { %v6095_v3 = vadd.f32 %v7246_v6, %v5417_v46  ;;  %v5415_v56 = vadd.f32 %v5372_v51, %v9690_v42  ;;  %v7247_v11 = vpop.f32.mrf.mxu0 }
 0x319   : > { %v7213_v17 = vpop.f32.mrf.mxu1 }
 0x31a   : > { %v6134_v22 = vadd.f32 %v9707_v21, %v6095_v3  ;;  %v6093_v36 = vadd.f32 %v6050_v16, %v5415_v56  ;;  %v5418_v2 = vadd.f32 %v7213_v17, %v9695_v60  ;;  %v6053_v35 = vpop.f32.mrf.mxu0 }
 0x31b   : > { %v5375_v54 = vpop.f32.mrf.mxu1 }
 0x31c   : > { %6166 = vst.msk [vmem:[%s9715_s30 + $0xf0] sm:$0xff] %vm1193_vm5, %v6134_v22  ;;  %v6132_v38 = vadd.f32 %v9707_v21, %v6093_v36  ;;  %v6096_v42 = vadd.f32 %v7247_v11, %v5418_v2  ;;  %v5416_v10 = vadd.f32 %v5375_v54, %v9700_v52 }
 0x31d   : > { %6359 = vst.msk [vmem:[%s9715_s30 + $0xf0] sm:$0xff] %vm6328_vm0, %v6293_v29 }
 0x31e   : > { %6164 = vst.msk [vmem:[%s9715_s30 + $0xe0] sm:$0xff] %vm1193_vm5, %v6132_v38  ;;  %v6135_v0 = vadd.f32 %v9707_v21, %v6096_v42  ;;  %v6094_v60 = vadd.f32 %v6053_v35, %v5416_v10 }
 0x31f   : > { %6357 = vst.msk [vmem:[%s9715_s30 + $0xe0] sm:$0xff] %vm6328_vm0, %v6289_v41 }
 0x320   : > { %6167 = vst.msk [vmem:[%s9715_s30 + $0xf8] sm:$0xff] %vm1193_vm5, %v6135_v0  ;;  %v6133_v12 = vadd.f32 %v9707_v21, %v6094_v60 }
 0x321   : > { %6360 = vst.msk [vmem:[%s9715_s30 + $0xf8] sm:$0xff] %vm6328_vm0, %v6295_v53 }
 0x322   : > { %6165 = vst.msk [vmem:[%s9715_s30 + $0xe8] sm:$0xff] %vm1193_vm5, %v6133_v12 }
 0x323   : > { %6358 = vst.msk [vmem:[%s9715_s30 + $0xe8] sm:$0xff] %vm6328_vm0, %v6291_v15 }
 0x324 PF: > { %s14_s15 = sadd.s32 1, %s7347_s15  }
 0x325   : > { %p11_p4 = scmp.ge.s32.totalorder %s14_s15, 4  }
 0x327   :  { %13 = sbr.rel (!%p11_p4) target bundleno = 1 (0x1), region = 80 }

</bundles_post_ra>
